<compile_context>
chip_gen: v7x
topology: tpu7x:2x2x1
jax: 0.10.0
libtpu: 0.0.40
codegen_flags: <defaults>
</compile_context>

<pallas_src>
import functools

import jax
import jax.numpy as jnp
from jax import lax
from jax.experimental import pallas as pl
from jax.experimental.pallas import tpu as pltpu


# ----------------------------- fused MHA kernel ------------------------------
def _fused_mha_kernel(x_ref, wqkv_ref, bqkv_ref, wo_ref, bo_ref, o_ref, *,
                      num_heads, head_dim, scale):
    P, C = x_ref.shape

    # QKV projection: bf16 operands on the MXU, f32 accumulation, f32 bias epilogue.
    xb = x_ref[...].astype(jnp.bfloat16)
    qkv = jnp.dot(xb, wqkv_ref[...], preferred_element_type=jnp.float32)
    qkv = qkv + bqkv_ref[...]                                   # (P, 3C) f32

    # torch: qkv.reshape(P, 3, H, D) -> flat column index = s*C + h*D + d.
    heads_out = []
    for h in range(num_heads):
        q_off = h * head_dim
        k_off = C + h * head_dim
        v_off = 2 * C + h * head_dim
        # Fold the softmax scale into q (touches P*D, not P*P).
        q_h = (qkv[:, q_off:q_off + head_dim] * scale).astype(jnp.bfloat16)
        k_h = qkv[:, k_off:k_off + head_dim].astype(jnp.bfloat16)
        v_h = qkv[:, v_off:v_off + head_dim].astype(jnp.bfloat16)

        # (P, P) scores: contract last dims of q and k directly (no .T relayout).
        s = lax.dot_general(q_h, k_h, (((1,), (1,)), ((), ())),
                            preferred_element_type=jnp.float32)
        m = jnp.max(s, axis=-1, keepdims=True)
        p = jnp.exp(s - m)
        p = p * pl.reciprocal(jnp.sum(p, axis=-1, keepdims=True), approx=True)
        # TODO(synk): attn_dropout omitted (reference default p=0.0 -> identity).

        o_h = jnp.dot(p.astype(jnp.bfloat16), v_h,
                      preferred_element_type=jnp.float32)       # (P, D) f32
        heads_out.append(o_h)

    # torch: out.transpose(1, 2).reshape(P, C) == concat heads along lanes.
    o = jnp.concatenate(heads_out, axis=-1)                     # (P, C) f32, lane-dense

    # Output projection: keep attention output in f32 (no extra bf16 rounding).
    out = jnp.dot(o, wo_ref[...].astype(jnp.float32),
                  preferred_element_type=jnp.float32) + bo_ref[...]
    o_ref[...] = out.astype(o_ref.dtype)


def _fused_vmem_estimate_bytes(P, C):
    """Rough per-grid-step VMEM footprint (double-buffered operands + temps)."""
    x_blk = P * C * 4 * 2
    out_blk = P * C * 4 * 2
    wqkv = C * 3 * C * 2 * 2
    wo = C * C * 2 * 2
    temps = P * 3 * C * 4 + P * P * 4 + 2 * P * C * 4
    return x_blk + out_blk + wqkv + wo + temps


# ----------------------------------- model -----------------------------------
def init_mha_params(key, embed_dim):
    """Canonical (torch-layout) f32 params, as nn.Linear would hold them."""
    k1, k2, k3, k4 = jax.random.split(key, 4)
    s = embed_dim ** -0.5
    return {
        "qkv_w": s * jax.random.normal(k1, (3 * embed_dim, embed_dim), jnp.float32),
        "qkv_b": 0.01 * jax.random.normal(k2, (3 * embed_dim,), jnp.float32),
        "out_w": s * jax.random.normal(k3, (embed_dim, embed_dim), jnp.float32),
        "out_b": 0.01 * jax.random.normal(k4, (embed_dim,), jnp.float32),
    }


def prepare_kernel_params(params):
    """One-time prep: pre-transpose to (K, N) and cast weights to bf16 so the
    jitted forward never pays a per-call HBM transpose/cast pass."""
    return {
        "qkv_w_t": jnp.transpose(params["qkv_w"]).astype(jnp.bfloat16),   # (C, 3C)
        "qkv_b": params["qkv_b"].reshape(1, -1).astype(jnp.float32),      # (1, 3C)
        "out_w_t": jnp.transpose(params["out_w"]).astype(jnp.bfloat16),   # (C, C)
        "out_b": params["out_b"].reshape(1, -1).astype(jnp.float32),      # (1, C)
    }


@functools.partial(jax.jit, static_argnames=("num_heads", "attn_dropout"))
def mha_forward(kparams, x, *, num_heads, attn_dropout=0.0):
    """x: (B, P, C) f32 -> (B, P, C) f32. Matches MultiHeadAttention.forward."""
    if attn_dropout != 0.0:
        raise NotImplementedError("attn_dropout > 0 not supported by this kernel")
    B, P, C = x.shape
    if C % num_heads != 0:
        raise ValueError("embed_dim must be divisible by num_heads")
    D = C // num_heads
    scale = D ** -0.5

    # Fully-fused path assumes one batch element's working set fits VMEM.
    # TODO(synk): add a tiled (per-head / K-split) fallback for very large P or C.
    if _fused_vmem_estimate_bytes(P, C) > 24 * 1024 * 1024:
        raise ValueError("shape too large for the fused single-block MHA kernel")

    kernel = functools.partial(_fused_mha_kernel,
                               num_heads=num_heads, head_dim=D, scale=scale)

    return pl.pallas_call(
        kernel,
        out_shape=jax.ShapeDtypeStruct((B, P, C), jnp.float32),
        grid_spec=pltpu.PrefetchScalarGridSpec(
            num_scalar_prefetch=0,
            grid=(B,),
            in_specs=[
                pl.BlockSpec((None, P, C), lambda b: (b, 0, 0)),   # x (cast in-kernel)
                pl.BlockSpec((C, 3 * C), lambda b: (0, 0)),        # qkv_w^T bf16
                pl.BlockSpec((1, 3 * C), lambda b: (0, 0)),        # qkv_b f32
                pl.BlockSpec((C, C), lambda b: (0, 0)),            # out_w^T bf16
                pl.BlockSpec((1, C), lambda b: (0, 0)),            # out_b f32
            ],
            out_specs=pl.BlockSpec((None, P, C), lambda b: (b, 0, 0)),
        ),
        compiler_params=pltpu.CompilerParams(
            dimension_semantics=("parallel",)),
    )(x, kparams["qkv_w_t"], kparams["qkv_b"], kparams["out_w_t"], kparams["out_b"])


# ---------------------------- pure-JAX reference ------------------------------
def mha_reference(params, x, *, num_heads):
    B, P, C = x.shape
    D = C // num_heads
    qkv = x @ params["qkv_w"].T + params["qkv_b"]
    qkv = qkv.reshape(B, P, 3, num_heads, D).transpose(0, 3, 2, 1, 4)   # (B, H, 3, P, D)
    q, k, v = qkv[:, :, 0], qkv[:, :, 1], qkv[:, :, 2]
    q = q * (D ** -0.5)
    attn = jax.nn.softmax(jnp.einsum("bhqd,bhkd->bhqk", q, k), axis=-1)
    o = jnp.einsum("bhqk,bhkd->bhqd", attn, v)
    o = o.transpose(0, 2, 1, 3).reshape(B, P, C)
    return o @ params["out_w"].T + params["out_b"]


if __name__ == "__main__":
    B, P, C, NUM_HEADS = 2, 128, 128, 4

    key = jax.random.PRNGKey(0)
    kp, kx = jax.random.split(key)
    params = init_mha_params(kp, C)
    kparams = prepare_kernel_params(params)
    x = jax.random.normal(kx, (B, P, C), jnp.float32)

    out = mha_forward(kparams, x, num_heads=NUM_HEADS)
    jax.block_until_ready(out)
    assert out.shape == (B, P, C) and out.dtype == jnp.float32
    assert bool(jnp.isfinite(out).all())

    ref = mha_reference(params, x, num_heads=NUM_HEADS)
    err = float(jnp.max(jnp.abs(out - ref)))
    assert err < 1e-1, f"max abs error vs f32 reference: {err}"   # bf16 matmul tolerance

    print("KERNEL_OK")
</pallas_src>

<mosaic_0001>
module attributes {stable_mosaic.version = 11 : i64} {
  func.func @_fused_mha_kernel(%arg0: i32, %arg1: memref<1x128x128xf32, #tpu.memory_space<vmem>>, %arg2: memref<128x384xbf16, #tpu.memory_space<vmem>>, %arg3: memref<1x384xf32, #tpu.memory_space<vmem>>, %arg4: memref<128x128xbf16, #tpu.memory_space<vmem>>, %arg5: memref<1x128xf32, #tpu.memory_space<vmem>>, %arg6: memref<1x128x128xf32, #tpu.memory_space<vmem>>) attributes {dimension_semantics = [#tpu.dimension_semantics<parallel>], iteration_bounds = array<i64: 2>, scalar_prefetch = 0 : i64, scratch_operands = 0 : i64, tpu.core_type = #tpu.core_type<tc>, window_params = [{transform_indices = @transform_0, window_bounds = array<i64: 1, 128, 128>}, {pipeline_mode = #tpu.pipeline_mode<synchronous>, transform_indices = @transform_1, window_bounds = array<i64: 128, 384>}, {pipeline_mode = #tpu.pipeline_mode<synchronous>, transform_indices = @transform_2, window_bounds = array<i64: 1, 384>}, {pipeline_mode = #tpu.pipeline_mode<synchronous>, transform_indices = @transform_3, window_bounds = array<i64: 128, 128>}, {pipeline_mode = #tpu.pipeline_mode<synchronous>, transform_indices = @transform_4, window_bounds = array<i64: 1, 128>}, {transform_indices = @transform_5, window_bounds = array<i64: 1, 128, 128>}]} {
    %c0 = arith.constant 0 : index
    %c0_0 = arith.constant 0 : index
    %c0_1 = arith.constant 0 : index
    %0 = vector.load %arg1[%c0, %c0_0, %c0_1] : memref<1x128x128xf32, #tpu.memory_space<vmem>>, vector<1x128x128xf32>
    %1 = vector.shape_cast %0 : vector<1x128x128xf32> to vector<128x128xf32>
    %2 = arith.truncf %1 : vector<128x128xf32> to vector<128x128xbf16>
    %c0_2 = arith.constant 0 : index
    %c0_3 = arith.constant 0 : index
    %3 = vector.load %arg2[%c0_2, %c0_3] : memref<128x384xbf16, #tpu.memory_space<vmem>>, vector<128x384xbf16>
    %cst = arith.constant dense<0.000000e+00> : vector<128x384xf32>
    %4 = tpu.matmul %2, %3, %cst {dimension_numbers = #tpu.dot_dimension_numbers<[1], [0], [0], [1], [0, 0, 1, 1], [], []>} : vector<128x128xbf16>, vector<128x384xbf16>, vector<128x384xf32> -> vector<128x384xf32>
    %c0_4 = arith.constant 0 : index
    %c0_5 = arith.constant 0 : index
    %5 = vector.load %arg3[%c0_4, %c0_5] : memref<1x384xf32, #tpu.memory_space<vmem>>, vector<1x384xf32>
    %6 = vector.broadcast %5 : vector<1x384xf32> to vector<128x384xf32>
    %7 = arith.addf %4, %6 : vector<128x384xf32>
    %8 = vector.extract_strided_slice %7 {offsets = [0, 0], sizes = [128, 32], strides = [1, 1]} : vector<128x384xf32> to vector<128x32xf32>
    %cst_6 = arith.constant 0.176776692 : f32
    %9 = vector.broadcast %cst_6 : f32 to vector<128x32xf32>
    %10 = arith.mulf %8, %9 : vector<128x32xf32>
    %11 = arith.truncf %10 : vector<128x32xf32> to vector<128x32xbf16>
    %12 = vector.extract_strided_slice %7 {offsets = [0, 128], sizes = [128, 32], strides = [1, 1]} : vector<128x384xf32> to vector<128x32xf32>
    %13 = arith.truncf %12 : vector<128x32xf32> to vector<128x32xbf16>
    %14 = vector.extract_strided_slice %7 {offsets = [0, 256], sizes = [128, 32], strides = [1, 1]} : vector<128x384xf32> to vector<128x32xf32>
    %15 = arith.truncf %14 : vector<128x32xf32> to vector<128x32xbf16>
    %cst_7 = arith.constant dense<0.000000e+00> : vector<128x128xf32>
    %16 = tpu.matmul %11, %13, %cst_7 {dimension_numbers = #tpu.dot_dimension_numbers<[1], [1], [0], [0], [0, 0, 1, 0], [], []>} : vector<128x32xbf16>, vector<128x32xbf16>, vector<128x128xf32> -> vector<128x128xf32>
    %cst_8 = arith.constant dense<0xFF800000> : vector<128xf32>
    %17 = vector.multi_reduction <maximumf>, %16, %cst_8 [1] : vector<128x128xf32> to vector<128xf32>
    %18 = vector.shape_cast %17 : vector<128xf32> to vector<128x1xf32>
    %19 = vector.broadcast %18 : vector<128x1xf32> to vector<128x128xf32>
    %20 = arith.subf %16, %19 : vector<128x128xf32>
    %21 = math.exp %20 : vector<128x128xf32>
    %cst_9 = arith.constant dense<0.000000e+00> : vector<128xf32>
    %22 = vector.multi_reduction <add>, %21, %cst_9 [1] : vector<128x128xf32> to vector<128xf32>
    %23 = vector.shape_cast %22 : vector<128xf32> to vector<128x1xf32>
    %24 = tpu.reciprocal %23 {approx = true} : vector<128x1xf32> -> vector<128x1xf32>
    %25 = vector.broadcast %24 : vector<128x1xf32> to vector<128x128xf32>
    %26 = arith.mulf %21, %25 : vector<128x128xf32>
    %27 = arith.truncf %26 : vector<128x128xf32> to vector<128x128xbf16>
    %cst_10 = arith.constant dense<0.000000e+00> : vector<128x32xf32>
    %28 = tpu.matmul %27, %15, %cst_10 {dimension_numbers = #tpu.dot_dimension_numbers<[1], [0], [0], [1], [0, 0, 1, 1], [], []>} : vector<128x128xbf16>, vector<128x32xbf16>, vector<128x32xf32> -> vector<128x32xf32>
    %29 = vector.extract_strided_slice %7 {offsets = [0, 32], sizes = [128, 32], strides = [1, 1]} : vector<128x384xf32> to vector<128x32xf32>
    %cst_11 = arith.constant 0.176776692 : f32
    %30 = vector.broadcast %cst_11 : f32 to vector<128x32xf32>
    %31 = arith.mulf %29, %30 : vector<128x32xf32>
    %32 = arith.truncf %31 : vector<128x32xf32> to vector<128x32xbf16>
    %33 = vector.extract_strided_slice %7 {offsets = [0, 160], sizes = [128, 32], strides = [1, 1]} : vector<128x384xf32> to vector<128x32xf32>
    %34 = arith.truncf %33 : vector<128x32xf32> to vector<128x32xbf16>
    %35 = vector.extract_strided_slice %7 {offsets = [0, 288], sizes = [128, 32], strides = [1, 1]} : vector<128x384xf32> to vector<128x32xf32>
    %36 = arith.truncf %35 : vector<128x32xf32> to vector<128x32xbf16>
    %cst_12 = arith.constant dense<0.000000e+00> : vector<128x128xf32>
    %37 = tpu.matmul %32, %34, %cst_12 {dimension_numbers = #tpu.dot_dimension_numbers<[1], [1], [0], [0], [0, 0, 1, 0], [], []>} : vector<128x32xbf16>, vector<128x32xbf16>, vector<128x128xf32> -> vector<128x128xf32>
    %cst_13 = arith.constant dense<0xFF800000> : vector<128xf32>
    %38 = vector.multi_reduction <maximumf>, %37, %cst_13 [1] : vector<128x128xf32> to vector<128xf32>
    %39 = vector.shape_cast %38 : vector<128xf32> to vector<128x1xf32>
    %40 = vector.broadcast %39 : vector<128x1xf32> to vector<128x128xf32>
    %41 = arith.subf %37, %40 : vector<128x128xf32>
    %42 = math.exp %41 : vector<128x128xf32>
    %cst_14 = arith.constant dense<0.000000e+00> : vector<128xf32>
    %43 = vector.multi_reduction <add>, %42, %cst_14 [1] : vector<128x128xf32> to vector<128xf32>
    %44 = vector.shape_cast %43 : vector<128xf32> to vector<128x1xf32>
    %45 = tpu.reciprocal %44 {approx = true} : vector<128x1xf32> -> vector<128x1xf32>
    %46 = vector.broadcast %45 : vector<128x1xf32> to vector<128x128xf32>
    %47 = arith.mulf %42, %46 : vector<128x128xf32>
    %48 = arith.truncf %47 : vector<128x128xf32> to vector<128x128xbf16>
    %cst_15 = arith.constant dense<0.000000e+00> : vector<128x32xf32>
    %49 = tpu.matmul %48, %36, %cst_15 {dimension_numbers = #tpu.dot_dimension_numbers<[1], [0], [0], [1], [0, 0, 1, 1], [], []>} : vector<128x128xbf16>, vector<128x32xbf16>, vector<128x32xf32> -> vector<128x32xf32>
    %50 = vector.extract_strided_slice %7 {offsets = [0, 64], sizes = [128, 32], strides = [1, 1]} : vector<128x384xf32> to vector<128x32xf32>
    %cst_16 = arith.constant 0.176776692 : f32
    %51 = vector.broadcast %cst_16 : f32 to vector<128x32xf32>
    %52 = arith.mulf %50, %51 : vector<128x32xf32>
    %53 = arith.truncf %52 : vector<128x32xf32> to vector<128x32xbf16>
    %54 = vector.extract_strided_slice %7 {offsets = [0, 192], sizes = [128, 32], strides = [1, 1]} : vector<128x384xf32> to vector<128x32xf32>
    %55 = arith.truncf %54 : vector<128x32xf32> to vector<128x32xbf16>
    %56 = vector.extract_strided_slice %7 {offsets = [0, 320], sizes = [128, 32], strides = [1, 1]} : vector<128x384xf32> to vector<128x32xf32>
    %57 = arith.truncf %56 : vector<128x32xf32> to vector<128x32xbf16>
    %cst_17 = arith.constant dense<0.000000e+00> : vector<128x128xf32>
    %58 = tpu.matmul %53, %55, %cst_17 {dimension_numbers = #tpu.dot_dimension_numbers<[1], [1], [0], [0], [0, 0, 1, 0], [], []>} : vector<128x32xbf16>, vector<128x32xbf16>, vector<128x128xf32> -> vector<128x128xf32>
    %cst_18 = arith.constant dense<0xFF800000> : vector<128xf32>
    %59 = vector.multi_reduction <maximumf>, %58, %cst_18 [1] : vector<128x128xf32> to vector<128xf32>
    %60 = vector.shape_cast %59 : vector<128xf32> to vector<128x1xf32>
    %61 = vector.broadcast %60 : vector<128x1xf32> to vector<128x128xf32>
    %62 = arith.subf %58, %61 : vector<128x128xf32>
    %63 = math.exp %62 : vector<128x128xf32>
    %cst_19 = arith.constant dense<0.000000e+00> : vector<128xf32>
    %64 = vector.multi_reduction <add>, %63, %cst_19 [1] : vector<128x128xf32> to vector<128xf32>
    %65 = vector.shape_cast %64 : vector<128xf32> to vector<128x1xf32>
    %66 = tpu.reciprocal %65 {approx = true} : vector<128x1xf32> -> vector<128x1xf32>
    %67 = vector.broadcast %66 : vector<128x1xf32> to vector<128x128xf32>
    %68 = arith.mulf %63, %67 : vector<128x128xf32>
    %69 = arith.truncf %68 : vector<128x128xf32> to vector<128x128xbf16>
    %cst_20 = arith.constant dense<0.000000e+00> : vector<128x32xf32>
    %70 = tpu.matmul %69, %57, %cst_20 {dimension_numbers = #tpu.dot_dimension_numbers<[1], [0], [0], [1], [0, 0, 1, 1], [], []>} : vector<128x128xbf16>, vector<128x32xbf16>, vector<128x32xf32> -> vector<128x32xf32>
    %71 = vector.extract_strided_slice %7 {offsets = [0, 96], sizes = [128, 32], strides = [1, 1]} : vector<128x384xf32> to vector<128x32xf32>
    %cst_21 = arith.constant 0.176776692 : f32
    %72 = vector.broadcast %cst_21 : f32 to vector<128x32xf32>
    %73 = arith.mulf %71, %72 : vector<128x32xf32>
    %74 = arith.truncf %73 : vector<128x32xf32> to vector<128x32xbf16>
    %75 = vector.extract_strided_slice %7 {offsets = [0, 224], sizes = [128, 32], strides = [1, 1]} : vector<128x384xf32> to vector<128x32xf32>
    %76 = arith.truncf %75 : vector<128x32xf32> to vector<128x32xbf16>
    %77 = vector.extract_strided_slice %7 {offsets = [0, 352], sizes = [128, 32], strides = [1, 1]} : vector<128x384xf32> to vector<128x32xf32>
    %78 = arith.truncf %77 : vector<128x32xf32> to vector<128x32xbf16>
    %cst_22 = arith.constant dense<0.000000e+00> : vector<128x128xf32>
    %79 = tpu.matmul %74, %76, %cst_22 {dimension_numbers = #tpu.dot_dimension_numbers<[1], [1], [0], [0], [0, 0, 1, 0], [], []>} : vector<128x32xbf16>, vector<128x32xbf16>, vector<128x128xf32> -> vector<128x128xf32>
    %cst_23 = arith.constant dense<0xFF800000> : vector<128xf32>
    %80 = vector.multi_reduction <maximumf>, %79, %cst_23 [1] : vector<128x128xf32> to vector<128xf32>
    %81 = vector.shape_cast %80 : vector<128xf32> to vector<128x1xf32>
    %82 = vector.broadcast %81 : vector<128x1xf32> to vector<128x128xf32>
    %83 = arith.subf %79, %82 : vector<128x128xf32>
    %84 = math.exp %83 : vector<128x128xf32>
    %cst_24 = arith.constant dense<0.000000e+00> : vector<128xf32>
    %85 = vector.multi_reduction <add>, %84, %cst_24 [1] : vector<128x128xf32> to vector<128xf32>
    %86 = vector.shape_cast %85 : vector<128xf32> to vector<128x1xf32>
    %87 = tpu.reciprocal %86 {approx = true} : vector<128x1xf32> -> vector<128x1xf32>
    %88 = vector.broadcast %87 : vector<128x1xf32> to vector<128x128xf32>
    %89 = arith.mulf %84, %88 : vector<128x128xf32>
    %90 = arith.truncf %89 : vector<128x128xf32> to vector<128x128xbf16>
    %cst_25 = arith.constant dense<0.000000e+00> : vector<128x32xf32>
    %91 = tpu.matmul %90, %78, %cst_25 {dimension_numbers = #tpu.dot_dimension_numbers<[1], [0], [0], [1], [0, 0, 1, 1], [], []>} : vector<128x128xbf16>, vector<128x32xbf16>, vector<128x32xf32> -> vector<128x32xf32>
    %92 = tpu.concatenate %28, %49, %70, %91 in 1 : vector<128x32xf32>, vector<128x32xf32>, vector<128x32xf32>, vector<128x32xf32> -> vector<128x128xf32>
    %c0_26 = arith.constant 0 : index
    %c0_27 = arith.constant 0 : index
    %93 = vector.load %arg4[%c0_26, %c0_27] : memref<128x128xbf16, #tpu.memory_space<vmem>>, vector<128x128xbf16>
    %94 = arith.extf %93 : vector<128x128xbf16> to vector<128x128xf32>
    %cst_28 = arith.constant dense<0.000000e+00> : vector<128x128xf32>
    %95 = tpu.matmul %92, %94, %cst_28 {dimension_numbers = #tpu.dot_dimension_numbers<[1], [0], [0], [1], [0, 0, 1, 1], [], []>} : vector<128x128xf32>, vector<128x128xf32>, vector<128x128xf32> -> vector<128x128xf32>
    %c0_29 = arith.constant 0 : index
    %c0_30 = arith.constant 0 : index
    %96 = vector.load %arg5[%c0_29, %c0_30] : memref<1x128xf32, #tpu.memory_space<vmem>>, vector<1x128xf32>
    %97 = vector.broadcast %96 : vector<1x128xf32> to vector<128x128xf32>
    %98 = arith.addf %95, %97 : vector<128x128xf32>
    %c0_31 = arith.constant 0 : index
    %c0_32 = arith.constant 0 : index
    %c0_33 = arith.constant 0 : index
    %99 = vector.load %arg6[%c0_31, %c0_32, %c0_33] : memref<1x128x128xf32, #tpu.memory_space<vmem>>, vector<1x128x128xf32>
    %100 = vector.shape_cast %99 : vector<1x128x128xf32> to vector<128x128xf32>
    %101 = vector.shape_cast %98 : vector<128x128xf32> to vector<1x128x128xf32>
    tpu.vector_store %arg6[%c0_31, %c0_32, %c0_33], %101 {strides = array<i32>} : memref<1x128x128xf32, #tpu.memory_space<vmem>>, vector<1x128x128xf32>,
    return
  }
  func.func @transform_0(%arg0: i32) -> (i32, i32, i32) {
    %c0_i32 = arith.constant 0 : i32
    %c0_i32_0 = arith.constant 0 : i32
    %c0_i32_1 = arith.constant 0 : i32
    return %arg0, %c0_i32, %c0_i32_0 : i32, i32, i32
  }
  func.func @transform_1(%arg0: i32) -> (i32, i32) {
    %c0_i32 = arith.constant 0 : i32
    %c0_i32_0 = arith.constant 0 : i32
    %c0_i32_1 = arith.constant 0 : i32
    return %c0_i32, %c0_i32_0 : i32, i32
  }
  func.func @transform_2(%arg0: i32) -> (i32, i32) {
    %c0_i32 = arith.constant 0 : i32
    %c0_i32_0 = arith.constant 0 : i32
    %c0_i32_1 = arith.constant 0 : i32
    return %c0_i32, %c0_i32_0 : i32, i32
  }
  func.func @transform_3(%arg0: i32) -> (i32, i32) {
    %c0_i32 = arith.constant 0 : i32
    %c0_i32_0 = arith.constant 0 : i32
    %c0_i32_1 = arith.constant 0 : i32
    return %c0_i32, %c0_i32_0 : i32, i32
  }
  func.func @transform_4(%arg0: i32) -> (i32, i32) {
    %c0_i32 = arith.constant 0 : i32
    %c0_i32_0 = arith.constant 0 : i32
    %c0_i32_1 = arith.constant 0 : i32
    return %c0_i32, %c0_i32_0 : i32, i32
  }
  func.func @transform_5(%arg0: i32) -> (i32, i32, i32) {
    %c0_i32 = arith.constant 0 : i32
    %c0_i32_0 = arith.constant 0 : i32
    %c0_i32_1 = arith.constant 0 : i32
    return %arg0, %c0_i32, %c0_i32_0 : i32, i32, i32
  }
}

</mosaic_0001>

<bundles_post_ra>
// kernel: mha_forward.1
= control target key start
LH: loop header
LB: loop body
LE: loop exit
PB: predicated region body
PF: predicated region fallthrough
CT: control target
= control target key end

     0   :  { %10 = vsyncpa [#allocation3], 0  ;;  %s5950_s0 = inlined_call_operand.hbm [shape: f32[2,128,128], index: 0, kind: input, shape index: {}]   ;;  %s5951_s1 = inlined_call_operand.hbm [shape: bf16[128,384], index: 1, kind: input, shape index: {}]   ;;  %s5952_s2 = inlined_call_operand.vmem [shape: f32[1,384], index: 2, kind: input, shape index: {}]   ;;  %s5953_s3 = inlined_call_operand.hbm [shape: bf16[128,128], index: 3, kind: input, shape index: {}]   ;;  %s5954_s4 = inlined_call_operand.hbm [shape: f32[1,128], index: 4, kind: input, shape index: {}]   ;;  %s5955_s5 = inlined_call_operand.hbm [shape: f32[2,128,128], index: 5, kind: output, shape index: {}]  }
   0x1   :  { %12 = vsyncpa [#allocation3 + $0x1], 0 }
   0x2   :  { %13 = vsyncpa [#allocation6], 0 }
   0x3   :  { %14 = vsyncpa [#allocation9], 0 }
   0x4   :  { %15 = vsyncpa [#allocation4], 0 }
   0x5   :  { %17 = vsyncpa [#allocation4 + $0x1], 0  ;;  %s4516_s18 = smov 0   ;;  %s4518_s19 = smov 0  }
   0x6   :  { %s4520_s20 = smov 0   ;;  %s4522_s21 = smov 0  }
   0x7 LB: > { %s4537_s22 = sadd.s32 4294967295, %s4467_s21   ;;  %s3064_s23 = sadd.s32 4294967294, %s4467_s21   ;;  %s4467_s21 = sphi %s4522_s21, %s6041_s21   ;;  %s4463_s20 = sphi %s4520_s20, %s6040_s20   ;;  %s4459_s19 = sphi %s4518_s19, %s6039_s19   ;;  %s4455_s18 = sphi %s4516_s18, %s6038_s18  }
   0x8   : > { %p43_p0 = scmp.ne.s32.totalorder %s4459_s19, %s4455_s18  ;;  %p5956_p1 = scmp.eq.s32.totalorder %s4537_s22, 0 }
   0x9   : > { %p157_p3 = scmp.eq.s32.totalorder %s3064_s23, 1  ;;  %p3065_p5 = scmp.ge.s32.totalorder %s4467_s21, 1 }
   0xa   : > { %p4546_p4 = por %p5956_p1, %p43_p0  ;;  %p164_p7 = scmp.lt.s32.totalorder %s4467_s21, 3 }
   0xb   : > { %p4551_p6 = por %p157_p3, %p43_p0  ;;  %s4469_s27 = smov [#allocation5]  }
   0xc   : > { %s5965_s24 = scalar_select %p4546_p4, 1, 0 }
   0xd   : > { %s5966_s25 = scalar_select %p4551_p6, 1, 0 }
   0xe   : > { %p4556_p8 = pnand %p3065_p5, %p164_p7  ;;  %s176_s28 = sshll.u32 %s4469_s27, 4  ;;  %s4560_s28 = int_to_ptr.vmem [resolvable:$true] %s176_s28 }
   0xf   : > { %s4470_s30 = smov [#allocation7]   ;;  %s4279_s9 = scalar_lea.hbm %s5951_s1, 3072 }
  0x10   : > { %s5967_s26 = scalar_select %p4556_p8, 1, 0 }
  0x11   : > { %p3798_p9 = pneg %p4556_p8  ;;  %s192_s6 = sshll.u32 %s4470_s30, 4  ;;  %s4571_s6 = int_to_ptr.vmem [resolvable:$true] %s192_s6 }
  0x12   : > { %p4280_p12 = scmp.ne.s32.totalorder %s5951_s1, %s4279_s9  ;;  %p4286_p5 = scmp.lt.u32.totalorder %s4279_s9, %s5951_s1 }
  0x13   : > { %p4567_p11 = pnand %p3798_p9, %p5956_p1 }
  0x15   : > { %p4581_p13 = pneg %p4567_p11 }
  0x17   : > { %p4282_p0 = pnand %p4581_p13, %p4280_p12 }
  0x19   : > { %p4283_p3 = pneg %p4282_p0 }
  0x1b   : > { %p4288_p7 = pnand %p4286_p5, %p4283_p3 }
  0x1d   : > { %4291 = shalt.err (!%p4288_p7)
}
  0x1e   : > { %s4292_s15 = scalar_lea.vmem %s4560_s28, 3072  ;;  %p4300_p2 = scmp.lt.s32.totalorder %s4560_s28, %s4560_s28 }
  0x1f   : > { %p4293_p9 = scmp.ne.s32.totalorder %s4560_s28, %s4292_s15  ;;  %p4301_p6 = scmp.lt.s32.totalorder %s4292_s15, %s4292_s15 }
  0x21   : > { %p4295_p10 = pnand %p4293_p9, %p4581_p13  ;;  %p4302_p12 = por %p4301_p6, %p4300_p2 }
  0x23   : > { %p4296_p1 = pneg %p4295_p10 }
  0x25   : > { %p4303_p0 = pnand %p4302_p12, %p4296_p1 }
  0x27   : > { %4306 = shalt.err (!%p4303_p0)
}
  0x28   : > { %s4471_s16 = smov 192   ;;  %s4472_s17 = smov 12  }
  0x29   : > { %3801 = dma.hbm_to_vmem [thread:$0]  (!%p4567_p11), %s5951_s1, 3072, %s4560_s28, [#allocation6], %s4471_s16, %s4471_s16, %s4472_s17  }
  0x2a   : > { %s4307_s8 = scalar_lea.hbm %s5953_s3, 1024 }
  0x2b   : > { %p4308_p2 = scmp.ne.s32.totalorder %s5953_s3, %s4307_s8  ;;  %p4314_p10 = scmp.lt.u32.totalorder %s4307_s8, %s5953_s3 }
  0x2d   : > { %p4310_p1 = pnand %p4308_p2, %p4581_p13 }
  0x2f   : > { %p4311_p6 = pneg %p4310_p1 }
  0x31   : > { %p4316_p3 = pnand %p4314_p10, %p4311_p6 }
  0x33   : > { %4319 = shalt.err (!%p4316_p3)
}
  0x34   : > { %s4320_s28 = scalar_lea.vmem %s4571_s6, 1024  ;;  %p4328_p12 = scmp.lt.s32.totalorder %s4571_s6, %s4571_s6 }
  0x35   : > { %p4321_p5 = scmp.ne.s32.totalorder %s4571_s6, %s4320_s28  ;;  %p4329_p0 = scmp.lt.s32.totalorder %s4320_s28, %s4320_s28 }
  0x37   : > { %p4323_p7 = pnand %p4321_p5, %p4581_p13  ;;  %p4330_p2 = por %p4329_p0, %p4328_p12 }
  0x39   : > { %p4324_p9 = pneg %p4323_p7 }
  0x3b   : > { %p4331_p1 = pnand %p4330_p2, %p4324_p9 }
  0x3d   : > { %4334 = shalt.err (!%p4331_p1)
}
  0x3e   : > { %s4473_s14 = smov 64   ;;  %s4474_s15 = smov 4  }
  0x3f   : > { %3804 = dma.hbm_to_vmem [thread:$0]  (!%p4567_p11), %s5953_s3, 1024, %s4571_s6, [#allocation6], %s4473_s14, %s4473_s14, %s4474_s15  }
  0x40   : > { %s4475_s23 = smov [#allocation8]   ;;  %s4626_s30 = sadd.s32 1, %s4467_s21  }
  0x41   : > { %s206_s27 = sshll.u32 %s4475_s23, 4  ;;  %s4335_s9 = scalar_lea.hbm %s5954_s4, 16  ;;  %s207_s27 = int_to_ptr.vmem [resolvable:$true] %s206_s27 }
  0x42   : > { %p4336_p6 = scmp.ne.s32.totalorder %s5954_s4, %s4335_s9  ;;  %p4342_p5 = scmp.lt.u32.totalorder %s4335_s9, %s5954_s4 }
  0x44   : > { %p4338_p10 = pnand %p4336_p6, %p4581_p13 }
  0x46   : > { %p4339_p3 = pneg %p4338_p10 }
  0x48   : > { %p4344_p7 = pnand %p4342_p5, %p4339_p3 }
  0x4a   : > { %4347 = shalt.err (!%p4344_p7)
}
  0x4b   : > { %s4348_s6 = scalar_lea.vmem %s207_s27, 16  ;;  %s4355_s14 = scalar_lea.vmem %s207_s27, 32 }
  0x4c   : > { %p4349_p9 = scmp.ne.s32.totalorder %s207_s27, %s4348_s6  ;;  %p4356_p2 = scmp.lt.s32.totalorder %s207_s27, %s207_s27 }
  0x4d   : > { %p4357_p1 = scmp.lt.s32.totalorder %s4355_s14, %s4348_s6 }
  0x4e   : > { %p4351_p12 = pnand %p4349_p9, %p4581_p13 }
  0x4f   : > { %p4358_p4 = por %p4357_p1, %p4356_p2 }
  0x50   : > { %p4352_p0 = pneg %p4351_p12 }
  0x52   : > { %p4359_p8 = pnand %p4358_p4, %p4352_p0 }
  0x54   : > { %4362 = shalt.err (!%p4359_p8)
}
  0x55   : > { %3807 = dma.hbm_to_vmem [thread:$0]  (!%p4567_p11), %s5954_s4, 16, %s207_s27, [#allocation9]  }
  0x56   : > { %s27_s12 = ssub.s32 %s4467_s21, %s4626_s30  ;;  %s30_s17 = sadd.s32 1, %s4463_s20 }
  0x57   : > { %p28_p4 = scmp.eq.s32.totalorder %s27_s12, 0  ;;  %p37_p8 = scmp.ne.s32.totalorder %s4463_s20, %s4459_s19 }
  0x58   : > { %p38_p13 = scmp.eq.s32.totalorder %s4467_s21, 0  ;;  %p3819_p6 = scmp.lt.s32.totalorder %s4467_s21, 2 }
  0x59   : > { %s4654_s29 = scalar_select %p28_p4, %s4463_s20, %s30_s17  }
  0x5a   : > { %p39_p10 = por %p38_p13, %p37_p8  ;;  %p5970_p3 = scmp.eq.s32.totalorder %s4537_s22, 1 }
  0x5b   : > { %s217_s7 = sand.u32 1, %s4463_s20   ;;  %s3141_s8 = sshll.u32 %s4467_s21, 11 }
  0x5c   : > { %p4658_p5 = por %p5970_p3, %p37_p8  ;;  %s3070_s9 = sshll.u32 %s217_s7, 7 }
  0x5d   : > { %s4667_s27 = scalar_lea.hbm %s5950_s0, %s3141_s8  ;;  %s221_s13 = scalar_lea.vmem [#allocation2], %s3070_s9 }
  0x5e   : > { %s228_s28 = sshll.u32 %s221_s13, 4  ;;  %p4669_p11 = pnand %p3819_p6, %p39_p10  ;;  %s4673_s28 = int_to_ptr.vmem [resolvable:$true] %s228_s28 }
  0x5f   : > { %s4675_s14 = scalar_lea.sflag [#allocation3], %s217_s7  ;;  %s4363_s15 = scalar_lea.hbm %s4667_s27, 2048 }
  0x60   : > { %p4364_p7 = scmp.ne.s32.totalorder %s4667_s27, %s4363_s15  ;;  %p4365_p9 = pneg %p4669_p11 }
  0x61   : > { %s4368_s17 = scalar_lea.hbm %s5950_s0, 4096  ;;  %p4369_p2 = scmp.lt.u32.totalorder %s4667_s27, %s5950_s0 }
  0x62   : > { %p4366_p12 = pnand %p4365_p9, %p4364_p7  ;;  %p4370_p1 = scmp.lt.u32.totalorder %s4368_s17, %s4363_s15 }
  0x63   : > { %p4372_p8 = scmp.lt.u32.totalorder %s4363_s15, %s4667_s27 }
  0x64   : > { %p4367_p0 = pneg %p4366_p12  ;;  %p4371_p4 = por %p4370_p1, %p4369_p2 }
  0x66   : > { %p4373_p13 = por %p4372_p8, %p4371_p4 }
  0x68   : > { %p4374_p6 = pnand %p4373_p13, %p4367_p0 }
  0x6a   : > { %4377 = shalt.err (!%p4374_p6)
}
  0x6b   : > { %s4378_s7 = scalar_lea.vmem %s4673_s28, 2048  ;;  %s4476_s10 = smov [#allocation2]  }
  0x6c   : > { %p4379_p10 = scmp.ne.s32.totalorder %s4673_s28, %s4378_s7  ;;  %s4383_s11 = sshll.u32 %s4476_s10, 4  ;;  %s4384_s11 = int_to_ptr.vmem [resolvable:$false] %s4383_s11 }
  0x6d   : > { %s4385_s13 = scalar_lea.vmem %s4384_s11, 4096  ;;  %p4386_p12 = scmp.lt.s32.totalorder %s4673_s28, %s4384_s11 }
  0x6e   : > { %p4381_p3 = pnand %p4379_p10, %p4365_p9  ;;  %p4387_p2 = scmp.lt.s32.totalorder %s4385_s13, %s4378_s7 }
  0x70   : > { %p4382_p7 = pneg %p4381_p3  ;;  %p4388_p1 = por %p4387_p2, %p4386_p12 }
  0x72   : > { %p4389_p4 = pnand %p4388_p1, %p4382_p7 }
  0x74   : > { %4392 = shalt.err (!%p4389_p4)
}
  0x75   : > { %s4477_s15 = smov 128   ;;  %s4478_s16 = smov 8  }
  0x76   : > { %3811 = dma.hbm_to_vmem [thread:$0]  (!%p4669_p11), %s4667_s27, 2048, %s4673_s28, %s4675_s14, %s4477_s15, %s4477_s15, %s4478_s16  }
  0x77   : > { %p5973_p9 = scmp.ne.s32.totalorder %s5967_s26, 0 }
  0x79   : > { %240 = sbr.rel (%p5973_p9) target bundleno = 3503 (0xdaf), region = 40 }
  0x80   : > { %s4706_s12 = sand.u32 1, %s4459_s19   ;;  %p5974_p0 = scmp.ne.s32.totalorder %s5965_s24, 0 }
  0x81   : > { %s3074_s17 = sshll.u32 %s4706_s12, 7  ;;  %s243_s8 = scalar_lea.sflag [#allocation3], %s4706_s12 }
  0x82   : > { %s4712_s9 = scalar_lea.vmem [#allocation2], %s3074_s17 }
  0x83   : > { %4438 = dma.done.wait (%p5974_p0), %s243_s8, 2048  }
  0x84   : > { %4440 = vsyncadd (%p5974_p0), %s243_s8, 4294965248  ;;  %p5975_p11 = scmp.eq.s32.totalorder %s4537_s22, 0 }
  0x86   : > { %4442 = dma.done.wait (%p5975_p11), [#allocation6], 4096   ;;  %p5976_p8 = pmov %p5975_p11 }
  0x88   : > { %4444 = vsyncadd (%p5976_p8), [#allocation6], 4294963200  ;;  %p5977_p13 = pmov %p5976_p8 }
  0x89   : > { %p5978_p6 = pmov %p5976_p8 }
  0x8a   : > { %4446 = dma.done.wait (%p5977_p13), [#allocation9], 16  }
  0x8b   : > { %4448 = vsyncadd (%p5978_p6), [#allocation9], 4294967280  ;;  %v4479_v0 = vmov 0   ;;  %v3991_v1 = vld [vmem:[#allocation5 + $0x4] ss:$12 sps:$4 sm:$0xff]   ;;  %v287_v10 = vld [vmem:[%s4712_s9 + $0x8] sm:$0xff]  ;;  %v344_v49 = vlaneseq }
  0x8c   : > { %519 = vmatprep.mubr.bf16.mxu0 %v4479_v0  ;;  %v3993_v2 = vld [vmem:[#allocation5] ss:$12 sps:$4 sm:$0xff]   ;;  %487 = vmatprep.subr.bf16.mxu0 %v3991_v1  ;;  %v3994_v3 = vld [vmem:[#allocation5 + $0x1c] ss:$12 sps:$4 sm:$0xff]   ;;  %v3996_v4 = vld [vmem:[#allocation5 + $0x18] ss:$12 sps:$4 sm:$0xff]  }
  0x8d   : > { %488 = vmatpush1.bf16.msra.mxu0 %v3993_v2  ;;  %v3997_v5 = vld [vmem:[#allocation5 + $0x34] ss:$12 sps:$4 sm:$0xff]   ;;  %v3999_v6 = vld [vmem:[#allocation5 + $0x30] ss:$12 sps:$4 sm:$0xff]   ;;  %v4000_v7 = vld [vmem:[#allocation5 + $0x4c] ss:$12 sps:$4 sm:$0xff]  }
  0x8e   : > { %489 = vmatprep.subr.bf16.mxu0 %v3994_v3  ;;  %v286_v8 = vld [vmem:[%s4712_s9] sm:$0xff]  ;;  %v4002_v9 = vld [vmem:[#allocation5 + $0x48] ss:$12 sps:$4 sm:$0xff]   ;;  %v4011_v20 = vld [vmem:[#allocation5 + $0x90] ss:$12 sps:$4 sm:$0xff]   ;;  %v345_v50 = vshrl.u32 %v344_v49, 7 }
  0x8f   : > { %v4003_v11 = vld [vmem:[#allocation5 + $0x64] ss:$12 sps:$4 sm:$0xff]   ;;  %v302_v12 = vpack.c.bf16 %v287_v10, %v286_v8  ;;  %v4005_v13 = vld [vmem:[#allocation5 + $0x60] ss:$12 sps:$4 sm:$0xff]   ;;  %v4006_v14 = vld [vmem:[#allocation5 + $0x7c] ss:$12 sps:$4 sm:$0xff]  }
  0x90   : > { %v4015_v15 = vld [vmem:[#allocation5 + $0x8] ss:$12 sps:$4 sm:$0xff]   ;;  %v4016_v16 = vld [vmem:[#allocation5 + $0x20] ss:$12 sps:$4 sm:$0xff]   ;;  %v4008_v17 = vld [vmem:[#allocation5 + $0x78] ss:$12 sps:$4 sm:$0xff]  }
  0x91   : > { %490 = vmatpush1.bf16.msra.mxu0 %v3996_v4  ;;  %3374 = vmatprep.mubr.bf16.mxu1 %v302_v12  ;;  %v4009_v18 = vld [vmem:[#allocation5 + $0x94] ss:$12 sps:$4 sm:$0xff]   ;;  %v4017_v19 = vld [vmem:[#allocation5 + $0x38] ss:$12 sps:$4 sm:$0xff]   ;;  %v4018_v22 = vld [vmem:[#allocation5 + $0x50] ss:$12 sps:$4 sm:$0xff]  }
  0x92   : > { %491 = vmatprep.subr.bf16.mxu0 %v3997_v5  ;;  %3358 = vmatprep.subr.bf16.mxu1 %v4015_v15  ;;  %v4012_v21 = vld [vmem:[#allocation5 + $0xac] ss:$12 sps:$4 sm:$0xff]   ;;  %v4014_v23 = vld [vmem:[#allocation5 + $0xa8] ss:$12 sps:$4 sm:$0xff]   ;;  %v4022_v30 = vld [vmem:[#allocation5 + $0xb0] ss:$12 sps:$4 sm:$0xff]  }
  0x93   : > { %3359 = vmatpush3.bf16.msra.mxu1 %v4015_v15  ;;  %v4019_v24 = vld [vmem:[#allocation5 + $0x68] ss:$12 sps:$4 sm:$0xff]   ;;  %v4020_v25 = vld [vmem:[#allocation5 + $0x80] ss:$12 sps:$4 sm:$0xff]   ;;  %v289_v27 = vld [vmem:[%s4712_s9 + $0x18] sm:$0xff]  ;;  %v346_v51 = vsub.s32 0, %v345_v50 }
  0x94   : > { %3360 = vmatprep.subr.bf16.mxu1 %v4016_v16  ;;  %v288_v26 = vld [vmem:[%s4712_s9 + $0x10] sm:$0xff]  ;;  %v4021_v28 = vld [vmem:[#allocation5 + $0x98] ss:$12 sps:$4 sm:$0xff]   ;;  %v291_v32 = vld [vmem:[%s4712_s9 + $0x28] sm:$0xff]  ;;  %v350_v53 = vsub.s32 1, %v345_v50  ;;  %vm737_vm0 = vcmask 261120  }
  0x95   : > { %492 = vmatpush1.bf16.msra.mxu0 %v3999_v6  ;;  %v303_v29 = vpack.c.bf16 %v289_v27, %v288_v26  ;;  %v290_v31 = vld [vmem:[%s4712_s9 + $0x20] sm:$0xff]  ;;  %v292_v34 = vld [vmem:[%s4712_s9 + $0x30] sm:$0xff]  ;;  %v293_v35 = vld [vmem:[%s4712_s9 + $0x38] sm:$0xff]  ;;  %s4480_s27 = smov 96   ;;  %s4481_s28 = smov 64   ;;  %vm2714_vm1 = vcmask 523264  }
  0x96   : > { %493 = vmatprep.subr.bf16.mxu0 %v4000_v7  ;;  %v304_v33 = vpack.c.bf16 %v291_v32, %v290_v31  ;;  %v305_v36 = vpack.c.bf16 %v293_v35, %v292_v34  ;;  %v294_v37 = vld [vmem:[%s4712_s9 + $0x40] sm:$0xff]  ;;  %v295_v38 = vld [vmem:[%s4712_s9 + $0x48] sm:$0xff]  ;;  %v296_v40 = vld [vmem:[%s4712_s9 + $0x50] sm:$0xff]  ;;  %s4482_s6 = smov 32   ;;  %vm2731_vm2 = vcmask 785408   ;;  %s5881_s14 = scalar_lea.vmem [#allocation10], %s3074_s17 }
  0x97   : > { %3361 = vmatpush3.bf16.msra.mxu1 %v4016_v16  ;;  %v306_v39 = vpack.c.bf16 %v295_v38, %v294_v37  ;;  %v297_v41 = vld [vmem:[%s4712_s9 + $0x58] sm:$0xff]  ;;  %v298_v42 = vld [vmem:[%s4712_s9 + $0x60] sm:$0xff]  ;;  %v299_v43 = vld [vmem:[%s4712_s9 + $0x68] sm:$0xff]  ;;  %s3142_s7 = sshll.u32 %s4537_s22, 11  ;;  %s2962_s10 = sshll.u32 %s5881_s14, 4  ;;  %s5902_s10 = int_to_ptr.vmem [resolvable:$true] %s2962_s10 }
  0x98   : > { %3362 = vmatprep.subr.bf16.mxu1 %v4017_v19  ;;  %v307_v44 = vpack.c.bf16 %v297_v41, %v296_v40  ;;  %v308_v45 = vpack.c.bf16 %v299_v43, %v298_v42  ;;  %v300_v46 = vld [vmem:[%s4712_s9 + $0x70] sm:$0xff]  ;;  %v301_v47 = vld [vmem:[%s4712_s9 + $0x78] sm:$0xff]  ;;  %s5900_s22 = scalar_lea.hbm %s5955_s5, %s3142_s7  ;;  %s2949_s15 = scalar_lea.sflag [#allocation4], %s4706_s12 }
  0x99   : > { %494 = vmatpush1.bf16.msra.mxu0 %v4002_v9  ;;  %v309_v48 = vpack.c.bf16 %v301_v47, %v300_v46  ;;  %v342_v52 = vld [vmem:[%s5952_s2] sm:$0x7]  ;;  %v354_v9 = vsub.s32 2, %v345_v50  ;;  %s4393_s16 = scalar_lea.vmem %s5902_s10, 2048  ;;  %s4483_s17 = smov [#allocation10]  }
  0x9a   : > { %495 = vmatprep.subr.bf16.mxu0 %v4003_v11  ;;  %v4753_v54 = vrot.slane %v342_v52, %v346_v51  ;;  %v4755_v56 = vrot.slane %v342_v52, %v350_v53  ;;  %p4394_p10 = scmp.ne.s32.totalorder %s5902_s10, %s4393_s16  ;;  %s4397_s8 = sshll.u32 %s4483_s17, 4  ;;  %s4398_s8 = int_to_ptr.vmem [resolvable:$false] %s4397_s8 }
  0x9b   : > { %3363 = vmatpush3.bf16.msra.mxu1 %v4017_v19  ;;  %s4399_s9 = scalar_lea.vmem %s4398_s8, 4096  ;;  %p4400_p12 = scmp.lt.s32.totalorder %s5902_s10, %s4398_s8 }
  0x9c   : > { %3364 = vmatprep.subr.bf16.mxu1 %v4018_v22  ;;  %p4395_p3 = pnand %p4394_p10, %p4658_p5  ;;  %p4401_p2 = scmp.lt.s32.totalorder %s4399_s9, %s4393_s16 }
  0x9d   : > { %496 = vmatpush1.bf16.msra.mxu0 %v4005_v13 }
  0x9e   : > { %497 = vmatprep.subr.bf16.mxu0 %v4006_v14  ;;  %p4396_p7 = pneg %p4395_p3  ;;  %p4402_p1 = por %p4401_p2, %p4400_p12 }
  0x9f   : > { %3365 = vmatpush3.bf16.msra.mxu1 %v4018_v22 }
  0xa0   : > { %3366 = vmatprep.subr.bf16.mxu1 %v4019_v24  ;;  %p4403_p4 = pnand %p4402_p1, %p4396_p7 }
  0xa1   : > { %498 = vmatpush1.bf16.msra.mxu0 %v4008_v17  ;;  %v4779_v17 = vrot.slane %v342_v52, %v354_v9 }
  0xa2   : > { %499 = vmatprep.subr.bf16.mxu0 %v4009_v18 }
  0xa3   : > { %3367 = vmatpush3.bf16.msra.mxu1 %v4019_v24 }
  0xa4   : > { %3368 = vmatprep.subr.bf16.mxu1 %v4020_v25 }
  0xa5   : > { %500 = vmatpush1.bf16.msra.mxu0 %v4011_v20 }
  0xa6   : > { %501 = vmatprep.subr.bf16.mxu0 %v4012_v21 }
  0xa7   : > { %3369 = vmatpush3.bf16.msra.mxu1 %v4020_v25 }
  0xa8   : > { %3370 = vmatprep.subr.bf16.mxu1 %v4021_v28 }
  0xa9   : > { %502 = vmatpush1.bf16.msra.mxu0 %v4014_v23 }
  0xab   : > { %3371 = vmatpush3.bf16.msra.mxu1 %v4021_v28 }
  0xac   : > { %520 = vmatmul.mubr.bf16.vlgmr.msra.gmra.mrb[0].mxu0 %v302_v12  ;;  %3372 = vmatprep.subr.bf16.mxu1 %v4022_v30 }
  0xad   : > { %529 = vmatprep.mubr.bf16.mxu0 %v4479_v0 }
  0xaf   : > { %3373 = vmatpush3.bf16.msra.mxu1 %v4022_v30 }
  0xb2   : > { %3375 = vmatmul.mubr.bf16.vlgmr.msra.gmra.mrb[0].mxu1 %v303_v29 }
  0xb3   : > { %3378 = vmatprep.mubr.bf16.mxu1 %v304_v33 }
  0xb4   : > { %530 = vmatmul.mubr.bf16.gmra.mrb[4].mxu0 %v303_v29 }
  0xb5   : > { %539 = vmatprep.mubr.bf16.mxu0 %v4479_v0 }
  0xba   : > { %3379 = vmatmul.mubr.bf16.gmra.mrb[4].mxu1 %v305_v36 }
  0xbb   : > { %3382 = vmatprep.mubr.bf16.mxu1 %v306_v39 }
  0xbc   : > { %540 = vmatmul.mubr.bf16.gmra.mrb[8].mxu0 %v304_v33 }
  0xbd   : > { %549 = vmatprep.mubr.bf16.mxu0 %v4479_v0 }
  0xc2   : > { %3383 = vmatmul.mubr.bf16.gmra.mrb[8].mxu1 %v307_v44 }
  0xc3   : > { %3386 = vmatprep.mubr.bf16.mxu1 %v308_v45 }
  0xc4   : > { %550 = vmatmul.mubr.bf16.gmra.mrb[12].mxu0 %v305_v36 }
  0xc5   : > { %559 = vmatprep.mubr.bf16.mxu0 %v4479_v0 }
  0xca   : > { %3387 = vmatmul.mubr.bf16.gmra.mrb[12].mxu1 %v309_v48 }
  0xcc   : > { %560 = vmatmul.mubr.bf16.gmra.mrb[16].mxu0 %v306_v39 }
  0xcd   : > { %569 = vmatprep.mubr.bf16.mxu0 %v4479_v0 }
  0xd4   : > { %570 = vmatmul.mubr.bf16.gmra.mrb[20].mxu0 %v307_v44 }
  0xd5   : > { %579 = vmatprep.mubr.bf16.mxu0 %v4479_v0 }
  0xdc   : > { %580 = vmatmul.mubr.bf16.gmra.mrb[24].mxu0 %v308_v45 }
  0xdd   : > { %589 = vmatprep.mubr.bf16.mxu0 %v4479_v0 }
  0xe4   : > { %590 = vmatmul.mubr.bf16.gmra.mrb[28].mxu0 %v309_v48 }
 0x17f   : > { %v521_v55 = vpop.f32.mrb[0].mxu0 }
 0x180   : > { %v522_v57 = vadd.f32 %v521_v55, %v4753_v54  ;;  %v523_v58 = vpop.f32.mrb[1].mxu0 }
 0x181   : > { %v525_v59 = vpop.f32.mrb[2].mxu0  ;;  %v524_v62 = vadd.f32 %v523_v58, %v4755_v56 }
 0x182   : > { %v526_v60 = vadd.f32 %v525_v59, %v4753_v54  ;;  %v527_v61 = vpop.f32.mrb[3].mxu0  ;;  %v697_v0 = vmul.f32 0.17677669, %v522_v57 }
 0x183   : > { %v528_v63 = vadd.f32 %v527_v61, %v4755_v56 }
 0x184   : > { %v698_v1 = vmul.f32 0.17677669, %v526_v60 }
 0x185   : > { %v4761_v2 = vpack.c.bf16 %v528_v63, %v524_v62  ;;  %v3376_v21 = vpop.f32.mrb[0].mxu1 }
 0x186   : > { %v4763_v3 = vpack.c.bf16 %v698_v1, %v697_v0  ;;  %v643_v24 = vadd.f32 %v3376_v21, %v4779_v17  ;;  %v634_v25 = vpop.f32.mrb[1].mxu1 }
 0x187   : > { %v531_v4 = vpop.f32.mrb[4].mxu0  ;;  %1164 = vrot.lane.b32.xlu0 %v4761_v2, %s4480_s27  ;;  %3750 = vmatprep.subr.msk.bf16.mxu0 %vm737_vm0, %v4761_v2  ;;  %v763_v5 = vsel %vm737_vm0, %v4761_v2, 0  ;;  %v635_v27 = vadd.f32 %v634_v25, %v4779_v17  ;;  %v3377_v28 = vpop.f32.mrb[2].mxu1 }
 0x188   : > { %v532_v6 = vadd.f32 %v531_v4, %v4753_v54  ;;  %v533_v7 = vpop.f32.mrb[5].mxu0  ;;  %3391 = vmatpush3.bf16.xpose.msra.mxu0 %v763_v5  ;;  %3406 = vmatprep.mubr.msk.bf16.mxu0 %vm737_vm0, %v4763_v3  ;;  %v646_v31 = vadd.f32 %v3377_v28, %v4779_v17  ;;  %v637_v32 = vpop.f32.mrb[3].mxu1 }
 0x189   : > { %v535_v8 = vpop.f32.mrb[6].mxu0  ;;  %v534_v12 = vadd.f32 %v533_v7, %v4755_v56  ;;  %v638_v35 = vadd.f32 %v637_v32, %v4779_v17 }
 0x18a   : > { %v536_v10 = vadd.f32 %v535_v8, %v4753_v54  ;;  %v537_v11 = vpop.f32.mrb[7].mxu0  ;;  %v699_v14 = vmul.f32 0.17677669, %v532_v6  ;;  %v4797_v38 = vpack.c.bf16 %v646_v31, %v643_v24 }
 0x18b   : > { %v538_v13 = vadd.f32 %v537_v11, %v4755_v56  ;;  %v4801_v40 = vpack.c.bf16 %v638_v35, %v635_v27 }
 0x18c   : > { %v700_v15 = vmul.f32 0.17677669, %v536_v10 }
 0x18d   : > { %v4777_v16 = vpack.c.bf16 %v538_v13, %v534_v12  ;;  %v3380_v44 = vpop.f32.mrb[4].mxu1  ;;  %3422 = vmatprep.subr.bf16.mxu1 %v4801_v40 }
 0x18e   : > { %v4781_v18 = vpack.c.bf16 %v700_v15, %v699_v14  ;;  %v659_v47 = vadd.f32 %v3380_v44, %v4779_v17  ;;  %v650_v48 = vpop.f32.mrb[5].mxu1  ;;  %3423 = vmatpush3.bf16.msra.mxu1 %v4801_v40 }
 0x18f   : > { %v541_v19 = vpop.f32.mrb[8].mxu0  ;;  %1166 = vrot.lane.b32.xlu1 %v4777_v16, %s4480_s27  ;;  %3751 = vmatprep.subr.msk.bf16.mxu0 %vm737_vm0, %v4777_v16  ;;  %v766_v20 = vsel %vm737_vm0, %v4777_v16, 0  ;;  %v651_v50 = vadd.f32 %v650_v48, %v4779_v17  ;;  %v3381_v51 = vpop.f32.mrb[6].mxu1 }
 0x190   : > { %v542_v22 = vadd.f32 %v541_v19, %v4753_v54  ;;  %v543_v23 = vpop.f32.mrb[9].mxu0  ;;  %3393 = vmatpush3.bf16.xpose.msra.mxu0 %v766_v20  ;;  %3424 = vmatprep.subr.bf16.mxu1 %v4797_v38  ;;  %v662_v55 = vadd.f32 %v3381_v51, %v4779_v17  ;;  %v653_v57 = vpop.f32.mrb[7].mxu1 }
 0x191   : > { %v545_v26 = vpop.f32.mrb[10].mxu0  ;;  %v544_v33 = vadd.f32 %v543_v23, %v4755_v56  ;;  %v654_v60 = vadd.f32 %v653_v57, %v4779_v17 }
 0x192   : > { %v546_v29 = vadd.f32 %v545_v26, %v4753_v54  ;;  %v547_v30 = vpop.f32.mrb[11].mxu0  ;;  %v701_v36 = vmul.f32 0.17677669, %v542_v22  ;;  %v4820_v63 = vpack.c.bf16 %v662_v55, %v659_v47  ;;  %3425 = vmatpush3.bf16.msra.mxu1 %v4797_v38 }
 0x193   : > { %v548_v34 = vadd.f32 %v547_v30, %v4755_v56  ;;  %v4825_v1 = vpack.c.bf16 %v654_v60, %v651_v50 }
 0x194   : > { %v702_v37 = vmul.f32 0.17677669, %v546_v29 }
 0x195   : > { %v4799_v39 = vpack.c.bf16 %v548_v34, %v544_v33  ;;  %v3384_v7 = vpop.f32.mrb[8].mxu1  ;;  %3426 = vmatprep.subr.bf16.mxu1 %v4825_v1 }
 0x196   : > { %v4803_v41 = vpack.c.bf16 %v702_v37, %v701_v36  ;;  %v675_v10 = vadd.f32 %v3384_v7, %v4779_v17  ;;  %v666_v11 = vpop.f32.mrb[9].mxu1  ;;  %3427 = vmatpush3.bf16.msra.mxu1 %v4825_v1 }
 0x197   : > { %v551_v42 = vpop.f32.mrb[12].mxu0  ;;  %3752 = vmatprep.subr.msk.bf16.mxu0 %vm737_vm0, %v4799_v39  ;;  %v769_v43 = vsel %vm737_vm0, %v4799_v39, 0  ;;  %v667_v13 = vadd.f32 %v666_v11, %v4779_v17  ;;  %v3385_v14 = vpop.f32.mrb[10].mxu1  ;;  %3428 = vmatprep.subr.bf16.mxu1 %v4820_v63 }
 0x198   : > { %v552_v45 = vadd.f32 %v551_v42, %v4753_v54  ;;  %v553_v46 = vpop.f32.mrb[13].mxu0  ;;  %3395 = vmatpush3.bf16.xpose.msra.mxu0 %v769_v43  ;;  %v678_v20 = vadd.f32 %v3385_v14, %v4779_v17  ;;  %v669_v21 = vpop.f32.mrb[11].mxu1 }
 0x199   : > { %v555_v49 = vpop.f32.mrb[14].mxu0  ;;  %v554_v58 = vadd.f32 %v553_v46, %v4755_v56  ;;  %v670_v24 = vadd.f32 %v669_v21, %v4779_v17 }
 0x19a   : > { %v556_v52 = vadd.f32 %v555_v49, %v4753_v54  ;;  %v557_v53 = vpop.f32.mrb[15].mxu0  ;;  %v703_v61 = vmul.f32 0.17677669, %v552_v45  ;;  %v4844_v27 = vpack.c.bf16 %v678_v20, %v675_v10  ;;  %3429 = vmatpush3.bf16.msra.mxu1 %v4820_v63 }
 0x19b   : > { %v558_v59 = vadd.f32 %v557_v53, %v4755_v56  ;;  %v4849_v29 = vpack.c.bf16 %v670_v24, %v667_v13 }
 0x19c   : > { %v704_v62 = vmul.f32 0.17677669, %v556_v52 }
 0x19d   : > { %v4823_v0 = vpack.c.bf16 %v558_v59, %v554_v58  ;;  %v3388_v33 = vpop.f32.mrb[12].mxu1  ;;  %3430 = vmatprep.subr.bf16.mxu1 %v4849_v29 }
 0x19e   : > { %v4827_v4 = vpack.c.bf16 %v704_v62, %v703_v61  ;;  %v691_v36 = vadd.f32 %v3388_v33, %v4779_v17  ;;  %v682_v37 = vpop.f32.mrb[13].mxu1  ;;  %3431 = vmatpush3.bf16.msra.mxu1 %v4849_v29 }
 0x19f   : > { %v561_v5 = vpop.f32.mrb[16].mxu0  ;;  %3753 = vmatprep.subr.msk.bf16.mxu0 %vm737_vm0, %v4823_v0  ;;  %v772_v6 = vsel %vm737_vm0, %v4823_v0, 0  ;;  %v683_v43 = vadd.f32 %v682_v37, %v4779_v17  ;;  %v3389_v44 = vpop.f32.mrb[14].mxu1  ;;  %3432 = vmatprep.subr.bf16.mxu1 %v4844_v27 }
 0x1a0   : > { %v562_v8 = vadd.f32 %v561_v5, %v4753_v54  ;;  %v563_v9 = vpop.f32.mrb[17].mxu0  ;;  %3397 = vmatpush3.bf16.xpose.msra.mxu0 %v772_v6  ;;  %v694_v47 = vadd.f32 %v3389_v44, %v4779_v17  ;;  %v685_v48 = vpop.f32.mrb[15].mxu1 }
 0x1a1   : > { %v565_v12 = vpop.f32.mrb[18].mxu0  ;;  %v564_v22 = vadd.f32 %v563_v9, %v4755_v56  ;;  %v686_v51 = vadd.f32 %v685_v48, %v4779_v17 }
 0x1a2   : > { %v566_v15 = vadd.f32 %v565_v12, %v4753_v54  ;;  %v567_v19 = vpop.f32.mrb[19].mxu0  ;;  %v705_v25 = vmul.f32 0.17677669, %v562_v8  ;;  %v4868_v55 = vpack.c.bf16 %v694_v47, %v691_v36  ;;  %3433 = vmatpush3.bf16.msra.mxu1 %v4844_v27 }
 0x1a3   : > { %v568_v23 = vadd.f32 %v567_v19, %v4755_v56  ;;  %v4873_v58 = vpack.c.bf16 %v686_v51, %v683_v43 }
 0x1a4   : > { %v706_v26 = vmul.f32 0.17677669, %v566_v15 }
 0x1a5   : > { %v4847_v28 = vpack.c.bf16 %v568_v23, %v564_v22  ;;  %3434 = vmatprep.subr.bf16.mxu1 %v4873_v58 }
 0x1a6   : > { %v4851_v30 = vpack.c.bf16 %v706_v26, %v705_v25  ;;  %3435 = vmatpush3.bf16.msra.mxu1 %v4873_v58 }
 0x1a7   : > { %v571_v31 = vpop.f32.mrb[20].mxu0  ;;  %3754 = vmatprep.subr.msk.bf16.mxu0 %vm737_vm0, %v4847_v28  ;;  %v775_v32 = vsel %vm737_vm0, %v4847_v28, 0  ;;  %3436 = vmatprep.subr.bf16.mxu1 %v4868_v55 }
 0x1a8   : > { %v572_v34 = vadd.f32 %v571_v31, %v4753_v54  ;;  %v573_v35 = vpop.f32.mrb[21].mxu0  ;;  %3399 = vmatpush3.bf16.xpose.msra.mxu0 %v775_v32 }
 0x1a9   : > { %v575_v42 = vpop.f32.mrb[22].mxu0  ;;  %v574_v49 = vadd.f32 %v573_v35, %v4755_v56 }
 0x1aa   : > { %v576_v45 = vadd.f32 %v575_v42, %v4753_v54  ;;  %v577_v46 = vpop.f32.mrb[23].mxu0  ;;  %v707_v52 = vmul.f32 0.17677669, %v572_v34  ;;  %3437 = vmatpush3.bf16.msra.mxu1 %v4868_v55 }
 0x1ab   : > { %v578_v50 = vadd.f32 %v577_v46, %v4755_v56 }
 0x1ac   : > { %v708_v53 = vmul.f32 0.17677669, %v576_v45 }
 0x1ad   : > { %v4871_v57 = vpack.c.bf16 %v578_v50, %v574_v49 }
 0x1ae   : > { %v4875_v59 = vpack.c.bf16 %v708_v53, %v707_v52 }
 0x1af   : > { %v581_v60 = vpop.f32.mrb[24].mxu0  ;;  %3755 = vmatprep.subr.msk.bf16.mxu0 %vm737_vm0, %v4871_v57  ;;  %v778_v61 = vsel %vm737_vm0, %v4871_v57, 0 }
 0x1b0   : > { %v582_v17 = vadd.f32 %v581_v60, %v4753_v54  ;;  %v583_v62 = vpop.f32.mrb[25].mxu0  ;;  %3401 = vmatpush3.bf16.xpose.msra.mxu0 %v778_v61 }
 0x1b1   : > { %v585_v5 = vpop.f32.mrb[26].mxu0  ;;  %v584_v8 = vadd.f32 %v583_v62, %v4755_v56 }
 0x1b2   : > { %v586_v6 = vadd.f32 %v585_v5, %v4753_v54  ;;  %v587_v7 = vpop.f32.mrb[27].mxu0  ;;  %v709_v10 = vmul.f32 0.17677669, %v582_v17 }
 0x1b3   : > { %v588_v9 = vadd.f32 %v587_v7, %v4755_v56 }
 0x1b4   : > { %v710_v11 = vmul.f32 0.17677669, %v586_v6 }
 0x1b5   : > { %v4889_v12 = vpack.c.bf16 %v588_v9, %v584_v8 }
 0x1b6   : > { %v4891_v13 = vpack.c.bf16 %v710_v11, %v709_v10 }
 0x1b7   : > { %v591_v14 = vpop.f32.mrb[28].mxu0  ;;  %3756 = vmatprep.subr.msk.bf16.mxu0 %vm737_vm0, %v4889_v12  ;;  %v781_v15 = vsel %vm737_vm0, %v4889_v12, 0 }
 0x1b8   : > { %v592_v19 = vadd.f32 %v591_v14, %v4753_v54  ;;  %v593_v20 = vpop.f32.mrb[29].mxu0  ;;  %3403 = vmatpush3.bf16.xpose.msra.mxu0 %v781_v15 }
 0x1b9   : > { %v595_v21 = vpop.f32.mrb[30].mxu0  ;;  %v594_v24 = vadd.f32 %v593_v20, %v4755_v56 }
 0x1ba   : > { %v596_v22 = vadd.f32 %v595_v21, %v4753_v54  ;;  %v597_v23 = vpop.f32.mrb[31].mxu0  ;;  %v711_v26 = vmul.f32 0.17677669, %v592_v19 }
 0x1bb   : > { %v598_v25 = vadd.f32 %v597_v23, %v4755_v56 }
 0x1bc   : > { %v712_v31 = vmul.f32 0.17677669, %v596_v22 }
 0x1bd   : > { %v4901_v32 = vpack.c.bf16 %v598_v25, %v594_v24 }
 0x1be   : > { %v4903_v33 = vpack.c.bf16 %v712_v31, %v711_v26 }
 0x1bf   : > { %3757 = vmatprep.subr.msk.bf16.mxu0 %vm737_vm0, %v4901_v32  ;;  %v784_v34 = vsel %vm737_vm0, %v4901_v32, 0 }
 0x1c0   : > { %3405 = vmatpush3.bf16.xpose.msra.mxu0 %v784_v34 }
 0x1c7   : > { %3407 = vmatmul.mubr.msk.bf16.vlgmr.msra.gmra.mrb[32].mxu0 %vm737_vm0, %v4781_v18 }
 0x1c8   : > { %3410 = vmatprep.mubr.msk.bf16.mxu0 %vm737_vm0, %v4803_v41 }
 0x1cf   : > { %3411 = vmatmul.mubr.msk.bf16.gmra.mrb[36].mxu0 %vm737_vm0, %v4827_v4 }
 0x1d0   : > { %3414 = vmatprep.mubr.msk.bf16.mxu0 %vm737_vm0, %v4851_v30 }
 0x1d7   : > { %3415 = vmatmul.mubr.msk.bf16.gmra.mrb[40].mxu0 %vm737_vm0, %v4875_v59 }
 0x1d8   : > { %3418 = vmatprep.mubr.msk.bf16.mxu0 %vm737_vm0, %v4891_v13 }
 0x1df   : > { %3419 = vmatmul.mubr.msk.bf16.gmra.mrb[44].mxu0 %vm737_vm0, %v4903_v33 }
 0x1f9   : > { %v4923_v54 = vpop.permute.xlu0 %1164 }
 0x1fa   : > { %3758 = vmatprep.subr.msk.bf16.mxu1 %vm737_vm0, %v4923_v54 }
 0x201   : > { %v4961_v60 = vpop.permute.xlu1 %1166 }
 0x29a   : > { %v3408_v56 = vpop.f32.mrb[32].mxu0 }
 0x29b   : > { %887 = vmax.xlane.f32.xlu1 %v3408_v56  ;;  %v820_v35 = vpop.f32.mrb[33].mxu0 }
 0x29c   : > { %883 = vmax.xlane.f32.xlu0 %v820_v35  ;;  %v3409_v36 = vpop.f32.mrb[34].mxu0 }
 0x29d   : > { %v823_v37 = vpop.f32.mrb[35].mxu0 }
 0x29f   : > { %889 = vmax.xlane.f32.xlu1 %v3409_v36 }
 0x2a0   : > { %885 = vmax.xlane.f32.xlu0 %v823_v37 }
 0x2a2   : > { %v3412_v42 = vpop.f32.mrb[36].mxu0 }
 0x2a3   : > { %v4927_v43 = vpop.f32.mrb[37].mxu0 }
 0x2a4   : > { %895 = vmax.xlane.f32.xlu0 %v3412_v42  ;;  %v4929_v44 = vpop.f32.mrb[38].mxu0 }
 0x2a5   : > { %897 = vmax.xlane.f32.xlu1 %v4929_v44  ;;  %v4932_v45 = vpop.f32.mrb[39].mxu0 }
 0x2a8   : > { %891 = vmax.xlane.f32.xlu0 %v4927_v43 }
 0x2a9   : > { %893 = vmax.xlane.f32.xlu1 %v4932_v45 }
 0x2aa   : > { %v4936_v46 = vpop.f32.mrb[40].mxu0 }
 0x2ab   : > { %v4938_v47 = vpop.f32.mrb[41].mxu0 }
 0x2ac   : > { %903 = vmax.xlane.f32.xlu0 %v4936_v46  ;;  %v4941_v48 = vpop.f32.mrb[42].mxu0 }
 0x2ad   : > { %905 = vmax.xlane.f32.xlu1 %v4941_v48  ;;  %v4944_v49 = vpop.f32.mrb[43].mxu0 }
 0x2b0   : > { %899 = vmax.xlane.f32.xlu0 %v4938_v47 }
 0x2b1   : > { %901 = vmax.xlane.f32.xlu1 %v4944_v49 }
 0x2b2   : > { %v3420_v50 = vpop.f32.mrb[44].mxu0 }
 0x2b3   : > { %v4948_v51 = vpop.f32.mrb[45].mxu0 }
 0x2b4   : > { %911 = vmax.xlane.f32.xlu0 %v3420_v50  ;;  %v4950_v52 = vpop.f32.mrb[46].mxu0 }
 0x2b5   : > { %v4952_v53 = vpop.f32.mrb[47].mxu0 }
 0x2b8   : > { %907 = vmax.xlane.f32.xlu0 %v4948_v51 }
 0x2c2   : > { %1170 = vrot.lane.b32.xlu1 %v4823_v0, %s4480_s27 }
 0x2ce   : > { %1168 = vrot.lane.b32.xlu0 %v4799_v39, %s4480_s27 }
 0x2e6   : > { %913 = vmax.xlane.f32.xlu1 %v4950_v52 }
 0x2ea   : > { %909 = vmax.xlane.f32.xlu1 %v4952_v53 }
 0x328   : > { %v888_v61 = vpop.xlane.xlu1 %887 }
 0x329   : > { %v917_v17 = vsub.f32 %v3408_v56, %v888_v61  ;;  %v884_v62 = vpop.xlane.xlu0 %883 }
 0x32a   : > { %v915_v5 = vsub.f32 %v820_v35, %v884_v62 }
 0x32b   : > { %v935_v6 = vmul.f32 1.442695, %v917_v17 }
 0x32c   : > { %v931_v7 = vmul.f32 1.442695, %v915_v5  ;;  %v890_v8 = vpop.xlane.xlu1 %889 }
 0x32d   : > { %4023 = vpow2.f32 %v935_v6  ;;  %v918_v9 = vsub.f32 %v3409_v36, %v890_v8  ;;  %v886_v10 = vpop.xlane.xlu0 %885 }
 0x32e   : > { %v916_v11 = vsub.f32 %v823_v37, %v886_v10  ;;  %4025 = vpow2.f32 %v931_v7 }
 0x32f   : > { %v937_v14 = vmul.f32 1.442695, %v918_v9 }
 0x330   : > { %v933_v15 = vmul.f32 1.442695, %v916_v11 }
 0x331   : > { %4027 = vpow2.f32 %v937_v14  ;;  %v896_v23 = vpop.xlane.xlu0 %895 }
 0x332   : > { %4029 = vpow2.f32 %v933_v15  ;;  %v898_v26 = vpop.xlane.xlu1 %897  ;;  %v921_v56 = vsub.f32 %v3412_v42, %v896_v23 }
 0x333   : > { %v922_v62 = vsub.f32 %v4929_v44, %v898_v26 }
 0x334   : > { %v943_v37 = vmul.f32 1.442695, %v921_v56 }
 0x335   : > { %v892_v24 = vpop.xlane.xlu0 %891  ;;  %v945_v9 = vmul.f32 1.442695, %v922_v62 }
 0x336   : > { %v894_v34 = vpop.xlane.xlu1 %893  ;;  %v919_v35 = vsub.f32 %v4927_v43, %v892_v24  ;;  %4031 = vpow2.f32 %v943_v37 }
 0x337   : > { %v4963_v19 = vpop.eup %4023  ;;  %v920_v61 = vsub.f32 %v4932_v45, %v894_v34 }
 0x338   : > { %967 = vadd.xlane.f32.xlu0 %v4963_v19  ;;  %v4966_v20 = vpop.eup %4025  ;;  %v939_v5 = vmul.f32 1.442695, %v919_v35 }
 0x339   : > { %v904_v25 = vpop.xlane.xlu0 %903  ;;  %v941_v6 = vmul.f32 1.442695, %v920_v61 }
 0x33a   : > { %v906_v17 = vpop.xlane.xlu1 %905  ;;  %4033 = vpow2.f32 %v939_v5  ;;  %v925_v10 = vsub.f32 %v4936_v46, %v904_v25 }
 0x33b   : > { %v4968_v21 = vpop.eup %4027  ;;  %4035 = vpow2.f32 %v941_v6  ;;  %v926_v46 = vsub.f32 %v4941_v48, %v906_v17 }
 0x33c   : > { %963 = vadd.xlane.f32.xlu0 %v4966_v20  ;;  %969 = vadd.xlane.f32.xlu1 %v4968_v21  ;;  %v4972_v22 = vpop.eup %4029  ;;  %4037 = vpow2.f32 %v945_v9  ;;  %v951_v14 = vmul.f32 1.442695, %v925_v10 }
 0x33d   : > { %v900_v31 = vpop.xlane.xlu0 %899  ;;  %v953_v26 = vmul.f32 1.442695, %v926_v46 }
 0x33e   : > { %v902_v11 = vpop.xlane.xlu1 %901  ;;  %v923_v45 = vsub.f32 %v4938_v47, %v900_v31 }
 0x33f   : > { %v924_v31 = vsub.f32 %v4944_v49, %v902_v11 }
 0x340   : > { %965 = vadd.xlane.f32.xlu1 %v4972_v22  ;;  %v4987_v23 = vpop.eup %4031 }
 0x341   : > { %v912_v36 = vpop.xlane.xlu0 %911 }
 0x342   : > { %v929_v7 = vsub.f32 %v3420_v50, %v912_v36  ;;  %v4985_v15 = vpop.permute.xlu1 %1170  ;;  %v947_v50 = vmul.f32 1.442695, %v923_v45 }
 0x344   : > { %v959_v42 = vmul.f32 1.442695, %v929_v7  ;;  %v4991_v24 = vpop.eup %4033 }
 0x345   : > { %v908_v8 = vpop.xlane.xlu0 %907  ;;  %v4993_v25 = vpop.eup %4035 }
 0x346   : > { %v927_v43 = vsub.f32 %v4948_v51, %v908_v8  ;;  %4039 = vpow2.f32 %v959_v42  ;;  %v4999_v56 = vpop.eup %4037 }
 0x347   : > { %4041 = vpow2.f32 %v951_v14 }
 0x348   : > { %v955_v44 = vmul.f32 1.442695, %v927_v43 }
 0x349   : > { %v1169_v7 = vpop.permute.xlu0 %1168 }
 0x34a   : > { %4043 = vpow2.f32 %v955_v44 }
 0x34b   : > { %4045 = vpow2.f32 %v947_v50 }
 0x350   : > { %v5001_v35 = vpop.eup %4039 }
 0x351   : > { %1174 = vrot.lane.b32.xlu1 %v4871_v57, %s4480_s27  ;;  %v5006_v37 = vpop.eup %4041 }
 0x352   : > { %1172 = vrot.lane.b32.xlu0 %v4847_v28, %s4480_s27 }
 0x354   : > { %v5008_v61 = vpop.eup %4043 }
 0x355   : > { %v5012_v17 = vpop.eup %4045 }
 0x371   : > { %975 = vadd.xlane.f32.xlu0 %v4987_v23 }
 0x373   : > { %v914_v51 = vpop.xlane.xlu1 %913 }
 0x374   : > { %v930_v47 = vsub.f32 %v4950_v52, %v914_v51  ;;  %v949_v52 = vmul.f32 1.442695, %v924_v31  ;;  %v1205_v31 = vsel %vm737_vm0, %v4923_v54, 0 }
 0x375   : > { %973 = vadd.xlane.f32.xlu0 %v4993_v25  ;;  %971 = vadd.xlane.f32.xlu1 %v4991_v24 }
 0x376   : > { %v961_v34 = vmul.f32 1.442695, %v930_v47 }
 0x377   : > { %v910_v48 = vpop.xlane.xlu1 %909 }
 0x378   : > { %4047 = vpow2.f32 %v961_v34  ;;  %v928_v36 = vsub.f32 %v4952_v53, %v910_v48 }
 0x379   : > { %991 = vadd.xlane.f32.xlu0 %v5001_v35  ;;  %977 = vadd.xlane.f32.xlu1 %v4999_v56  ;;  %4049 = vpow2.f32 %v953_v26 }
 0x37a   : > { %4051 = vpow2.f32 %v949_v52  ;;  %v957_v49 = vmul.f32 1.442695, %v928_v36 }
 0x37c   : > { %4053 = vpow2.f32 %v957_v49 }
 0x37d   : > { %987 = vadd.xlane.f32.xlu0 %v5008_v61  ;;  %983 = vadd.xlane.f32.xlu1 %v5006_v37 }
 0x381   : > { %979 = vadd.xlane.f32.xlu1 %v5012_v17 }
 0x382   : > { %v5015_v62 = vpop.eup %4047 }
 0x383   : > { %993 = vadd.xlane.f32.xlu0 %v5015_v62  ;;  %v5018_v53 = vpop.eup %4049 }
 0x384   : > { %v5021_v5 = vpop.eup %4051 }
 0x385   : > { %985 = vadd.xlane.f32.xlu1 %v5018_v53 }
 0x386   : > { %v5024_v6 = vpop.eup %4053 }
 0x389   : > { %981 = vadd.xlane.f32.xlu1 %v5021_v5 }
 0x38d   : > { %989 = vadd.xlane.f32.xlu1 %v5024_v6 }
 0x399   : > { %1176 = vrot.lane.b32.xlu0 %v4889_v12, %s4480_s27 }
 0x39d   : > { %1140 = vrot.lane.b32.xlu0 %v4763_v3, %s4480_s27 }
 0x39e   : > { %1178 = vrot.lane.b32.xlu1 %v4901_v32, %s4480_s27 }
 0x3a1   : > { %1144 = vrot.lane.b32.xlu0 %v4803_v41, %s4480_s27 }
 0x3a2   : > { %1142 = vrot.lane.b32.xlu1 %v4781_v18, %s4480_s27 }
 0x3a5   : > { %1148 = vrot.lane.b32.xlu0 %v4851_v30, %s4480_s27 }
 0x3a6   : > { %1146 = vrot.lane.b32.xlu1 %v4827_v4, %s4480_s27 }
 0x3a9   : > { %1152 = vrot.lane.b32.xlu0 %v4891_v13, %s4480_s27 }
 0x3aa   : > { %1150 = vrot.lane.b32.xlu1 %v4875_v59, %s4480_s27 }
 0x3ad   : > { %1485 = vrot.lane.b32.xlu0 %v4801_v40, %s4480_s27 }
 0x3ae   : > { %1154 = vrot.lane.b32.xlu1 %v4903_v33, %s4480_s27 }
 0x3b1   : > { %1489 = vrot.lane.b32.xlu0 %v4825_v1, %s4480_s27 }
 0x3b2   : > { %1487 = vrot.lane.b32.xlu1 %v4797_v38, %s4480_s27 }
 0x3b5   : > { %1493 = vrot.lane.b32.xlu0 %v4849_v29, %s4480_s27 }
 0x3b6   : > { %1491 = vrot.lane.b32.xlu1 %v4820_v63, %s4480_s27 }
 0x3b9   : > { %1497 = vrot.lane.b32.xlu0 %v4873_v58, %s4480_s27 }
 0x3ba   : > { %1495 = vrot.lane.b32.xlu1 %v4844_v27, %s4480_s27 }
 0x3bd   : > { %1622 = vrot.lane.b32.xlu0 %v4761_v2, %s4481_s28 }
 0x3be   : > { %1499 = vrot.lane.b32.xlu1 %v4868_v55, %s4480_s27 }
 0x3c2   : > { %1624 = vrot.lane.b32.xlu1 %v4777_v16, %s4481_s28 }
 0x3c5   : > { %v968_v8 = vpop.xlane.xlu0 %967 }
 0x3c9   : > { %v964_v9 = vpop.xlane.xlu0 %963  ;;  %v970_v10 = vpop.xlane.xlu1 %969 }
 0x3ca   : > { %4055 = vrcp.f32 %v970_v10 }
 0x3cb   : > { %4057 = vrcp.f32 %v964_v9 }
 0x3cc   : > { %4059 = vrcp.f32 %v968_v8 }
 0x3cd   : > { %v966_v11 = vpop.xlane.xlu1 %965  ;;  %v1173_v54 = vpop.permute.xlu0 %1172 }
 0x3ce   : > { %4061 = vrcp.f32 %v966_v11 }
 0x3d4   : > { %v4056_v42 = vpop.eup %4055 }
 0x3d5   : > { %v4058_v43 = vpop.eup %4057  ;;  %v1014_v44 = vmul.f32 %v4056_v42, %v4968_v21  ;;  %v1208_v21 = vsel %vm737_vm0, %v4961_v60, 0 }
 0x3d6   : > { %v4060_v14 = vpop.eup %4059  ;;  %v1011_v46 = vmul.f32 %v4058_v43, %v4966_v20  ;;  %v1211_v20 = vsel %vm737_vm0, %v1169_v7, 0 }
 0x3d7   : > { %v1013_v51 = vmul.f32 %v4060_v14, %v4963_v19  ;;  %v1214_v19 = vsel %vm737_vm0, %v4985_v15, 0 }
 0x3d8   : > { %v4062_v45 = vpop.eup %4061 }
 0x3d9   : > { %v1012_v50 = vmul.f32 %v4062_v45, %v4972_v22  ;;  %v1028_v26 = vpack.c.bf16 %v1014_v44, %v1013_v51  ;;  %v1175_v22 = vpop.permute.xlu1 %1174 }
 0x3da   : > { %v1220_v49 = vsel %vm737_vm0, %v1175_v22, 0 }
 0x3db   : > { %v1027_v47 = vpack.c.bf16 %v1012_v50, %v1011_v46 }
 0x3dd   : > { %3438 = vmatprep.mubr.bf16.mxu1 %v1027_v47 }
 0x3de   : > { %3439 = vmatmul.mubr.bf16.vlgmr.msra.gmra.mrb[16].mxu1 %v1028_v26 }
 0x3df   : > { %3455 = vmatpush3.bf16.xpose.msra.mxu1 %v1205_v31 }
 0x3e0   : > { %3759 = vmatprep.subr.msk.bf16.mxu1 %vm737_vm0, %v4961_v60  ;;  %v1217_v60 = vsel %vm737_vm0, %v1173_v54, 0 }
 0x3e7   : > { %3457 = vmatpush3.bf16.xpose.msra.mxu1 %v1208_v21 }
 0x3e8   : > { %3760 = vmatprep.subr.msk.bf16.mxu1 %vm737_vm0, %v1169_v7 }
 0x3ef   : > { %3459 = vmatpush3.bf16.xpose.msra.mxu1 %v1211_v20 }
 0x3f0   : > { %3761 = vmatprep.subr.msk.bf16.mxu1 %vm737_vm0, %v4985_v15 }
 0x3f7   : > { %3461 = vmatpush3.bf16.xpose.msra.mxu1 %v1214_v19 }
 0x3f8   : > { %3762 = vmatprep.subr.msk.bf16.mxu1 %vm737_vm0, %v1173_v54 }
 0x3fe   : > { %v976_v34 = vpop.xlane.xlu0 %975 }
 0x3ff   : > { %3463 = vmatpush3.bf16.xpose.msra.mxu1 %v1217_v60 }
 0x400   : > { %3763 = vmatprep.subr.msk.bf16.mxu1 %vm737_vm0, %v1175_v22 }
 0x402   : > { %v974_v48 = vpop.xlane.xlu0 %973  ;;  %v972_v52 = vpop.xlane.xlu1 %971 }
 0x403   : > { %4063 = vrcp.f32 %v974_v48 }
 0x404   : > { %4065 = vrcp.f32 %v972_v52 }
 0x405   : > { %4067 = vrcp.f32 %v976_v34 }
 0x406   : > { %v992_v36 = vpop.xlane.xlu0 %991  ;;  %v978_v15 = vpop.xlane.xlu1 %977 }
 0x407   : > { %3465 = vmatpush3.bf16.xpose.msra.mxu1 %v1220_v49  ;;  %4069 = vrcp.f32 %v978_v15 }
 0x40a   : > { %v984_v7 = vpop.xlane.xlu1 %983  ;;  %v988_v8 = vpop.xlane.xlu0 %987 }
 0x40d   : > { %v4064_v9 = vpop.eup %4063 }
 0x40e   : > { %v4066_v10 = vpop.eup %4065  ;;  %v980_v11 = vpop.xlane.xlu1 %979  ;;  %v1016_v42 = vmul.f32 %v4064_v9, %v4993_v25 }
 0x40f   : > { %v1015_v43 = vmul.f32 %v4066_v10, %v4991_v24  ;;  %v4068_v14 = vpop.eup %4067 }
 0x410   : > { %v994_v45 = vpop.xlane.xlu0 %993  ;;  %v1017_v51 = vmul.f32 %v4068_v14, %v4987_v23 }
 0x411   : > { %v1029_v44 = vpack.c.bf16 %v1016_v42, %v1015_v43  ;;  %v4070_v46 = vpop.eup %4069 }
 0x412   : > { %v986_v50 = vpop.xlane.xlu1 %985  ;;  %v1018_v47 = vmul.f32 %v4070_v46, %v4999_v56 }
 0x413   : > { %3442 = vmatprep.mubr.bf16.mxu1 %v1029_v44  ;;  %4071 = vrcp.f32 %v986_v50 }
 0x414   : > { %v1177_v26 = vpop.permute.xlu0 %1176  ;;  %4073 = vrcp.f32 %v980_v11  ;;  %v1030_v31 = vpack.c.bf16 %v1018_v47, %v1017_v51 }
 0x415   : > { %3764 = vmatprep.subr.msk.bf16.mxu1 %vm737_vm0, %v1177_v26  ;;  %v1223_v25 = vsel %vm737_vm0, %v1177_v26, 0  ;;  %4075 = vrcp.f32 %v984_v7 }
 0x416   : > { %3467 = vmatpush3.bf16.xpose.msra.mxu1 %v1223_v25  ;;  %v982_v24 = vpop.xlane.xlu1 %981 }
 0x417   : > { %3443 = vmatmul.mubr.bf16.gmra.mrb[20].mxu1 %v1030_v31  ;;  %4077 = vrcp.f32 %v982_v24 }
 0x418   : > { %v1141_v21 = vpop.permute.xlu0 %1140  ;;  %4079 = vrcp.f32 %v988_v8 }
 0x41a   : > { %v990_v20 = vpop.xlane.xlu1 %989 }
 0x41b   : > { %4081 = vrcp.f32 %v990_v20 }
 0x41c   : > { %4083 = vrcp.f32 %v994_v45  ;;  %v1145_v23 = vpop.permute.xlu0 %1144 }
 0x41d   : > { %v4072_v56 = vpop.eup %4071  ;;  %4085 = vrcp.f32 %v992_v36 }
 0x41e   : > { %v1179_v19 = vpop.permute.xlu1 %1178  ;;  %v4074_v54 = vpop.eup %4073  ;;  %v1022_v52 = vmul.f32 %v4072_v56, %v5018_v53 }
 0x41f   : > { %3765 = vmatprep.subr.msk.bf16.mxu1 %vm737_vm0, %v1179_v19  ;;  %v1226_v22 = vsel %vm737_vm0, %v1179_v19, 0  ;;  %v4076_v34 = vpop.eup %4075  ;;  %v1019_v15 = vmul.f32 %v4074_v54, %v5012_v17 }
 0x420   : > { %v1149_v60 = vpop.permute.xlu0 %1148  ;;  %3469 = vmatpush3.bf16.xpose.msra.mxu1 %v1226_v22  ;;  %v1021_v36 = vmul.f32 %v4076_v34, %v5006_v37 }
 0x421   : > { %v4078_v48 = vpop.eup %4077 }
 0x422   : > { %v1143_v49 = vpop.permute.xlu1 %1142  ;;  %v1020_v7 = vmul.f32 %v4078_v48, %v5021_v5  ;;  %v4080_v8 = vpop.eup %4079  ;;  %v1032_v42 = vpack.c.bf16 %v1022_v52, %v1021_v36 }
 0x423   : > { %v1023_v45 = vmul.f32 %v4080_v8, %v5008_v61 }
 0x424   : > { %v1153_v9 = vpop.permute.xlu0 %1152  ;;  %v1031_v10 = vpack.c.bf16 %v1020_v7, %v1019_v15 }
 0x425   : > { %v4082_v11 = vpop.eup %4081 }
 0x426   : > { %v4084_v43 = vpop.eup %4083  ;;  %3446 = vmatprep.mubr.bf16.mxu1 %v1031_v10  ;;  %v1147_v14 = vpop.permute.xlu1 %1146  ;;  %v1024_v44 = vmul.f32 %v4082_v11, %v5024_v6 }
 0x427   : > { %3447 = vmatmul.mubr.bf16.gmra.mrb[24].mxu1 %v1032_v42  ;;  %v4086_v53 = vpop.eup %4085  ;;  %v1026_v5 = vmul.f32 %v4084_v43, %v5015_v62 }
 0x428   : > { %v1486_v46 = vpop.permute.xlu0 %1485  ;;  %v1033_v17 = vpack.c.bf16 %v1024_v44, %v1023_v45  ;;  %v1025_v50 = vmul.f32 %v4086_v53, %v5001_v35 }
 0x429   : > { %3486 = vmatprep.subr.bf16.mxu0 %v1486_v46 }
 0x42a   : > { %3450 = vmatprep.mubr.bf16.mxu1 %v1033_v17  ;;  %v1151_v37 = vpop.permute.xlu1 %1150  ;;  %3487 = vmatpush3.bf16.msra.mxu0 %v1486_v46  ;;  %v1034_v51 = vpack.c.bf16 %v1026_v5, %v1025_v50 }
 0x42c   : > { %v1490_v6 = vpop.permute.xlu0 %1489 }
 0x42e   : > { %v1155_v47 = vpop.permute.xlu1 %1154 }
 0x42f   : > { %3451 = vmatmul.mubr.bf16.gmra.mrb[28].mxu1 %v1034_v51 }
 0x430   : > { %3470 = vmatprep.mubr.msk.bf16.mxu1 %vm737_vm0, %v1141_v21  ;;  %v1494_v62 = vpop.permute.xlu0 %1493 }
 0x432   : > { %v1488_v61 = vpop.permute.xlu1 %1487 }
 0x433   : > { %3488 = vmatprep.subr.bf16.mxu0 %v1488_v61 }
 0x434   : > { %3489 = vmatpush3.bf16.msra.mxu0 %v1488_v61  ;;  %v1498_v31 = vpop.permute.xlu0 %1497 }
 0x435   : > { %3490 = vmatprep.subr.bf16.mxu0 %v1490_v6 }
 0x436   : > { %v1492_v26 = vpop.permute.xlu1 %1491 }
 0x437   : > { %3471 = vmatmul.mubr.msk.bf16.vlgmr.msra.gmra.mrb[32].mxu1 %vm737_vm0, %v1143_v49 }
 0x438   : > { %3474 = vmatprep.mubr.msk.bf16.mxu1 %vm737_vm0, %v1145_v23  ;;  %3491 = vmatpush3.bf16.msra.mxu0 %v1490_v6  ;;  %v5110_v24 = vpop.permute.xlu0 %1622 }
 0x439   : > { %3492 = vmatprep.subr.bf16.mxu0 %v1492_v26 }
 0x43a   : > { %v1496_v35 = vpop.permute.xlu1 %1495 }
 0x43c   : > { %3493 = vmatpush3.bf16.msra.mxu0 %v1492_v26 }
 0x43d   : > { %3494 = vmatprep.subr.bf16.mxu0 %v1494_v62 }
 0x43e   : > { %v1500_v25 = vpop.permute.xlu1 %1499 }
 0x43f   : > { %3475 = vmatmul.mubr.msk.bf16.gmra.mrb[36].mxu1 %vm737_vm0, %v1147_v14 }
 0x440   : > { %3478 = vmatprep.mubr.msk.bf16.mxu1 %vm737_vm0, %v1149_v60  ;;  %3495 = vmatpush3.bf16.msra.mxu0 %v1494_v62 }
 0x441   : > { %3496 = vmatprep.subr.bf16.mxu0 %v1496_v35 }
 0x442   : > { %v5184_v61 = vpop.permute.xlu1 %1624 }
 0x444   : > { %3497 = vmatpush3.bf16.msra.mxu0 %v1496_v35 }
 0x445   : > { %3498 = vmatprep.subr.bf16.mxu0 %v1498_v31 }
 0x447   : > { %3479 = vmatmul.mubr.msk.bf16.gmra.mrb[40].mxu1 %vm737_vm0, %v1151_v37 }
 0x448   : > { %3482 = vmatprep.mubr.msk.bf16.mxu1 %vm737_vm0, %v1153_v9  ;;  %3499 = vmatpush3.bf16.msra.mxu0 %v1498_v31 }
 0x449   : > { %3500 = vmatprep.subr.bf16.mxu0 %v1500_v25 }
 0x44c   : > { %3501 = vmatpush3.bf16.msra.mxu0 %v1500_v25 }
 0x44d   : > { %3766 = vmatprep.subr.msk.bf16.mxu0 %vm737_vm0, %v5110_v24 }
 0x44f   : > { %3483 = vmatmul.mubr.msk.bf16.gmra.mrb[44].mxu1 %vm737_vm0, %v1155_v47 }
 0x4b1   : > { %v5115_v21 = vpop.f32.mrb[16].mxu1 }
 0x4b2   : > { %5979 = vst [vmem:[#allocation15_spill] sm:$0xff] %v5115_v21  ;;  %v5117_v20 = vpop.f32.mrb[17].mxu1 }
 0x4b3   : > { %5980 = vst [vmem:[#allocation16_spill] sm:$0xff] %v5117_v20  ;;  %v5119_v23 = vpop.f32.mrb[18].mxu1 }
 0x4b4   : > { %5981 = vst [vmem:[#allocation17_spill] sm:$0xff] %v5119_v23  ;;  %v5121_v56 = vpop.f32.mrb[19].mxu1 }
 0x4b5   : > { %5982 = vst [vmem:[#allocation18_spill] sm:$0xff] %v5121_v56 }
 0x4ea   : > { %v5123_v19 = vpop.f32.mrb[20].mxu1 }
 0x4eb   : > { %5983 = vst [vmem:[#allocation19_spill] sm:$0xff] %v5123_v19  ;;  %v5125_v54 = vpop.f32.mrb[21].mxu1 }
 0x4ec   : > { %5984 = vst [vmem:[#allocation20_spill] sm:$0xff] %v5125_v54  ;;  %v5127_v22 = vpop.f32.mrb[22].mxu1 }
 0x4ed   : > { %5985 = vst [vmem:[#allocation21_spill] sm:$0xff] %v5127_v22  ;;  %v5129_v34 = vpop.f32.mrb[23].mxu1 }
 0x4ee   : > { %5986 = vst [vmem:[#allocation22_spill] sm:$0xff] %v5129_v34 }
 0x4fa   : > { %v5131_v60 = vpop.f32.mrb[24].mxu1 }
 0x4fb   : > { %5987 = vst [vmem:[#allocation23_spill] sm:$0xff] %v5131_v60  ;;  %v5133_v48 = vpop.f32.mrb[25].mxu1 }
 0x4fc   : > { %5988 = vst [vmem:[#allocation24_spill] sm:$0xff] %v5133_v48  ;;  %v5135_v52 = vpop.f32.mrb[26].mxu1 }
 0x4fd   : > { %5989 = vst [vmem:[#allocation25_spill] sm:$0xff] %v5135_v52  ;;  %v5137_v49 = vpop.f32.mrb[27].mxu1 }
 0x4fe   : > { %5990 = vst [vmem:[#allocation26_spill] sm:$0xff] %v5137_v49 }
 0x502   : > { %v5139_v15 = vpop.f32.mrb[28].mxu1 }
 0x503   : > { %5991 = vst [vmem:[#allocation27_spill] sm:$0xff] %v5139_v15  ;;  %v5141_v7 = vpop.f32.mrb[29].mxu1 }
 0x504   : > { %5992 = vst [vmem:[#allocation28_spill] sm:$0xff] %v5141_v7  ;;  %v5143_v8 = vpop.f32.mrb[30].mxu1 }
 0x505   : > { %5993 = vst [vmem:[#allocation29_spill] sm:$0xff] %v5143_v8  ;;  %v5145_v36 = vpop.f32.mrb[31].mxu1 }
 0x506   : > { %5994 = vst [vmem:[#allocation30_spill] sm:$0xff] %v5145_v36 }
 0x50a   : > { %v3472_v9 = vpop.f32.mrb[32].mxu1 }
 0x50b   : > { %1329 = vmax.xlane.f32.xlu0 %v3472_v9  ;;  %v1262_v10 = vpop.f32.mrb[33].mxu1 }
 0x50c   : > { %v3473_v11 = vpop.f32.mrb[34].mxu1 }
 0x50d   : > { %v1265_v42 = vpop.f32.mrb[35].mxu1 }
 0x50e   : > { %1327 = vmax.xlane.f32.xlu1 %v1265_v42 }
 0x50f   : > { %1325 = vmax.xlane.f32.xlu0 %v1262_v10 }
 0x512   : > { %v3476_v43 = vpop.f32.mrb[36].mxu1 }
 0x513   : > { %1331 = vmax.xlane.f32.xlu0 %v3473_v11  ;;  %v5147_v14 = vpop.f32.mrb[37].mxu1 }
 0x514   : > { %v5149_v45 = vpop.f32.mrb[38].mxu1 }
 0x515   : > { %1339 = vmax.xlane.f32.xlu1 %v5149_v45  ;;  %v5152_v44 = vpop.f32.mrb[39].mxu1 }
 0x517   : > { %1337 = vmax.xlane.f32.xlu0 %v3476_v43 }
 0x519   : > { %1335 = vmax.xlane.f32.xlu1 %v5152_v44 }
 0x51a   : > { %v5155_v53 = vpop.f32.mrb[40].mxu1 }
 0x51b   : > { %1333 = vmax.xlane.f32.xlu0 %v5147_v14  ;;  %v5158_v46 = vpop.f32.mrb[41].mxu1 }
 0x51c   : > { %v5160_v17 = vpop.f32.mrb[42].mxu1 }
 0x51d   : > { %1347 = vmax.xlane.f32.xlu1 %v5160_v17  ;;  %v5163_v5 = vpop.f32.mrb[43].mxu1 }
 0x51f   : > { %1345 = vmax.xlane.f32.xlu0 %v5155_v53 }
 0x521   : > { %1343 = vmax.xlane.f32.xlu1 %v5163_v5 }
 0x522   : > { %v5167_v37 = vpop.f32.mrb[44].mxu1 }
 0x523   : > { %1341 = vmax.xlane.f32.xlu0 %v5158_v46  ;;  %v5170_v50 = vpop.f32.mrb[45].mxu1 }
 0x524   : > { %v5172_v51 = vpop.f32.mrb[46].mxu1 }
 0x525   : > { %v5174_v47 = vpop.f32.mrb[47].mxu1 }
 0x527   : > { %1353 = vmax.xlane.f32.xlu0 %v5167_v37 }
 0x52b   : > { %1349 = vmax.xlane.f32.xlu0 %v5170_v50 }
 0x532   : > { %1628 = vrot.lane.b32.xlu1 %v4823_v0, %s4481_s28 }
 0x541   : > { %1626 = vrot.lane.b32.xlu0 %v4799_v39, %s4481_s28 }
 0x556   : > { %1355 = vmax.xlane.f32.xlu1 %v5172_v51 }
 0x55a   : > { %1351 = vmax.xlane.f32.xlu1 %v5174_v47 }
 0x598   : > { %v1330_v6 = vpop.xlane.xlu0 %1329 }
 0x599   : > { %v1359_v26 = vsub.f32 %v3472_v9, %v1330_v6 }
 0x59b   : > { %v1377_v62 = vmul.f32 1.442695, %v1359_v26  ;;  %v1328_v35 = vpop.xlane.xlu1 %1327 }
 0x59c   : > { %v1358_v31 = vsub.f32 %v1265_v42, %v1328_v35  ;;  %v1326_v25 = vpop.xlane.xlu0 %1325 }
 0x59d   : > { %4087 = vpow2.f32 %v1377_v62  ;;  %v1357_v8 = vsub.f32 %v1262_v10, %v1326_v25 }
 0x59e   : > { %v1375_v15 = vmul.f32 1.442695, %v1358_v31 }
 0x59f   : > { %v1373_v19 = vmul.f32 1.442695, %v1357_v8 }
 0x5a0   : > { %4089 = vpow2.f32 %v1375_v15  ;;  %v1332_v7 = vpop.xlane.xlu0 %1331 }
 0x5a1   : > { %4091 = vpow2.f32 %v1373_v19  ;;  %v1360_v54 = vsub.f32 %v3473_v11, %v1332_v7 }
 0x5a3   : > { %v1379_v22 = vmul.f32 1.442695, %v1360_v54 }
 0x5a4   : > { %v1338_v19 = vpop.xlane.xlu0 %1337 }
 0x5a5   : > { %4093 = vpow2.f32 %v1379_v22  ;;  %v1340_v22 = vpop.xlane.xlu1 %1339  ;;  %v1363_v7 = vsub.f32 %v3476_v43, %v1338_v19 }
 0x5a6   : > { %v1364_v31 = vsub.f32 %v5149_v45, %v1340_v22 }
 0x5a7   : > { %v5186_v36 = vpop.eup %4087  ;;  %v1385_v42 = vmul.f32 1.442695, %v1363_v7 }
 0x5a8   : > { %1409 = vadd.xlane.f32.xlu1 %v5186_v36  ;;  %v1334_v54 = vpop.xlane.xlu0 %1333  ;;  %v1387_v60 = vmul.f32 1.442695, %v1364_v31 }
 0x5a9   : > { %v1336_v8 = vpop.xlane.xlu1 %1335  ;;  %v1361_v6 = vsub.f32 %v5147_v14, %v1334_v54  ;;  %4095 = vpow2.f32 %v1385_v42 }
 0x5aa   : > { %v5189_v34 = vpop.eup %4089  ;;  %v1362_v26 = vsub.f32 %v5152_v44, %v1336_v8 }
 0x5ab   : > { %v5191_v9 = vpop.eup %4091  ;;  %1407 = vadd.xlane.f32.xlu0 %v5189_v34  ;;  %v1381_v25 = vmul.f32 1.442695, %v1361_v6 }
 0x5ac   : > { %1405 = vadd.xlane.f32.xlu1 %v5191_v9  ;;  %v1346_v15 = vpop.xlane.xlu0 %1345  ;;  %v1383_v52 = vmul.f32 1.442695, %v1362_v26 }
 0x5ad   : > { %v1348_v62 = vpop.xlane.xlu1 %1347  ;;  %v1367_v23 = vsub.f32 %v5155_v53, %v1346_v15  ;;  %4097 = vpow2.f32 %v1381_v25 }
 0x5ae   : > { %4099 = vpow2.f32 %v1383_v52  ;;  %v1368_v45 = vsub.f32 %v5160_v17, %v1348_v62 }
 0x5af   : > { %v5195_v10 = vpop.eup %4093  ;;  %v1393_v19 = vmul.f32 1.442695, %v1367_v23  ;;  %4101 = vpow2.f32 %v1387_v60 }
 0x5b0   : > { %1411 = vadd.xlane.f32.xlu1 %v5195_v10  ;;  %v1342_v11 = vpop.xlane.xlu0 %1341  ;;  %v1395_v23 = vmul.f32 1.442695, %v1368_v45 }
 0x5b1   : > { %v1344_v21 = vpop.xlane.xlu1 %1343  ;;  %v1365_v14 = vsub.f32 %v5158_v46, %v1342_v11  ;;  %4103 = vpow2.f32 %v1393_v19 }
 0x5b2   : > { %v1366_v46 = vsub.f32 %v5163_v5, %v1344_v21 }
 0x5b3   : > { %v1389_v22 = vmul.f32 1.442695, %v1365_v14  ;;  %v5210_v8 = vpop.eup %4095 }
 0x5b4   : > { %v1354_v35 = vpop.xlane.xlu0 %1353  ;;  %v1391_v15 = vmul.f32 1.442695, %v1366_v46 }
 0x5b5   : > { %v1371_v43 = vsub.f32 %v5167_v37, %v1354_v35  ;;  %v5212_v53 = vpop.permute.xlu1 %1628 }
 0x5b7   : > { %v1401_v44 = vmul.f32 1.442695, %v1371_v43  ;;  %v5216_v60 = vpop.eup %4097 }
 0x5b8   : > { %v1350_v54 = vpop.xlane.xlu0 %1349 }
 0x5b9   : > { %v1369_v7 = vsub.f32 %v5170_v50, %v1350_v54  ;;  %4105 = vpow2.f32 %v1401_v44  ;;  %v5218_v50 = vpop.eup %4099 }
 0x5ba   : > { %4107 = vpow2.f32 %v1389_v22  ;;  %v5223_v42 = vpop.eup %4101 }
 0x5bb   : > { %v1397_v52 = vmul.f32 1.442695, %v1369_v7  ;;  %v5225_v21 = vpop.eup %4103 }
 0x5bc   : > { %v1627_v19 = vpop.permute.xlu0 %1626 }
 0x5bd   : > { %4109 = vpow2.f32 %v1397_v52 }
 0x5be   : > { %4111 = vpow2.f32 %v1395_v23 }
 0x5c1   : > { %1632 = vrot.lane.b32.xlu1 %v4871_v57, %s4481_s28  ;;  %1630 = vrot.lane.b32.xlu0 %v4847_v28, %s4481_s28 }
 0x5c3   : > { %v5230_v26 = vpop.eup %4105 }
 0x5c4   : > { %v5232_v62 = vpop.eup %4107 }
 0x5c7   : > { %v5236_v35 = vpop.eup %4109 }
 0x5c8   : > { %v5238_v31 = vpop.eup %4111 }
 0x5e0   : > { %1417 = vadd.xlane.f32.xlu0 %v5210_v8 }
 0x5e3   : > { %v1356_v37 = vpop.xlane.xlu1 %1355 }
 0x5e4   : > { %v1372_v17 = vsub.f32 %v5172_v51, %v1356_v37  ;;  %1413 = vadd.xlane.f32.xlu0 %v5216_v60 }
 0x5e5   : > { %1415 = vadd.xlane.f32.xlu1 %v5218_v50 }
 0x5e6   : > { %v1403_v11 = vmul.f32 1.442695, %v1372_v17 }
 0x5e7   : > { %v1352_v6 = vpop.xlane.xlu1 %1351 }
 0x5e8   : > { %4113 = vpow2.f32 %v1403_v11  ;;  %v1370_v5 = vsub.f32 %v5174_v47, %v1352_v6  ;;  %1419 = vadd.xlane.f32.xlu0 %v5223_v42  ;;  %v1663_v11 = vsel %vm737_vm0, %v5110_v24, 0 }
 0x5e9   : > { %1425 = vadd.xlane.f32.xlu1 %v5225_v21  ;;  %4115 = vpow2.f32 %v1391_v15 }
 0x5ea   : > { %v1399_v51 = vmul.f32 1.442695, %v1370_v5 }
 0x5ec   : > { %1433 = vadd.xlane.f32.xlu0 %v5230_v26  ;;  %4117 = vpow2.f32 %v1399_v51 }
 0x5ed   : > { %1421 = vadd.xlane.f32.xlu1 %v5232_v62 }
 0x5f0   : > { %1429 = vadd.xlane.f32.xlu0 %v5236_v35 }
 0x5f1   : > { %1427 = vadd.xlane.f32.xlu1 %v5238_v31 }
 0x5f2   : > { %v5242_v47 = vpop.eup %4113 }
 0x5f3   : > { %v5244_v25 = vpop.eup %4115 }
 0x5f4   : > { %1435 = vadd.xlane.f32.xlu0 %v5242_v47 }
 0x5f5   : > { %1423 = vadd.xlane.f32.xlu1 %v5244_v25 }
 0x5f6   : > { %v5248_v43 = vpop.eup %4117 }
 0x5f9   : > { %1431 = vadd.xlane.f32.xlu1 %v5248_v43 }
 0x60a   : > { %1634 = vrot.lane.b32.xlu0 %v4889_v12, %s4481_s28  ;;  %1636 = vrot.lane.b32.xlu1 %v4901_v32, %s4481_s28 }
 0x60e   : > { %1606 = vrot.lane.b32.xlu0 %v4763_v3, %s4481_s28  ;;  %1608 = vrot.lane.b32.xlu1 %v4781_v18, %s4481_s28 }
 0x612   : > { %1610 = vrot.lane.b32.xlu0 %v4803_v41, %s4481_s28  ;;  %1612 = vrot.lane.b32.xlu1 %v4827_v4, %s4481_s28 }
 0x616   : > { %1614 = vrot.lane.b32.xlu0 %v4851_v30, %s4481_s28  ;;  %1616 = vrot.lane.b32.xlu1 %v4875_v59, %s4481_s28 }
 0x61a   : > { %1618 = vrot.lane.b32.xlu0 %v4891_v13, %s4481_s28  ;;  %1620 = vrot.lane.b32.xlu1 %v4903_v33, %s4481_s28 }
 0x61e   : > { %1935 = vrot.lane.b32.xlu0 %v4801_v40, %s4481_s28  ;;  %1937 = vrot.lane.b32.xlu1 %v4797_v38, %s4481_s28 }
 0x622   : > { %1939 = vrot.lane.b32.xlu0 %v4825_v1, %s4481_s28  ;;  %1941 = vrot.lane.b32.xlu1 %v4820_v63, %s4481_s28 }
 0x626   : > { %1943 = vrot.lane.b32.xlu0 %v4849_v29, %s4481_s28  ;;  %1945 = vrot.lane.b32.xlu1 %v4844_v27, %s4481_s28 }
 0x62a   : > { %1947 = vrot.lane.b32.xlu0 %v4873_v58, %s4481_s28  ;;  %1949 = vrot.lane.b32.xlu1 %v4868_v55, %s4481_s28 }
 0x62e   : > { %2072 = vrot.lane.b32.xlu0 %v4761_v2, %s4482_s6  ;;  %2074 = vrot.lane.b32.xlu1 %v4777_v16, %s4482_s6 }
 0x635   : > { %v1410_v14 = vpop.xlane.xlu1 %1409 }
 0x638   : > { %v1408_v54 = vpop.xlane.xlu0 %1407 }
 0x639   : > { %4119 = vrcp.f32 %v1408_v54  ;;  %v1406_v44 = vpop.xlane.xlu1 %1405 }
 0x63a   : > { %4121 = vrcp.f32 %v1406_v44 }
 0x63b   : > { %4123 = vrcp.f32 %v1410_v14 }
 0x63c   : > { %v1631_v24 = vpop.permute.xlu0 %1630 }
 0x63d   : > { %v1412_v7 = vpop.xlane.xlu1 %1411  ;;  %v1675_v6 = vsel %vm737_vm0, %v1631_v24, 0 }
 0x63e   : > { %4125 = vrcp.f32 %v1412_v7 }
 0x643   : > { %v4120_v45 = vpop.eup %4119 }
 0x644   : > { %v4122_v22 = vpop.eup %4121  ;;  %v1454_v52 = vmul.f32 %v4120_v45, %v5189_v34  ;;  %v1666_v34 = vsel %vm737_vm0, %v5184_v61, 0 }
 0x645   : > { %v1453_v23 = vmul.f32 %v4122_v22, %v5191_v9  ;;  %v4124_v46 = vpop.eup %4123  ;;  %v1672_v9 = vsel %vm737_vm0, %v5212_v53, 0 }
 0x646   : > { %v1455_v16 = vmul.f32 %v4124_v46, %v5186_v36  ;;  %v1669_v36 = vsel %vm737_vm0, %v1627_v19, 0 }
 0x647   : > { %v1469_v2 = vpack.c.bf16 %v1454_v52, %v1453_v23 }
 0x648   : > { %v4126_v37 = vpop.eup %4125 }
 0x649   : > { %v1456_v17 = vmul.f32 %v4126_v37, %v5195_v10  ;;  %3502 = vmatprep.mubr.bf16.mxu0 %v1469_v2 }
 0x64b   : > { %v1470_v15 = vpack.c.bf16 %v1456_v17, %v1455_v16 }
 0x64d   : > { %3503 = vmatmul.mubr.bf16.vlgmr.msra.gmra.mrb[48].mxu0 %v1470_v15 }
 0x64e   : > { %3519 = vmatpush3.bf16.xpose.msra.mxu0 %v1663_v11 }
 0x64f   : > { %3767 = vmatprep.subr.msk.bf16.mxu0 %vm737_vm0, %v5184_v61  ;;  %v1633_v61 = vpop.permute.xlu1 %1632 }
 0x650   : > { %v1678_v14 = vsel %vm737_vm0, %v1633_v61, 0 }
 0x656   : > { %3521 = vmatpush3.bf16.xpose.msra.mxu0 %v1666_v34 }
 0x657   : > { %3768 = vmatprep.subr.msk.bf16.mxu0 %vm737_vm0, %v1627_v19 }
 0x65e   : > { %3523 = vmatpush3.bf16.xpose.msra.mxu0 %v1669_v36 }
 0x65f   : > { %3769 = vmatprep.subr.msk.bf16.mxu0 %vm737_vm0, %v5212_v53 }
 0x666   : > { %3525 = vmatpush3.bf16.xpose.msra.mxu0 %v1672_v9 }
 0x667   : > { %3770 = vmatprep.subr.msk.bf16.mxu0 %vm737_vm0, %v1631_v24 }
 0x66d   : > { %v1418_v10 = vpop.xlane.xlu0 %1417 }
 0x66e   : > { %3527 = vmatpush3.bf16.xpose.msra.mxu0 %v1675_v6 }
 0x66f   : > { %3771 = vmatprep.subr.msk.bf16.mxu0 %vm737_vm0, %v1633_v61 }
 0x671   : > { %v1414_v5 = vpop.xlane.xlu0 %1413 }
 0x672   : > { %4127 = vrcp.f32 %v1414_v5  ;;  %v1416_v51 = vpop.xlane.xlu1 %1415 }
 0x673   : > { %4129 = vrcp.f32 %v1416_v51 }
 0x674   : > { %4131 = vrcp.f32 %v1418_v10 }
 0x675   : > { %v1420_v19 = vpop.xlane.xlu0 %1419 }
 0x676   : > { %4133 = vrcp.f32 %v1420_v19  ;;  %3529 = vmatpush3.bf16.xpose.msra.mxu0 %v1678_v14  ;;  %v1426_v53 = vpop.xlane.xlu1 %1425 }
 0x679   : > { %v1434_v54 = vpop.xlane.xlu0 %1433 }
 0x67a   : > { %v1422_v44 = vpop.xlane.xlu1 %1421 }
 0x67c   : > { %v4128_v7 = vpop.eup %4127 }
 0x67d   : > { %v4130_v45 = vpop.eup %4129  ;;  %v1430_v22 = vpop.xlane.xlu0 %1429  ;;  %v1457_v52 = vmul.f32 %v4128_v7, %v5216_v60 }
 0x67e   : > { %v4132_v23 = vpop.eup %4131  ;;  %v1428_v46 = vpop.xlane.xlu1 %1427  ;;  %v1458_v2 = vmul.f32 %v4130_v45, %v5218_v50 }
 0x67f   : > { %4135 = vrcp.f32 %v1428_v46  ;;  %v1459_v15 = vmul.f32 %v4132_v23, %v5210_v8 }
 0x680   : > { %v4134_v37 = vpop.eup %4133  ;;  %v1471_v16 = vpack.c.bf16 %v1458_v2, %v1457_v52  ;;  %4137 = vrcp.f32 %v1422_v44 }
 0x681   : > { %v1436_v17 = vpop.xlane.xlu0 %1435  ;;  %v1460_v11 = vmul.f32 %v4134_v37, %v5223_v42  ;;  %4139 = vrcp.f32 %v1426_v53 }
 0x682   : > { %3506 = vmatprep.mubr.bf16.mxu0 %v1471_v16  ;;  %v1424_v34 = vpop.xlane.xlu1 %1423 }
 0x683   : > { %4141 = vrcp.f32 %v1424_v34  ;;  %v1472_v36 = vpack.c.bf16 %v1460_v11, %v1459_v15 }
 0x684   : > { %4143 = vrcp.f32 %v1430_v22 }
 0x685   : > { %v1635_v60 = vpop.permute.xlu0 %1634  ;;  %3507 = vmatmul.mubr.bf16.gmra.mrb[52].mxu0 %v1472_v36 }
 0x686   : > { %3772 = vmatprep.subr.msk.bf16.mxu0 %vm737_vm0, %v1635_v60  ;;  %v1432_v50 = vpop.xlane.xlu1 %1431  ;;  %v1681_v9 = vsel %vm737_vm0, %v1635_v60, 0 }
 0x687   : > { %4145 = vrcp.f32 %v1432_v50  ;;  %3531 = vmatpush3.bf16.xpose.msra.mxu0 %v1681_v9 }
 0x688   : > { %4147 = vrcp.f32 %v1436_v17 }
 0x689   : > { %v1607_v24 = vpop.permute.xlu0 %1606  ;;  %v4136_v8 = vpop.eup %4135  ;;  %4149 = vrcp.f32 %v1434_v54 }
 0x68a   : > { %v1637_v42 = vpop.permute.xlu1 %1636  ;;  %v4138_v10 = vpop.eup %4137  ;;  %v1464_v51 = vmul.f32 %v4136_v8, %v5238_v31 }
 0x68b   : > { %3773 = vmatprep.subr.msk.bf16.mxu0 %vm737_vm0, %v1637_v42  ;;  %v4140_v6 = vpop.eup %4139  ;;  %v1684_v14 = vsel %vm737_vm0, %v1637_v42, 0  ;;  %v1461_v53 = vmul.f32 %v4138_v10, %v5232_v62 }
 0x68c   : > { %v1463_v54 = vmul.f32 %v4140_v6, %v5225_v21 }
 0x68d   : > { %v4142_v61 = vpop.eup %4141  ;;  %v1611_v5 = vpop.permute.xlu0 %1610 }
 0x68e   : > { %v1609_v19 = vpop.permute.xlu1 %1608  ;;  %v1462_v44 = vmul.f32 %v4142_v61, %v5244_v25  ;;  %v4144_v7 = vpop.eup %4143  ;;  %v1474_v23 = vpack.c.bf16 %v1464_v51, %v1463_v54 }
 0x68f   : > { %3533 = vmatpush3.bf16.xpose.msra.mxu0 %v1684_v14  ;;  %v1465_v31 = vmul.f32 %v4144_v7, %v5236_v35 }
 0x690   : > { %v1473_v45 = vpack.c.bf16 %v1462_v44, %v1461_v53 }
 0x691   : > { %v4146_v22 = vpop.eup %4145  ;;  %v1615_v52 = vpop.permute.xlu0 %1614 }
 0x692   : > { %v4148_v46 = vpop.eup %4147  ;;  %3510 = vmatprep.mubr.bf16.mxu0 %v1473_v45  ;;  %v1613_v2 = vpop.permute.xlu1 %1612  ;;  %v1466_v37 = vmul.f32 %v4146_v22, %v5248_v43 }
 0x693   : > { %3511 = vmatmul.mubr.bf16.gmra.mrb[56].mxu0 %v1474_v23  ;;  %v4150_v16 = vpop.eup %4149  ;;  %v1468_v25 = vmul.f32 %v4148_v46, %v5242_v47 }
 0x694   : > { %v1475_v62 = vpack.c.bf16 %v1466_v37, %v1465_v31  ;;  %v1467_v21 = vmul.f32 %v4150_v16, %v5230_v26 }
 0x695   : > { %v1619_v17 = vpop.permute.xlu0 %1618 }
 0x696   : > { %3514 = vmatprep.mubr.bf16.mxu0 %v1475_v62  ;;  %v1617_v15 = vpop.permute.xlu1 %1616  ;;  %v1476_v34 = vpack.c.bf16 %v1468_v25, %v1467_v21 }
 0x699   : > { %v1936_v11 = vpop.permute.xlu0 %1935 }
 0x69a   : > { %3550 = vmatprep.subr.bf16.mxu1 %v1936_v11  ;;  %v1621_v36 = vpop.permute.xlu1 %1620 }
 0x69b   : > { %3515 = vmatmul.mubr.bf16.gmra.mrb[60].mxu0 %v1476_v34  ;;  %3551 = vmatpush3.bf16.msra.mxu1 %v1936_v11 }
 0x69c   : > { %3534 = vmatprep.mubr.msk.bf16.mxu0 %vm737_vm0, %v1607_v24 }
 0x69d   : > { %v1940_v43 = vpop.permute.xlu0 %1939 }
 0x69e   : > { %v1938_v35 = vpop.permute.xlu1 %1937 }
 0x69f   : > { %3552 = vmatprep.subr.bf16.mxu1 %v1938_v35 }
 0x6a0   : > { %3553 = vmatpush3.bf16.msra.mxu1 %v1938_v35 }
 0x6a1   : > { %3554 = vmatprep.subr.bf16.mxu1 %v1940_v43  ;;  %v1944_v26 = vpop.permute.xlu0 %1943 }
 0x6a2   : > { %v1942_v47 = vpop.permute.xlu1 %1941 }
 0x6a3   : > { %3535 = vmatmul.mubr.msk.bf16.vlgmr.msra.gmra.mrb[64].mxu0 %vm737_vm0, %v1609_v19 }
 0x6a4   : > { %3538 = vmatprep.mubr.msk.bf16.mxu0 %vm737_vm0, %v1611_v5  ;;  %3555 = vmatpush3.bf16.msra.mxu1 %v1940_v43 }
 0x6a5   : > { %3556 = vmatprep.subr.bf16.mxu1 %v1942_v47  ;;  %v1948_v50 = vpop.permute.xlu0 %1947 }
 0x6a6   : > { %v1946_v60 = vpop.permute.xlu1 %1945 }
 0x6a8   : > { %3557 = vmatpush3.bf16.msra.mxu1 %v1942_v47 }
 0x6a9   : > { %3558 = vmatprep.subr.bf16.mxu1 %v1944_v26  ;;  %v5334_v24 = vpop.permute.xlu0 %2072 }
 0x6aa   : > { %v1950_v9 = vpop.permute.xlu1 %1949 }
 0x6ab   : > { %3539 = vmatmul.mubr.msk.bf16.gmra.mrb[68].mxu0 %vm737_vm0, %v1613_v2 }
 0x6ac   : > { %3542 = vmatprep.mubr.msk.bf16.mxu0 %vm737_vm0, %v1615_v52  ;;  %3559 = vmatpush3.bf16.msra.mxu1 %v1944_v26 }
 0x6ad   : > { %3560 = vmatprep.subr.bf16.mxu1 %v1946_v60 }
 0x6ae   : > { %v5424_v7 = vpop.permute.xlu1 %2074 }
 0x6b0   : > { %3561 = vmatpush3.bf16.msra.mxu1 %v1946_v60 }
 0x6b1   : > { %3562 = vmatprep.subr.bf16.mxu1 %v1948_v50 }
 0x6b3   : > { %3543 = vmatmul.mubr.msk.bf16.gmra.mrb[72].mxu0 %vm737_vm0, %v1617_v15 }
 0x6b4   : > { %3546 = vmatprep.mubr.msk.bf16.mxu0 %vm737_vm0, %v1619_v17  ;;  %3563 = vmatpush3.bf16.msra.mxu1 %v1948_v50 }
 0x6b5   : > { %3564 = vmatprep.subr.bf16.mxu1 %v1950_v9 }
 0x6b8   : > { %3565 = vmatpush3.bf16.msra.mxu1 %v1950_v9 }
 0x6b9   : > { %3774 = vmatprep.subr.msk.bf16.mxu1 %vm737_vm0, %v5334_v24 }
 0x6bb   : > { %3547 = vmatmul.mubr.msk.bf16.gmra.mrb[76].mxu0 %vm737_vm0, %v1621_v36 }
 0x720   : > { %v5339_v8 = vpop.f32.mrb[48].mxu0 }
 0x721   : > { %5995 = vst [vmem:[#allocation31_spill] sm:$0xff] %v5339_v8  ;;  %v5341_v42 = vpop.f32.mrb[49].mxu0 }
 0x722   : > { %v5343_v10 = vpop.f32.mrb[50].mxu0 }
 0x723   : > { %v5345_v6 = vpop.f32.mrb[51].mxu0 }
 0x758   : > { %v5347_v61 = vpop.f32.mrb[52].mxu0 }
 0x759   : > { %5996 = vst [vmem:[#allocation32_spill] sm:$0xff] %v5347_v61  ;;  %v5349_v5 = vpop.f32.mrb[53].mxu0 }
 0x75a   : > { %5997 = vst [vmem:[#allocation33_spill] sm:$0xff] %v5349_v5  ;;  %v5351_v51 = vpop.f32.mrb[54].mxu0 }
 0x75b   : > { %v5353_v19 = vpop.f32.mrb[55].mxu0 }
 0x766   : > { %v5355_v14 = vpop.f32.mrb[56].mxu0 }
 0x767   : > { %5998 = vst [vmem:[#allocation34_spill] sm:$0xff] %v5355_v14  ;;  %v5359_v44 = vpop.f32.mrb[57].mxu0 }
 0x768   : > { %v5363_v54 = vpop.f32.mrb[58].mxu0 }
 0x769   : > { %v5367_v22 = vpop.f32.mrb[59].mxu0 }
 0x76e   : > { %v5371_v23 = vpop.f32.mrb[60].mxu0 }
 0x76f   : > { %5999 = vst [vmem:[#allocation35_spill] sm:$0xff] %v5371_v23  ;;  %v5375_v2 = vpop.f32.mrb[61].mxu0 }
 0x770   : > { %6000 = vst [vmem:[#allocation36_spill] sm:$0xff] %v5375_v2  ;;  %v5379_v37 = vpop.f32.mrb[62].mxu0 }
 0x771   : > { %v5383_v62 = vpop.f32.mrb[63].mxu0 }
 0x776   : > { %v3536_v25 = vpop.f32.mrb[64].mxu0 }
 0x777   : > { %1787 = vmax.xlane.f32.xlu0 %v3536_v25  ;;  %v1720_v15 = vpop.f32.mrb[65].mxu0 }
 0x778   : > { %v3537_v21 = vpop.f32.mrb[66].mxu0 }
 0x779   : > { %v1723_v11 = vpop.f32.mrb[67].mxu0 }
 0x77a   : > { %1785 = vmax.xlane.f32.xlu1 %v1723_v11 }
 0x77b   : > { %1783 = vmax.xlane.f32.xlu0 %v1720_v15 }
 0x77e   : > { %v3540_v34 = vpop.f32.mrb[68].mxu0 }
 0x77f   : > { %1789 = vmax.xlane.f32.xlu0 %v3537_v21  ;;  %v5387_v36 = vpop.f32.mrb[69].mxu0 }
 0x780   : > { %v5389_v35 = vpop.f32.mrb[70].mxu0 }
 0x781   : > { %1797 = vmax.xlane.f32.xlu1 %v5389_v35  ;;  %v5392_v43 = vpop.f32.mrb[71].mxu0 }
 0x783   : > { %1795 = vmax.xlane.f32.xlu0 %v3540_v34 }
 0x785   : > { %1793 = vmax.xlane.f32.xlu1 %v5392_v43 }
 0x786   : > { %v5395_v47 = vpop.f32.mrb[72].mxu0 }
 0x787   : > { %1791 = vmax.xlane.f32.xlu0 %v5387_v36  ;;  %v5398_v26 = vpop.f32.mrb[73].mxu0 }
 0x788   : > { %v5400_v60 = vpop.f32.mrb[74].mxu0 }
 0x789   : > { %1805 = vmax.xlane.f32.xlu1 %v5400_v60  ;;  %v5403_v50 = vpop.f32.mrb[75].mxu0 }
 0x78b   : > { %1803 = vmax.xlane.f32.xlu0 %v5395_v47 }
 0x78d   : > { %1801 = vmax.xlane.f32.xlu1 %v5403_v50 }
 0x78e   : > { %v5407_v9 = vpop.f32.mrb[76].mxu0 }
 0x78f   : > { %1799 = vmax.xlane.f32.xlu0 %v5398_v26  ;;  %v5410_v46 = vpop.f32.mrb[77].mxu0 }
 0x790   : > { %v5412_v31 = vpop.f32.mrb[78].mxu0 }
 0x791   : > { %v5414_v53 = vpop.f32.mrb[79].mxu0 }
 0x793   : > { %1811 = vmax.xlane.f32.xlu0 %v5407_v9 }
 0x797   : > { %1807 = vmax.xlane.f32.xlu0 %v5410_v46 }
 0x79e   : > { %2078 = vrot.lane.b32.xlu1 %v4823_v0, %s4482_s6 }
 0x7ad   : > { %2076 = vrot.lane.b32.xlu0 %v4799_v39, %s4482_s6 }
 0x7c2   : > { %1813 = vmax.xlane.f32.xlu1 %v5412_v31 }
 0x7c6   : > { %1809 = vmax.xlane.f32.xlu1 %v5414_v53 }
 0x804   : > { %v1788_v16 = vpop.xlane.xlu0 %1787 }
 0x805   : > { %v1817_v17 = vsub.f32 %v3536_v25, %v1788_v16 }
 0x807   : > { %v1835_v45 = vmul.f32 1.442695, %v1817_v17  ;;  %v1786_v52 = vpop.xlane.xlu1 %1785 }
 0x808   : > { %v1816_v48 = vsub.f32 %v1723_v11, %v1786_v52  ;;  %v1784_v56 = vpop.xlane.xlu0 %1783 }
 0x809   : > { %4151 = vpow2.f32 %v1835_v45  ;;  %v1815_v20 = vsub.f32 %v1720_v15, %v1784_v56 }
 0x80a   : > { %v1833_v49 = vmul.f32 1.442695, %v1816_v48 }
 0x80b   : > { %v1831_v61 = vmul.f32 1.442695, %v1815_v20 }
 0x80c   : > { %4153 = vpow2.f32 %v1833_v49  ;;  %v1790_v0 = vpop.xlane.xlu0 %1789 }
 0x80d   : > { %4155 = vpow2.f32 %v1831_v61  ;;  %v1818_v39 = vsub.f32 %v3537_v21, %v1790_v0 }
 0x80e   : > { %v1798_v49 = vpop.xlane.xlu1 %1797 }
 0x80f   : > { %v1837_v23 = vmul.f32 1.442695, %v1818_v39  ;;  %v1822_v0 = vsub.f32 %v5389_v35, %v1798_v49 }
 0x810   : > { %v1796_v20 = vpop.xlane.xlu0 %1795 }
 0x811   : > { %4157 = vpow2.f32 %v1837_v23  ;;  %v1821_v45 = vsub.f32 %v3540_v34, %v1796_v20  ;;  %v1845_v8 = vmul.f32 1.442695, %v1822_v0 }
 0x812   : > { %v1794_v52 = vpop.xlane.xlu1 %1793 }
 0x813   : > { %v5426_v5 = vpop.eup %4151  ;;  %v1843_v17 = vmul.f32 1.442695, %v1821_v45  ;;  %v1820_v15 = vsub.f32 %v5392_v43, %v1794_v52 }
 0x814   : > { %1867 = vadd.xlane.f32.xlu1 %v5426_v5  ;;  %v1792_v48 = vpop.xlane.xlu0 %1791 }
 0x815   : > { %v1819_v25 = vsub.f32 %v5387_v36, %v1792_v48  ;;  %4159 = vpow2.f32 %v1843_v17  ;;  %v1841_v39 = vmul.f32 1.442695, %v1820_v15 }
 0x816   : > { %v5429_v2 = vpop.eup %4153  ;;  %v1806_v21 = vpop.xlane.xlu1 %1805 }
 0x817   : > { %v5431_v16 = vpop.eup %4155  ;;  %1865 = vadd.xlane.f32.xlu0 %v5429_v2  ;;  %v1826_v35 = vsub.f32 %v5400_v60, %v1806_v21 }
 0x818   : > { %1863 = vadd.xlane.f32.xlu1 %v5431_v16  ;;  %v1804_v61 = vpop.xlane.xlu0 %1803 }
 0x81a   : > { %v1802_v14 = vpop.xlane.xlu1 %1801 }
 0x81b   : > { %v5435_v56 = vpop.eup %4157 }
 0x81c   : > { %1869 = vadd.xlane.f32.xlu1 %v5435_v56  ;;  %v1800_v23 = vpop.xlane.xlu0 %1799 }
 0x81d   : > { %v1823_v36 = vsub.f32 %v5398_v26, %v1800_v23  ;;  %v1824_v26 = vsub.f32 %v5403_v50, %v1802_v14 }
 0x81f   : > { %v1847_v49 = vmul.f32 1.442695, %v1823_v36  ;;  %v5450_v52 = vpop.eup %4159  ;;  %v1849_v17 = vmul.f32 1.442695, %v1824_v26 }
 0x820   : > { %v1812_v11 = vpop.xlane.xlu0 %1811 }
 0x821   : > { %v1829_v34 = vsub.f32 %v5407_v9, %v1812_v11 }
 0x823   : > { %v1859_v43 = vmul.f32 1.442695, %v1829_v34 }
 0x824   : > { %v1808_v48 = vpop.xlane.xlu0 %1807 }
 0x825   : > { %v1827_v45 = vsub.f32 %v5410_v46, %v1808_v48  ;;  %v2113_v48 = vsel %vm737_vm0, %v5334_v24, 0 }
 0x827   : > { %v1855_v9 = vmul.f32 1.442695, %v1827_v45 }
 0x82d   : > { %2082 = vrot.lane.b32.xlu1 %v4871_v57, %s4482_s6  ;;  %2080 = vrot.lane.b32.xlu0 %v4847_v28, %s4482_s6  ;;  %v1839_v57 = vmul.f32 1.442695, %v1819_v25  ;;  %v1825_v28 = vsub.f32 %v5395_v47, %v1804_v61  ;;  %v5452_v47 = vpop.permute.xlu1 %2078  ;;  %v1853_v61 = vmul.f32 1.442695, %v1826_v35 }
 0x82f   : > { %4161 = vpow2.f32 %v1839_v57  ;;  %v1851_v20 = vmul.f32 1.442695, %v1825_v28 }
 0x830   : > { %4163 = vpow2.f32 %v1841_v39 }
 0x831   : > { %4165 = vpow2.f32 %v1845_v8 }
 0x832   : > { %4167 = vpow2.f32 %v1851_v20 }
 0x833   : > { %4169 = vpow2.f32 %v1859_v43 }
 0x834   : > { %4171 = vpow2.f32 %v1847_v49 }
 0x835   : > { %4173 = vpow2.f32 %v1855_v9 }
 0x836   : > { %4175 = vpow2.f32 %v1853_v61 }
 0x839   : > { %v5456_v8 = vpop.eup %4161 }
 0x83a   : > { %v5458_v46 = vpop.eup %4163 }
 0x83b   : > { %v5463_v15 = vpop.eup %4165 }
 0x83c   : > { %v5465_v14 = vpop.eup %4167 }
 0x83d   : > { %v5470_v11 = vpop.eup %4169 }
 0x83e   : > { %v5472_v0 = vpop.eup %4171 }
 0x83f   : > { %v5476_v57 = vpop.eup %4173 }
 0x840   : > { %v5478_v39 = vpop.eup %4175 }
 0x84c   : > { %1875 = vadd.xlane.f32.xlu0 %v5450_v52 }
 0x84f   : > { %v1814_v23 = vpop.xlane.xlu1 %1813 }
 0x850   : > { %v1830_v60 = vsub.f32 %v5412_v31, %v1814_v23  ;;  %1871 = vadd.xlane.f32.xlu0 %v5456_v8 }
 0x851   : > { %1873 = vadd.xlane.f32.xlu1 %v5458_v46 }
 0x852   : > { %v1861_v25 = vmul.f32 1.442695, %v1830_v60 }
 0x853   : > { %v1810_v21 = vpop.xlane.xlu1 %1809 }
 0x854   : > { %4177 = vpow2.f32 %v1861_v25  ;;  %v1828_v50 = vsub.f32 %v5414_v53, %v1810_v21  ;;  %1877 = vadd.xlane.f32.xlu0 %v5463_v15 }
 0x855   : > { %1883 = vadd.xlane.f32.xlu1 %v5465_v14  ;;  %4179 = vpow2.f32 %v1849_v17 }
 0x856   : > { %v1857_v31 = vmul.f32 1.442695, %v1828_v50 }
 0x858   : > { %1891 = vadd.xlane.f32.xlu0 %v5470_v11  ;;  %4181 = vpow2.f32 %v1857_v31 }
 0x859   : > { %1879 = vadd.xlane.f32.xlu1 %v5472_v0 }
 0x85c   : > { %1887 = vadd.xlane.f32.xlu0 %v5476_v57 }
 0x85d   : > { %1885 = vadd.xlane.f32.xlu1 %v5478_v39 }
 0x85e   : > { %v5482_v53 = vpop.eup %4177 }
 0x85f   : > { %v5484_v28 = vpop.eup %4179 }
 0x860   : > { %1893 = vadd.xlane.f32.xlu0 %v5482_v53 }
 0x861   : > { %1881 = vadd.xlane.f32.xlu1 %v5484_v28 }
 0x862   : > { %v5488_v34 = vpop.eup %4181 }
 0x865   : > { %1889 = vadd.xlane.f32.xlu1 %v5488_v34 }
 0x876   : > { %2084 = vrot.lane.b32.xlu0 %v4889_v12, %s4482_s6  ;;  %2086 = vrot.lane.b32.xlu1 %v4901_v32, %s4482_s6 }
 0x87a   : > { %2056 = vrot.lane.b32.xlu0 %v4763_v3, %s4482_s6  ;;  %2058 = vrot.lane.b32.xlu1 %v4781_v18, %s4482_s6  ;;  %v2077_v3 = vpop.permute.xlu0 %2076 }
 0x87e   : > { %2060 = vrot.lane.b32.xlu0 %v4803_v41, %s4482_s6  ;;  %2062 = vrot.lane.b32.xlu1 %v4827_v4, %s4482_s6 }
 0x882   : > { %2064 = vrot.lane.b32.xlu0 %v4851_v30, %s4482_s6  ;;  %2066 = vrot.lane.b32.xlu1 %v4875_v59, %s4482_s6 }
 0x886   : > { %2068 = vrot.lane.b32.xlu0 %v4891_v13, %s4482_s6  ;;  %2070 = vrot.lane.b32.xlu1 %v4903_v33, %s4482_s6 }
 0x88a   : > { %2385 = vrot.lane.b32.xlu0 %v4801_v40, %s4482_s6  ;;  %2387 = vrot.lane.b32.xlu1 %v4797_v38, %s4482_s6 }
 0x88e   : > { %2389 = vrot.lane.b32.xlu0 %v4825_v1, %s4482_s6 }
 0x8a1   : > { %v1868_v18 = vpop.xlane.xlu1 %1867 }
 0x8a4   : > { %v1866_v41 = vpop.xlane.xlu0 %1865 }
 0x8a5   : > { %4183 = vrcp.f32 %v1866_v41  ;;  %v1864_v4 = vpop.xlane.xlu1 %1863 }
 0x8a6   : > { %4185 = vrcp.f32 %v1864_v4 }
 0x8a7   : > { %4187 = vrcp.f32 %v1868_v18 }
 0x8a8   : > { %v2081_v24 = vpop.permute.xlu0 %2080 }
 0x8a9   : > { %v1870_v30 = vpop.xlane.xlu1 %1869 }
 0x8aa   : > { %4189 = vrcp.f32 %v1870_v30 }
 0x8af   : > { %v4184_v59 = vpop.eup %4183 }
 0x8b0   : > { %v4186_v12 = vpop.eup %4185  ;;  %v1912_v13 = vmul.f32 %v4184_v59, %v5429_v2  ;;  %v2116_v2 = vsel %vm737_vm0, %v5424_v7, 0 }
 0x8b1   : > { %v1911_v40 = vmul.f32 %v4186_v12, %v5431_v16  ;;  %v4188_v32 = vpop.eup %4187  ;;  %v2122_v16 = vsel %vm737_vm0, %v5452_v47, 0 }
 0x8b2   : > { %v1913_v1 = vmul.f32 %v4188_v32, %v5426_v5  ;;  %v2119_v5 = vsel %vm737_vm0, %v2077_v3, 0 }
 0x8b3   : > { %v1927_v38 = vpack.c.bf16 %v1912_v13, %v1911_v40 }
 0x8b4   : > { %v4190_v33 = vpop.eup %4189 }
 0x8b5   : > { %v1914_v20 = vmul.f32 %v4190_v33, %v5435_v56  ;;  %3566 = vmatprep.mubr.bf16.mxu1 %v1927_v38  ;;  %v2125_v56 = vsel %vm737_vm0, %v2081_v24, 0 }
 0x8b7   : > { %v1928_v36 = vpack.c.bf16 %v1914_v20, %v1913_v1 }
 0x8b9   : > { %3567 = vmatmul.mubr.bf16.vlgmr.msra.gmra.mrb[48].mxu1 %v1928_v36 }
 0x8ba   : > { %3583 = vmatpush3.bf16.xpose.msra.mxu1 %v2113_v48 }
 0x8bb   : > { %3775 = vmatprep.subr.msk.bf16.mxu1 %vm737_vm0, %v5424_v7  ;;  %v2083_v7 = vpop.permute.xlu1 %2082 }
 0x8bc   : > { %v2128_v49 = vsel %vm737_vm0, %v2083_v7, 0 }
 0x8c2   : > { %3585 = vmatpush3.bf16.xpose.msra.mxu1 %v2116_v2 }
 0x8c3   : > { %3776 = vmatprep.subr.msk.bf16.mxu1 %vm737_vm0, %v2077_v3 }
 0x8ca   : > { %3587 = vmatpush3.bf16.xpose.msra.mxu1 %v2119_v5 }
 0x8cb   : > { %3777 = vmatprep.subr.msk.bf16.mxu1 %vm737_vm0, %v5452_v47 }
 0x8d2   : > { %3589 = vmatpush3.bf16.xpose.msra.mxu1 %v2122_v16 }
 0x8d3   : > { %3778 = vmatprep.subr.msk.bf16.mxu1 %vm737_vm0, %v2081_v24 }
 0x8d9   : > { %v1876_v43 = vpop.xlane.xlu0 %1875 }
 0x8da   : > { %3591 = vmatpush3.bf16.xpose.msra.mxu1 %v2125_v56 }
 0x8db   : > { %3779 = vmatprep.subr.msk.bf16.mxu1 %vm737_vm0, %v2083_v7 }
 0x8dd   : > { %v1872_v45 = vpop.xlane.xlu0 %1871 }
 0x8de   : > { %4191 = vrcp.f32 %v1872_v45  ;;  %v1874_v35 = vpop.xlane.xlu1 %1873 }
 0x8df   : > { %4193 = vrcp.f32 %v1874_v35 }
 0x8e0   : > { %4195 = vrcp.f32 %v1876_v43 }
 0x8e1   : > { %v1878_v9 = vpop.xlane.xlu0 %1877 }
 0x8e2   : > { %4197 = vrcp.f32 %v1878_v9  ;;  %3593 = vmatpush3.bf16.xpose.msra.mxu1 %v2128_v49  ;;  %v1884_v47 = vpop.xlane.xlu1 %1883 }
 0x8e5   : > { %v1892_v61 = vpop.xlane.xlu0 %1891 }
 0x8e6   : > { %v1880_v26 = vpop.xlane.xlu1 %1879 }
 0x8e8   : > { %v4192_v23 = vpop.eup %4191 }
 0x8e9   : > { %v4194_v60 = vpop.eup %4193  ;;  %v1888_v17 = vpop.xlane.xlu0 %1887  ;;  %v1915_v25 = vmul.f32 %v4192_v23, %v5456_v8 }
 0x8ea   : > { %v4196_v21 = vpop.eup %4195  ;;  %v1886_v50 = vpop.xlane.xlu1 %1885  ;;  %v1916_v31 = vmul.f32 %v4194_v60, %v5458_v46 }
 0x8eb   : > { %4199 = vrcp.f32 %v1886_v50  ;;  %v1917_v4 = vmul.f32 %v4196_v21, %v5450_v52 }
 0x8ec   : > { %v4198_v3 = vpop.eup %4197  ;;  %v1929_v18 = vpack.c.bf16 %v1916_v31, %v1915_v25  ;;  %4201 = vrcp.f32 %v1880_v26 }
 0x8ed   : > { %v1894_v41 = vpop.xlane.xlu0 %1893  ;;  %v1918_v30 = vmul.f32 %v4198_v3, %v5463_v15  ;;  %4203 = vrcp.f32 %v1884_v47 }
 0x8ee   : > { %3570 = vmatprep.mubr.bf16.mxu1 %v1929_v18  ;;  %v1882_v59 = vpop.xlane.xlu1 %1881 }
 0x8ef   : > { %4205 = vrcp.f32 %v1882_v59  ;;  %v1930_v12 = vpack.c.bf16 %v1918_v30, %v1917_v4 }
 0x8f0   : > { %4207 = vrcp.f32 %v1888_v17 }
 0x8f1   : > { %v2085_v8 = vpop.permute.xlu0 %2084  ;;  %3571 = vmatmul.mubr.bf16.gmra.mrb[52].mxu1 %v1930_v12 }
 0x8f2   : > { %v2131_v13 = vsel %vm737_vm0, %v2085_v8, 0  ;;  %3780 = vmatprep.subr.msk.bf16.mxu1 %vm737_vm0, %v2085_v8  ;;  %v1890_v46 = vpop.xlane.xlu1 %1889 }
 0x8f3   : > { %4209 = vrcp.f32 %v1890_v46  ;;  %3595 = vmatpush3.bf16.xpose.msra.mxu1 %v2131_v13 }
 0x8f4   : > { %4211 = vrcp.f32 %v1894_v41 }
 0x8f5   : > { %v2057_v40 = vpop.permute.xlu0 %2056  ;;  %v4200_v52 = vpop.eup %4199  ;;  %4213 = vrcp.f32 %v1892_v61 }
 0x8f6   : > { %v2087_v15 = vpop.permute.xlu1 %2086  ;;  %v4202_v32 = vpop.eup %4201  ;;  %v1922_v20 = vmul.f32 %v4200_v52, %v5478_v39 }
 0x8f7   : > { %3781 = vmatprep.subr.msk.bf16.mxu1 %vm737_vm0, %v2087_v15  ;;  %v4204_v38 = vpop.eup %4203  ;;  %v2134_v36 = vsel %vm737_vm0, %v2087_v15, 0  ;;  %v1919_v2 = vmul.f32 %v4202_v32, %v5472_v0 }
 0x8f8   : > { %v1921_v24 = vmul.f32 %v4204_v38, %v5465_v14 }
 0x8f9   : > { %v4206_v33 = vpop.eup %4205  ;;  %v2061_v1 = vpop.permute.xlu0 %2060 }
 0x8fa   : > { %v2059_v48 = vpop.permute.xlu1 %2058  ;;  %v1920_v5 = vmul.f32 %v4206_v33, %v5484_v28  ;;  %v4208_v16 = vpop.eup %4207  ;;  %v1932_v45 = vpack.c.bf16 %v1922_v20, %v1921_v24 }
 0x8fb   : > { %3597 = vmatpush3.bf16.xpose.msra.mxu1 %v2134_v36  ;;  %v1923_v39 = vmul.f32 %v4208_v16, %v5476_v57 }
 0x8fc   : > { %v1931_v56 = vpack.c.bf16 %v1920_v5, %v1919_v2 }
 0x8fd   : > { %v4210_v43 = vpop.eup %4209  ;;  %v2065_v7 = vpop.permute.xlu0 %2064 }
 0x8fe   : > { %v4212_v35 = vpop.eup %4211  ;;  %3574 = vmatprep.mubr.bf16.mxu1 %v1931_v56  ;;  %v2063_v49 = vpop.permute.xlu1 %2062  ;;  %v1924_v9 = vmul.f32 %v4210_v43, %v5488_v34 }
 0x8ff   : > { %3575 = vmatmul.mubr.bf16.gmra.mrb[56].mxu1 %v1932_v45  ;;  %v4214_v47 = vpop.eup %4213  ;;  %v1926_v28 = vmul.f32 %v4212_v35, %v5482_v53 }
 0x900   : > { %v1933_v0 = vpack.c.bf16 %v1924_v9, %v1923_v39  ;;  %v1925_v14 = vmul.f32 %v4214_v47, %v5470_v11 }
 0x901   : > { %v2069_v61 = vpop.permute.xlu0 %2068 }
 0x902   : > { %3578 = vmatprep.mubr.bf16.mxu1 %v1933_v0  ;;  %v2067_v26 = vpop.permute.xlu1 %2066  ;;  %v1934_v60 = vpack.c.bf16 %v1926_v28, %v1925_v14 }
 0x905   : > { %v2386_v23 = vpop.permute.xlu0 %2385 }
 0x906   : > { %3614 = vmatprep.subr.bf16.mxu0 %v2386_v23  ;;  %v2071_v17 = vpop.permute.xlu1 %2070 }
 0x907   : > { %3579 = vmatmul.mubr.bf16.gmra.mrb[60].mxu1 %v1934_v60  ;;  %3615 = vmatpush3.bf16.msra.mxu0 %v2386_v23 }
 0x908   : > { %3598 = vmatprep.mubr.msk.bf16.mxu1 %vm737_vm0, %v2057_v40 }
 0x909   : > { %v2390_v34 = vpop.permute.xlu0 %2389 }
 0x90a   : > { %v2388_v57 = vpop.permute.xlu1 %2387 }
 0x90b   : > { %3616 = vmatprep.subr.bf16.mxu0 %v2388_v57 }
 0x90c   : > { %3617 = vmatpush3.bf16.msra.mxu0 %v2388_v57 }
 0x90d   : > { %3618 = vmatprep.subr.bf16.mxu0 %v2390_v34 }
 0x90f   : > { %3599 = vmatmul.mubr.msk.bf16.vlgmr.msra.gmra.mrb[64].mxu1 %vm737_vm0, %v2059_v48 }
 0x910   : > { %3602 = vmatprep.mubr.msk.bf16.mxu1 %vm737_vm0, %v2061_v1  ;;  %3619 = vmatpush3.bf16.msra.mxu0 %v2390_v34 }
 0x917   : > { %3603 = vmatmul.mubr.msk.bf16.gmra.mrb[68].mxu1 %vm737_vm0, %v2063_v49 }
 0x918   : > { %3606 = vmatprep.mubr.msk.bf16.mxu1 %vm737_vm0, %v2065_v7 }
 0x91f   : > { %3607 = vmatmul.mubr.msk.bf16.gmra.mrb[72].mxu1 %vm737_vm0, %v2067_v26 }
 0x920   : > { %3610 = vmatprep.mubr.msk.bf16.mxu1 %vm737_vm0, %v2069_v61 }
 0x927   : > { %3611 = vmatmul.mubr.msk.bf16.gmra.mrb[76].mxu1 %vm737_vm0, %v2071_v17 }
 0x98c   : > { %v5561_v11 = vpop.f32.mrb[48].mxu1 }
 0x98d   : > { %v5563_v53 = vpop.f32.mrb[49].mxu1 }
 0x98e   : > { %v5565_v25 = vpop.f32.mrb[50].mxu1 }
 0x98f   : > { %v5567_v21 = vpop.f32.mrb[51].mxu1 }
 0x9c4   : > { %v5569_v50 = vpop.f32.mrb[52].mxu1 }
 0x9c5   : > { %v5571_v31 = vpop.f32.mrb[53].mxu1 }
 0x9c6   : > { %v5573_v3 = vpop.f32.mrb[54].mxu1 }
 0x9c7   : > { %v5575_v18 = vpop.f32.mrb[55].mxu1 }
 0x9d2   : > { %v5577_v41 = vpop.f32.mrb[56].mxu1 }
 0x9d3   : > { %v5581_v30 = vpop.f32.mrb[57].mxu1 }
 0x9d4   : > { %v3881_v59 = vpack.i.bf16 %v5581_v30, %v5563_v53  ;;  %v5585_v12 = vpop.f32.mrb[58].mxu1  ;;  %v6003_v30 = vpack.i.bf16 %v5383_v62, %v5353_v19  ;;  %v6006_v19 = vpack.i.bf16 %v5359_v44, %v5341_v42  ;;  %v6007_v62 = vld [vmem:[#allocation34_spill] sm:$0xff]  ;;  %v6015_v44 = vld [vmem:[#allocation35_spill] sm:$0xff] }
 0x9d5   : > { %v3906_v8 = vpack.i.bf16 %v5585_v12, %v5565_v25  ;;  %v5589_v13 = vpop.f32.mrb[59].mxu1  ;;  %v6005_v25 = vpack.i.bf16 %v5379_v37, %v5351_v51  ;;  %v6010_v51 = vpack.i.bf16 %v5577_v41, %v5561_v11  ;;  %v6011_v37 = vld [vmem:[#allocation36_spill] sm:$0xff] }
 0x9d6   : > { %v3886_v46 = vpack.i.bf16 %v5589_v13, %v5567_v21  ;;  %v6012_v13 = vld [vmem:[#allocation33_spill] sm:$0xff] }
 0x9da   : > { %v5593_v40 = vpop.f32.mrb[60].mxu1 }
 0x9db   : > { %v5597_v15 = vpop.f32.mrb[61].mxu1 }
 0x9dc   : > { %v5601_v38 = vpop.f32.mrb[62].mxu1  ;;  %v6014_v42 = vpack.i.bf16 %v5597_v15, %v5571_v31 }
 0x9dd   : > { %v5605_v1 = vpop.f32.mrb[63].mxu1 }
 0x9e2   : > { %v3600_v36 = vpop.f32.mrb[64].mxu1 }
 0x9e3   : > { %2237 = vmax.xlane.f32.xlu0 %v3600_v36  ;;  %v2170_v48 = vpop.f32.mrb[65].mxu1 }
 0x9e4   : > { %v3601_v2 = vpop.f32.mrb[66].mxu1 }
 0x9e5   : > { %v2173_v5 = vpop.f32.mrb[67].mxu1 }
 0x9e6   : > { %2235 = vmax.xlane.f32.xlu1 %v2173_v5 }
 0x9e7   : > { %2233 = vmax.xlane.f32.xlu0 %v2170_v48 }
 0x9ea   : > { %v3604_v16 = vpop.f32.mrb[68].mxu1 }
 0x9eb   : > { %2239 = vmax.xlane.f32.xlu0 %v3601_v2  ;;  %v2186_v24 = vpop.f32.mrb[69].mxu1 }
 0x9ec   : > { %v3605_v56 = vpop.f32.mrb[70].mxu1 }
 0x9ed   : > { %2247 = vmax.xlane.f32.xlu1 %v3605_v56  ;;  %v2189_v43 = vpop.f32.mrb[71].mxu1 }
 0x9ef   : > { %2245 = vmax.xlane.f32.xlu0 %v3604_v16 }
 0x9f1   : > { %2243 = vmax.xlane.f32.xlu1 %v2189_v43 }
 0x9f2   : > { %v3608_v7 = vpop.f32.mrb[72].mxu1 }
 0x9f3   : > { %2241 = vmax.xlane.f32.xlu0 %v2186_v24  ;;  %v5609_v45 = vpop.f32.mrb[73].mxu1 }
 0x9f4   : > { %v5611_v35 = vpop.f32.mrb[74].mxu1 }
 0x9f5   : > { %2255 = vmax.xlane.f32.xlu1 %v5611_v35  ;;  %v5614_v49 = vpop.f32.mrb[75].mxu1 }
 0x9f7   : > { %2253 = vmax.xlane.f32.xlu0 %v3608_v7 }
 0x9f9   : > { %2251 = vmax.xlane.f32.xlu1 %v5614_v49 }
 0x9fa   : > { %v5617_v39 = vpop.f32.mrb[76].mxu1 }
 0x9fb   : > { %2249 = vmax.xlane.f32.xlu0 %v5609_v45  ;;  %v5620_v9 = vpop.f32.mrb[77].mxu1 }
 0x9fc   : > { %v5622_v47 = vpop.f32.mrb[78].mxu1 }
 0x9fd   : > { %v5624_v0 = vpop.f32.mrb[79].mxu1 }
 0x9ff   : > { %2261 = vmax.xlane.f32.xlu0 %v5617_v39 }
 0xa03   : > { %2257 = vmax.xlane.f32.xlu0 %v5620_v9 }
 0xa0a   : > { %2393 = vrot.lane.b32.xlu1 %v4849_v29, %s4482_s6 }
 0xa19   : > { %2391 = vrot.lane.b32.xlu0 %v4820_v63, %s4482_s6 }
 0xa2e   : > { %2263 = vmax.xlane.f32.xlu1 %v5622_v47 }
 0xa32   : > { %2259 = vmax.xlane.f32.xlu1 %v5624_v0 }
 0xa43   : > { %2395 = vrot.lane.b32.xlu1 %v4844_v27, %s4482_s6 }
 0xa70   : > { %v2238_v61 = vpop.xlane.xlu0 %2237 }
 0xa71   : > { %v2267_v28 = vsub.f32 %v3600_v36, %v2238_v61 }
 0xa73   : > { %v2285_v26 = vmul.f32 1.442695, %v2267_v28  ;;  %v2236_v23 = vpop.xlane.xlu1 %2235 }
 0xa74   : > { %v2234_v14 = vpop.xlane.xlu0 %2233  ;;  %v2266_v57 = vsub.f32 %v2173_v5, %v2236_v23 }
 0xa75   : > { %4215 = vpow2.f32 %v2285_v26  ;;  %v2265_v60 = vsub.f32 %v2170_v48, %v2234_v14 }
 0xa76   : > { %v2283_v52 = vmul.f32 1.442695, %v2266_v57 }
 0xa77   : > { %v2281_v17 = vmul.f32 1.442695, %v2265_v60 }
 0xa78   : > { %v2240_v29 = vpop.xlane.xlu0 %2239 }
 0xa79   : > { %4217 = vpow2.f32 %v2281_v17  ;;  %v2268_v34 = vsub.f32 %v3601_v2, %v2240_v29 }
 0xa7a   : > { %v2248_v63 = vpop.xlane.xlu1 %2247 }
 0xa7b   : > { %v2287_v33 = vmul.f32 1.442695, %v2268_v34  ;;  %v2272_v48 = vsub.f32 %v3605_v56, %v2248_v63 }
 0xa7c   : > { %v2246_v32 = vpop.xlane.xlu0 %2245 }
 0xa7d   : > { %4219 = vpow2.f32 %v2287_v33  ;;  %v2271_v4 = vsub.f32 %v3604_v16, %v2246_v32  ;;  %v2295_v32 = vmul.f32 1.442695, %v2272_v48 }
 0xa7e   : > { %v2244_v20 = vpop.xlane.xlu1 %2243  ;;  %4221 = vpow2.f32 %v2283_v52 }
 0xa7f   : > { %v5636_v27 = vpop.eup %4215  ;;  %v2293_v36 = vmul.f32 1.442695, %v2271_v4  ;;  %v2270_v61 = vsub.f32 %v2189_v43, %v2244_v20 }
 0xa80   : > { %v2242_v28 = vpop.xlane.xlu0 %2241  ;;  %2317 = vadd.xlane.f32.xlu1 %v5636_v27 }
 0xa81   : > { %4223 = vpow2.f32 %v2293_v36  ;;  %v2291_v5 = vmul.f32 1.442695, %v2270_v61  ;;  %v2269_v26 = vsub.f32 %v2186_v24, %v2242_v28 }
 0xa82   : > { %v2256_v23 = vpop.xlane.xlu1 %2255 }
 0xa83   : > { %v5639_v2 = vpop.eup %4217  ;;  %v2289_v14 = vmul.f32 1.442695, %v2269_v26  ;;  %4225 = vpow2.f32 %v2291_v5  ;;  %v2276_v52 = vsub.f32 %v5611_v35, %v2256_v23 }
 0xa84   : > { %v2254_v33 = vpop.xlane.xlu0 %2253  ;;  %2313 = vadd.xlane.f32.xlu1 %v5639_v2 }
 0xa85   : > { %4227 = vpow2.f32 %v2289_v14  ;;  %v2275_v4 = vsub.f32 %v3608_v7, %v2254_v33  ;;  %v2303_v29 = vmul.f32 1.442695, %v2276_v52  ;;  %v6001_v52 = vpack.i.bf16 %v5367_v22, %v5345_v6 }
 0xa86   : > { %4229 = vpow2.f32 %v2295_v32  ;;  %v2252_v24 = vpop.xlane.xlu1 %2251  ;;  %v6002_v6 = vpack.i.bf16 %v5363_v54, %v5343_v10  ;;  %v6004_v54 = vpack.i.bf16 %v5605_v1, %v5575_v18  ;;  %v6008_v18 = vld [vmem:[#allocation31_spill] sm:$0xff]  ;;  %v6016_v1 = vld [vmem:[#allocation32_spill] sm:$0xff] }
 0xa87   : > { %v5642_v20 = vpop.eup %4219  ;;  %v2301_v16 = vmul.f32 1.442695, %v2275_v4  ;;  %v2274_v7 = vsub.f32 %v5614_v49, %v2252_v24 }
 0xa88   : > { %v2250_v56 = vpop.xlane.xlu0 %2249  ;;  %2319 = vadd.xlane.f32.xlu1 %v5642_v20  ;;  %v5647_v60 = vpop.eup %4221 }
 0xa89   : > { %v2273_v43 = vsub.f32 %v5609_v45, %v2250_v56  ;;  %4231 = vpow2.f32 %v2301_v16  ;;  %v2299_v61 = vmul.f32 1.442695, %v2274_v7 }
 0xa8a   : > { %v2394_v14 = vpop.permute.xlu1 %2393 }
 0xa8b   : > { %v5649_v17 = vpop.eup %4223  ;;  %v2297_v57 = vmul.f32 1.442695, %v2273_v43 }
 0xa8c   : > { %v2262_v34 = vpop.xlane.xlu0 %2261  ;;  %2325 = vadd.xlane.f32.xlu0 %v5649_v17  ;;  %2315 = vadd.xlane.f32.xlu1 %v5647_v60 }
 0xa8d   : > { %4233 = vpow2.f32 %v2297_v57  ;;  %v2279_v35 = vsub.f32 %v5617_v39, %v2262_v34  ;;  %v5655_v63 = vpop.eup %4225 }
 0xa8e   : > { %4235 = vpow2.f32 %v2303_v29 }
 0xa8f   : > { %v5657_v45 = vpop.eup %4227  ;;  %v2309_v36 = vmul.f32 1.442695, %v2279_v35 }
 0xa90   : > { %2321 = vadd.xlane.f32.xlu0 %v5657_v45  ;;  %v2258_v28 = vpop.xlane.xlu0 %2257  ;;  %2323 = vadd.xlane.f32.xlu1 %v5655_v63  ;;  %v5662_v48 = vpop.eup %4229 }
 0xa91   : > { %4237 = vpow2.f32 %v2309_v36  ;;  %v2277_v49 = vsub.f32 %v5620_v9, %v2258_v28 }
 0xa92   : > { %4239 = vpow2.f32 %v2299_v61 }
 0xa93   : > { %v2305_v5 = vmul.f32 1.442695, %v2277_v49  ;;  %v5665_v26 = vpop.eup %4231 }
 0xa94   : > { %v2392_v39 = vpop.permute.xlu0 %2391  ;;  %2327 = vadd.xlane.f32.xlu0 %v5662_v48 }
 0xa95   : > { %4241 = vpow2.f32 %v2305_v5  ;;  %3620 = vmatprep.subr.bf16.mxu0 %v2392_v39 }
 0xa96   : > { %3621 = vmatpush3.bf16.msra.mxu0 %v2392_v39 }
 0xa97   : > { %v5667_v23 = vpop.eup %4233  ;;  %3622 = vmatprep.subr.bf16.mxu0 %v2394_v14 }
 0xa98   : > { %2333 = vadd.xlane.f32.xlu0 %v5665_v26  ;;  %2329 = vadd.xlane.f32.xlu1 %v5667_v23  ;;  %v5671_v9 = vpop.eup %4235 }
 0xa9a   : > { %3623 = vmatpush3.bf16.msra.mxu0 %v2394_v14 }
 0xa9b   : > { %v5673_v33 = vpop.eup %4237 }
 0xa9c   : > { %2341 = vadd.xlane.f32.xlu1 %v5673_v33  ;;  %2335 = vadd.xlane.f32.xlu0 %v5671_v9  ;;  %v5677_v32 = vpop.eup %4239 }
 0xa9f   : > { %v5679_v4 = vpop.eup %4241 }
 0xaa0   : > { %2337 = vadd.xlane.f32.xlu1 %v5679_v4  ;;  %2331 = vadd.xlane.f32.xlu0 %v5677_v32 }
 0xab1   : > { %2399 = vrot.lane.b32.xlu1 %v4868_v55, %s4482_s6 }
 0xab5   : > { %3877 = vrot.lane.b32.xlu1 %v6001_v52, %s4482_s6 }
 0xab6   : > { %2397 = vrot.lane.b32.xlu0 %v4873_v58, %s4482_s6 }
 0xab9   : > { %3882 = vrot.lane.b32.xlu1 %v3881_v59, %s4481_s28 }
 0xabb   : > { %v2264_v16 = vpop.xlane.xlu1 %2263 }
 0xabc   : > { %v2280_v53 = vsub.f32 %v5622_v47, %v2264_v16  ;;  %v6017_v47 = vpack.i.bf16 %v6015_v44, %v6016_v1 }
 0xabd   : > { %3887 = vrot.lane.b32.xlu1 %v3886_v46, %s4481_s28  ;;  %v6013_v46 = vpack.i.bf16 %v6011_v37, %v6012_v13 }
 0xabe   : > { %v2311_v10 = vmul.f32 1.442695, %v2280_v53 }
 0xabf   : > { %v2260_v55 = vpop.xlane.xlu1 %2259 }
 0xac0   : > { %v2278_v22 = vsub.f32 %v5624_v0, %v2260_v55 }
 0xac1   : > { %3897 = vrot.lane.b32.xlu1 %v6002_v6, %s4482_s6 }
 0xac2   : > { %v2307_v21 = vmul.f32 1.442695, %v2278_v22 }
 0xac3   : > { %v2396_v58 = vpop.permute.xlu1 %2395 }
 0xac4   : > { %3624 = vmatprep.subr.bf16.mxu0 %v2396_v58  ;;  %4243 = vpow2.f32 %v2307_v21 }
 0xac5   : > { %3907 = vrot.lane.b32.xlu1 %v3906_v8, %s4481_s28  ;;  %3625 = vmatpush3.bf16.msra.mxu0 %v2396_v58  ;;  %4245 = vpow2.f32 %v2311_v10  ;;  %v6009_v8 = vpack.i.bf16 %v6007_v62, %v6008_v18 }
 0xac9   : > { %3917 = vrot.lane.b32.xlu1 %v6003_v30, %s4482_s6 }
 0xacd   : > { %3927 = vrot.lane.b32.xlu1 %v6004_v54, %s4481_s28 }
 0xace   : > { %v5721_v59 = vpop.eup %4243 }
 0xacf   : > { %v5724_v12 = vpop.eup %4245 }
 0xad1   : > { %3937 = vrot.lane.b32.xlu1 %v6005_v25, %s4482_s6 }
 0xad5   : > { %2339 = vadd.xlane.f32.xlu0 %v5721_v59 }
 0xad9   : > { %2343 = vadd.xlane.f32.xlu0 %v5724_v12 }
 0xaef   : > { %3872 = vrot.lane.b32.xlu0 %v6006_v19, %s4482_s6 }
 0xaf3   : > { %3892 = vrot.lane.b32.xlu0 %v6009_v8, %s4482_s6 }
 0xaf7   : > { %3902 = vrot.lane.b32.xlu0 %v6010_v51, %s4481_s28 }
 0xafb   : > { %3912 = vrot.lane.b32.xlu0 %v6013_v46, %s4482_s6 }
 0xaff   : > { %3922 = vrot.lane.b32.xlu0 %v6014_v42, %s4481_s28 }
 0xb03   : > { %3932 = vrot.lane.b32.xlu0 %v6017_v47, %s4482_s6 }
 0xb0d   : > { %v2318_v0 = vpop.xlane.xlu1 %2317 }
 0xb11   : > { %v2314_v56 = vpop.xlane.xlu1 %2313 }
 0xb12   : > { %4247 = vrcp.f32 %v2314_v56 }
 0xb15   : > { %v2320_v24 = vpop.xlane.xlu1 %2319 }
 0xb19   : > { %v2326_v11 = vpop.xlane.xlu0 %2325  ;;  %v2316_v41 = vpop.xlane.xlu1 %2315 }
 0xb1a   : > { %4249 = vrcp.f32 %v2316_v41 }
 0xb1b   : > { %4251 = vrcp.f32 %v2320_v24  ;;  %v3144_v24 = vld [vmem:[#allocation7] sm:$0xff]  }
 0xb1c   : > { %v4248_v7 = vpop.eup %4247  ;;  %3734 = vmatprep.subr.bf16.mxu1 %v3144_v24 }
 0xb1d   : > { %v2322_v43 = vpop.xlane.xlu0 %2321  ;;  %v2324_v57 = vpop.xlane.xlu1 %2323  ;;  %v2361_v15 = vmul.f32 %v4248_v7, %v5639_v2  ;;  %3742 = vmatpush3.bf16.msra.mxu1 %v3144_v24  ;;  %v3180_v7 = vld [vmem:[#allocation7 + $0x30] sm:$0xff]  }
 0xb1e   : > { %4253 = vrcp.f32 %v2322_v43 }
 0xb1f   : > { %4255 = vrcp.f32 %v2324_v57 }
 0xb20   : > { %4257 = vrcp.f32 %v2318_v0 }
 0xb21   : > { %v2328_v29 = vpop.xlane.xlu0 %2327 }
 0xb22   : > { %4259 = vrcp.f32 %v2328_v29 }
 0xb24   : > { %v4250_v34 = vpop.eup %4249 }
 0xb25   : > { %v2334_v35 = vpop.xlane.xlu0 %2333  ;;  %v2330_v31 = vpop.xlane.xlu1 %2329  ;;  %v2362_v36 = vmul.f32 %v4250_v34, %v5647_v60 }
 0xb26   : > { %v4252_v14 = vpop.eup %4251 }
 0xb27   : > { %v2377_v61 = vpack.c.bf16 %v2362_v36, %v2361_v15  ;;  %v2364_v6 = vmul.f32 %v4252_v14, %v5642_v20  ;;  %v3181_v15 = vld [vmem:[#allocation7 + $0x38] sm:$0xff]  }
 0xb28   : > { %v4254_v52 = vpop.eup %4253 }
 0xb29   : > { %v2336_v28 = vpop.xlane.xlu0 %2335  ;;  %v2342_v49 = vpop.xlane.xlu1 %2341  ;;  %3630 = vmatprep.mubr.bf16.mxu0 %v2377_v61  ;;  %v2365_v22 = vmul.f32 %v4254_v52, %v5657_v45 }
 0xb2a   : > { %v4256_v55 = vpop.eup %4255 }
 0xb2b   : > { %v4258_v2 = vpop.eup %4257  ;;  %v2366_v58 = vmul.f32 %v4256_v55, %v5655_v63  ;;  %v6018_v55 = vpack.i.bf16 %v5593_v40, %v5569_v50 }
 0xb2c   : > { %v2363_v53 = vmul.f32 %v4258_v2, %v5636_v27  ;;  %v4260_v30 = vpop.eup %4259  ;;  %v6019_v2 = vpack.i.bf16 %v5601_v38, %v5573_v3 }
 0xb2d   : > { %v2332_v5 = vpop.xlane.xlu0 %2331  ;;  %v2338_v39 = vpop.xlane.xlu1 %2337  ;;  %v2379_v10 = vpack.c.bf16 %v2366_v58, %v2365_v22  ;;  %v2368_v20 = vmul.f32 %v4260_v30, %v5662_v48 }
 0xb2e   : > { %4261 = vrcp.f32 %v2332_v5  ;;  %v2378_v21 = vpack.c.bf16 %v2364_v6, %v2363_v53 }
 0xb2f   : > { %4263 = vrcp.f32 %v2326_v11  ;;  %v3175_v11 = vld [vmem:[#allocation7 + $0x8] sm:$0xff]  }
 0xb30   : > { %4265 = vrcp.f32 %v2330_v31  ;;  %3735 = vmatprep.subr.bf16.mxu1 %v3175_v11 }
 0xb31   : > { %v2398_v16 = vpop.permute.xlu0 %2397  ;;  %v2400_v60 = vpop.permute.xlu1 %2399  ;;  %4267 = vrcp.f32 %v2336_v28  ;;  %3743 = vmatpush3.bf16.msra.mxu1 %v3175_v11 }
 0xb32   : > { %3626 = vmatprep.subr.bf16.mxu0 %v2398_v16  ;;  %4269 = vrcp.f32 %v2334_v35 }
 0xb33   : > { %3627 = vmatpush3.bf16.msra.mxu0 %v2398_v16  ;;  %4271 = vrcp.f32 %v2338_v39 }
 0xb34   : > { %3628 = vmatprep.subr.bf16.mxu0 %v2400_v60 }
 0xb35   : > { %v3878_v50 = vpop.permute.xlu1 %3877 }
 0xb37   : > { %3629 = vmatpush3.bf16.msra.mxu0 %v2400_v60 }
 0xb38   : > { %v4262_v54 = vpop.eup %4261  ;;  %3703 = vmatprep.subr.bf16.mxu0 %v3144_v24 }
 0xb39   : > { %v4264_v25 = vpop.eup %4263  ;;  %v2370_v62 = vmul.f32 %v4262_v54, %v5677_v32  ;;  %v3883_v40 = vpop.permute.xlu1 %3882 }
 0xb3a   : > { %3631 = vmatmul.mubr.bf16.vlgmr.msra.gmra.mrb[80].mxu0 %v2378_v21  ;;  %v4266_v19 = vpop.eup %4265  ;;  %v2367_v45 = vmul.f32 %v4264_v25, %v5649_v17 }
 0xb3b   : > { %3634 = vmatprep.mubr.bf16.mxu0 %v2379_v10  ;;  %v2369_v63 = vmul.f32 %v4266_v19, %v5667_v23  ;;  %v4268_v18 = vpop.eup %4267  ;;  %3705 = vmatpush3.bf16.msra.mxu0 %v3144_v24 }
 0xb3c   : > { %v2380_v27 = vpack.c.bf16 %v2368_v20, %v2367_v45  ;;  %v4270_v51 = vpop.eup %4269  ;;  %v2372_v37 = vmul.f32 %v4268_v18, %v5671_v9  ;;  %3707 = vmatprep.subr.bf16.mxu0 %v3175_v11 }
 0xb3d   : > { %v2381_v8 = vpack.c.bf16 %v2370_v62, %v2369_v63  ;;  %v2371_v13 = vmul.f32 %v4270_v51, %v5665_v26  ;;  %v4272_v17 = vpop.eup %4271  ;;  %v3888_v38 = vpop.permute.xlu1 %3887 }
 0xb3e   : > { %v2373_v42 = vmul.f32 %v4272_v17, %v5679_v4  ;;  %v3176_v4 = vld [vmem:[#allocation7 + $0x10] sm:$0xff]  }
 0xb3f   : > { %v2382_v46 = vpack.c.bf16 %v2372_v37, %v2371_v13  ;;  %3709 = vmatpush3.bf16.msra.mxu0 %v3175_v11  ;;  %3736 = vmatprep.subr.bf16.mxu1 %v3176_v4  ;;  %v3879_v37 = vunpack.i.l.bf16 %v3878_v50  ;;  %v6023_v11 = vld [vmem:[#allocation24_spill] sm:$0xff] }
 0xb40   : > { %3711 = vmatprep.subr.bf16.mxu0 %v3176_v4  ;;  %3744 = vmatpush3.bf16.msra.mxu1 %v3176_v4 }
 0xb41   : > { %v5783_v25 = vpop.permute.xlu1 %3897 }
 0xb42   : > { %3635 = vmatmul.mubr.bf16.gmra.mrb[84].mxu0 %v2380_v27 }
 0xb43   : > { %3638 = vmatprep.mubr.bf16.mxu0 %v2381_v8  ;;  %3713 = vmatpush3.bf16.msra.mxu0 %v3176_v4  ;;  %v3880_v8 = vunpack.i.h.bf16 %v3878_v50 }
 0xb45   : > { %v5785_v20 = vpop.permute.xlu1 %3907 }
 0xb49   : > { %v5789_v45 = vpop.permute.xlu1 %3917 }
 0xb4a   : > { %3639 = vmatmul.mubr.bf16.gmra.mrb[88].mxu0 %v2382_v46 }
 0xb4d   : > { %v5793_v27 = vpop.permute.xlu1 %3927 }
 0xb51   : > { %v5797_v13 = vpop.permute.xlu1 %3937 }
 0xb62   : > { %v2340_v48 = vpop.xlane.xlu0 %2339 }
 0xb63   : > { %4273 = vrcp.f32 %v2340_v48  ;;  %v3890_v48 = vunpack.i.h.bf16 %v3888_v38 }
 0xb64   : > { %4275 = vrcp.f32 %v2342_v49 }
 0xb66   : > { %v2344_v32 = vpop.xlane.xlu0 %2343 }
 0xb67   : > { %4277 = vrcp.f32 %v2344_v32  ;;  %v3889_v32 = vunpack.i.l.bf16 %v3888_v38 }
 0xb6a   : > { %v3873_v3 = vpop.permute.xlu0 %3872 }
 0xb6b   : > { %v3874_v51 = vunpack.i.l.bf16 %v3873_v3  ;;  %v3875_v46 = vunpack.i.h.bf16 %v3873_v3  ;;  %v6026_v3 = vld [vmem:[#allocation17_spill] sm:$0xff] }
 0xb6d   : > { %v4274_v23 = vpop.eup %4273  ;;  %v2706_v4 = vsel %vm737_vm0, %v6023_v11, %v3875_v46  ;;  %v3919_v46 = vunpack.i.l.bf16 %v5789_v45  ;;  %v3940_v11 = vunpack.i.h.bf16 %v5797_v13 }
 0xb6e   : > { %v2374_v44 = vmul.f32 %v4274_v23, %v5721_v59  ;;  %v4276_v1 = vpop.eup %4275  ;;  %v3177_v59 = vld [vmem:[#allocation7 + $0x18] sm:$0xff]   ;;  %v3893_v54 = vpop.permute.xlu0 %3892 }
 0xb6f   : > { %v2375_v26 = vmul.f32 %v4276_v1, %v5673_v33  ;;  %3715 = vmatprep.subr.bf16.mxu0 %v3177_v59  ;;  %3737 = vmatprep.subr.bf16.mxu1 %v3177_v59  ;;  %v3178_v33 = vld [vmem:[#allocation7 + $0x20] sm:$0xff]   ;;  %v6021_v1 = vld [vmem:[#allocation16_spill] sm:$0xff] }
 0xb70   : > { %v2383_v47 = vpack.c.bf16 %v2374_v44, %v2373_v42  ;;  %3717 = vmatpush3.bf16.msra.mxu0 %v3177_v59  ;;  %3745 = vmatpush3.bf16.msra.mxu1 %v3177_v59  ;;  %v6020_v23 = vld [vmem:[#allocation26_spill] sm:$0xff]  ;;  %v3894_v44 = vunpack.i.l.bf16 %v3893_v54  ;;  %v3885_v59 = vunpack.i.h.bf16 %v3883_v40 }
 0xb71   : > { %v4278_v0 = vpop.eup %4277  ;;  %3719 = vmatprep.subr.bf16.mxu0 %v3178_v33  ;;  %3738 = vmatprep.subr.bf16.mxu1 %v3178_v33  ;;  %v2707_v42 = vsel %vm737_vm0, %v6020_v23, %v3880_v8 }
 0xb72   : > { %3642 = vmatprep.mubr.bf16.mxu0 %v2383_v47  ;;  %v2376_v9 = vmul.f32 %v4278_v0, %v5724_v12  ;;  %v3179_v12 = vld [vmem:[#allocation7 + $0x28] sm:$0xff]   ;;  %v3903_v19 = vpop.permute.xlu0 %3902  ;;  %v2698_v47 = vsel %vm737_vm0, %v6021_v1, %v3874_v51  ;;  %v6022_v0 = vld [vmem:[#allocation18_spill] sm:$0xff] }
 0xb74   : > { %v2384_v56 = vpack.c.bf16 %v2376_v9, %v2375_v26  ;;  %3721 = vmatpush3.bf16.msra.mxu0 %v3178_v33  ;;  %3746 = vmatpush3.bf16.msra.mxu1 %v3178_v33  ;;  %v2699_v26 = vsel %vm737_vm0, %v6022_v0, %v3879_v37  ;;  %v3884_v9 = vunpack.i.l.bf16 %v3883_v40  ;;  %v3920_v37 = vunpack.i.h.bf16 %v5789_v45  ;;  %v6029_v45 = vld [vmem:[#allocation30_spill] sm:$0xff] }
 0xb75   : > { %3723 = vmatprep.subr.bf16.mxu0 %v3179_v12  ;;  %3739 = vmatprep.subr.bf16.mxu1 %v3179_v12  ;;  %v2716_v33 = vsel %vm2714_vm1, %v2699_v26, %v3889_v32  ;;  %v3929_v32 = vunpack.i.l.bf16 %v5793_v27  ;;  %v6028_v26 = vld [vmem:[#allocation22_spill] sm:$0xff] }
 0xb76   : > { %3643 = vmatmul.mubr.bf16.gmra.mrb[92].mxu0 %v2384_v56  ;;  %v5787_v62 = vpop.permute.xlu0 %3912  ;;  %v3895_v56 = vunpack.i.h.bf16 %v3893_v54  ;;  %v6027_v54 = vld [vmem:[#allocation25_spill] sm:$0xff] }
 0xb78   : > { %3725 = vmatpush3.bf16.msra.mxu0 %v3179_v12  ;;  %3747 = vmatpush3.bf16.msra.mxu1 %v3179_v12  ;;  %v2724_v12 = vsel %vm2714_vm1, %v2707_v42, %v3890_v48  ;;  %v3930_v48 = vunpack.i.h.bf16 %v5793_v27  ;;  %v3915_v42 = vunpack.i.h.bf16 %v5787_v62 }
 0xb79   : > { %3727 = vmatprep.subr.bf16.mxu0 %v3180_v7  ;;  %3740 = vmatprep.subr.bf16.mxu1 %v3180_v7 }
 0xb7a   : > { %v5791_v63 = vpop.permute.xlu0 %3922 }
 0xb7b   : > { %v3925_v1 = vunpack.i.h.bf16 %v5791_v63 }
 0xb7c   : > { %3729 = vmatpush3.bf16.msra.mxu0 %v3180_v7  ;;  %3748 = vmatpush3.bf16.msra.mxu1 %v3180_v7 }
 0xb7d   : > { %3731 = vmatprep.subr.bf16.mxu0 %v3181_v15  ;;  %3741 = vmatprep.subr.bf16.mxu1 %v3181_v15 }
 0xb7e   : > { %v5795_v18 = vpop.permute.xlu0 %3932 }
 0xb80   : > { %3733 = vmatpush3.bf16.msra.mxu0 %v3181_v15  ;;  %3749 = vmatpush3.bf16.msra.mxu1 %v3181_v15  ;;  %v2723_v15 = vsel %vm2714_vm1, %v2706_v4, %v3885_v59  ;;  %v3935_v4 = vunpack.i.h.bf16 %v5795_v18 }
 0xc0d   : > { %v3632_v41 = vpop.f32.mrb[80].mxu0 }
 0xc0e   : > { %v2443_v43 = vpop.f32.mrb[81].mxu0 }
 0xc0f   : > { %v3633_v57 = vpop.f32.mrb[82].mxu0 }
 0xc10   : > { %v2446_v29 = vpop.f32.mrb[83].mxu0 }
 0xc15   : > { %v3636_v34 = vpop.f32.mrb[84].mxu0 }
 0xc16   : > { %v2459_v35 = vpop.f32.mrb[85].mxu0 }
 0xc17   : > { %v3637_v31 = vpop.f32.mrb[86].mxu0 }
 0xc18   : > { %v2462_v36 = vpop.f32.mrb[87].mxu0 }
 0xc1d   : > { %v3640_v61 = vpop.f32.mrb[88].mxu0 }
 0xc1e   : > { %v3941_v28 = vpack.i.bf16 %v3640_v61, %v3632_v41  ;;  %v2475_v49 = vpop.f32.mrb[89].mxu0  ;;  %v3900_v41 = vunpack.i.h.bf16 %v5783_v25 }
 0xc1f   : > { %v3946_v5 = vpack.i.bf16 %v2475_v49, %v2443_v43  ;;  %v3641_v39 = vpop.f32.mrb[90].mxu0  ;;  %v3899_v43 = vunpack.i.l.bf16 %v5783_v25 }
 0xc20   : > { %v3956_v14 = vpack.i.bf16 %v3641_v39, %v3633_v57  ;;  %3942 = vrot.lane.b32.xlu0 %v3941_v28, %s4480_s27  ;;  %v2478_v52 = vpop.f32.mrb[91].mxu0  ;;  %v3905_v57 = vunpack.i.h.bf16 %v3903_v19  ;;  %v6025_v39 = vld [vmem:[#allocation23_spill] sm:$0xff]  ;;  %v2709_v25 = vsel %vm737_vm0, %v6027_v54, %v3900_v41 }
 0xc21   : > { %v3961_v16 = vpack.i.bf16 %v2478_v52, %v2446_v29  ;;  %v3904_v29 = vunpack.i.l.bf16 %v3903_v19  ;;  %v2701_v38 = vsel %vm737_vm0, %v6026_v3, %v3899_v43  ;;  %v6031_v43 = vld [vmem:[#allocation20_spill] sm:$0xff] }
 0xc22   : > { %3957 = vrot.lane.b32.xlu1 %v3956_v14, %s4480_s27  ;;  %v2708_v14 = vsel %vm737_vm0, %v6025_v39, %v3895_v56  ;;  %v2711_v56 = vsel %vm737_vm0, %v6029_v45, %v3920_v37 }
 0xc24   : > { %3947 = vrot.lane.b32.xlu0 %v3946_v5, %s4480_s27 }
 0xc26   : > { %3962 = vrot.lane.b32.xlu1 %v3961_v16, %s4480_s27 }
 0xc28   : > { %3952 = vrot.lane.b32.xlu0 %v6018_v55, %s4481_s28 }
 0xc2a   : > { %3967 = vrot.lane.b32.xlu1 %v6019_v2, %s4481_s28 }
 0xc49   : > { %v3644_v60 = vpop.f32.mrb[92].mxu0 }
 0xc4a   : > { %v3981_v6 = vpack.i.bf16 %v3644_v60, %v3636_v34  ;;  %v2491_v22 = vpop.f32.mrb[93].mxu0  ;;  %v2715_v34 = vsel %vm2714_vm1, %v2698_v47, %v3884_v9  ;;  %v3910_v60 = vunpack.i.h.bf16 %v5785_v20  ;;  %v3924_v47 = vunpack.i.l.bf16 %v5791_v63 }
 0xc4b   : > { %v3971_v58 = vpack.i.bf16 %v2491_v22, %v2459_v35  ;;  %v3645_v53 = vpop.f32.mrb[94].mxu0  ;;  %v2703_v9 = vsel %vm737_vm0, %v6028_v26, %v3919_v46 }
 0xc4c   : > { %v3986_v21 = vpack.i.bf16 %v3645_v53, %v3637_v31  ;;  %v2494_v30 = vpop.f32.mrb[95].mxu0  ;;  %v2720_v27 = vsel %vm2714_vm1, %v2703_v9, %v3929_v32 }
 0xc4d   : > { %v3976_v10 = vpack.i.bf16 %v2494_v30, %v2462_v36  ;;  %3972 = vrot.lane.b32.xlu0 %v3971_v58, %s4480_s27  ;;  %v6024_v36 = vld [vmem:[#allocation15_spill] sm:$0xff]  ;;  %v2725_v58 = vsel %vm2714_vm1, %v2708_v14, %v3905_v57 }
 0xc4e   : > { %v2700_v61 = vsel %vm737_vm0, %v6024_v36, %v3894_v44  ;;  %v3914_v44 = vunpack.i.l.bf16 %v5787_v62  ;;  %v3934_v62 = vunpack.i.l.bf16 %v5795_v18  ;;  %v6033_v14 = vld [vmem:[#allocation19_spill] sm:$0xff] }
 0xc4f   : > { %3977 = vrot.lane.b32.xlu1 %v3976_v10, %s4480_s27  ;;  %v2717_v22 = vsel %vm2714_vm1, %v2700_v61, %v3904_v29  ;;  %v6032_v29 = vld [vmem:[#allocation28_spill] sm:$0xff] }
 0xc50   : > { %v2702_v57 = vsel %vm737_vm0, %v6031_v43, %v3914_v44 }
 0xc51   : > { %3982 = vrot.lane.b32.xlu0 %v3981_v6, %s4480_s27  ;;  %v3909_v6 = vunpack.i.l.bf16 %v5785_v20  ;;  %v2726_v20 = vsel %vm2714_vm1, %v2709_v25, %v3910_v60 }
 0xc53   : > { %3987 = vrot.lane.b32.xlu1 %v3986_v21, %s4480_s27  ;;  %v2718_v19 = vsel %vm2714_vm1, %v2701_v38, %v3909_v6 }
 0xc92   : > { %v3943_v17 = vpop.permute.xlu0 %3942 }
 0xc93   : > { %v3945_v28 = vunpack.i.h.bf16 %v3943_v17  ;;  %v3944_v49 = vunpack.i.l.bf16 %v3943_v17  ;;  %v3939_v17 = vunpack.i.l.bf16 %v5797_v13  ;;  %v2719_v13 = vsel %vm2714_vm1, %v2702_v57, %v3924_v47 }
 0xc94   : > { %v3958_v24 = vpop.permute.xlu1 %3957 }
 0xc95   : > { %v3960_v53 = vunpack.i.h.bf16 %v3958_v24  ;;  %v3959_v21 = vunpack.i.l.bf16 %v3958_v24  ;;  %v2734_v50 = vsel %vm2731_vm2, %v2717_v22, %v3944_v49  ;;  %v2742_v40 = vsel %vm2731_vm2, %v2725_v58, %v3945_v28 }
 0xc96   : > { %v3948_v7 = vpop.permute.xlu0 %3947  ;;  %v2728_v24 = vsel %vm2714_vm1, %v2711_v56, %v3930_v48 }
 0xc97   : > { %v3950_v35 = vunpack.i.h.bf16 %v3948_v7  ;;  %v3949_v31 = vunpack.i.l.bf16 %v3948_v7  ;;  %v2735_v8 = vsel %vm2731_vm2, %v2718_v19, %v3959_v21  ;;  %v2743_v51 = vsel %vm2731_vm2, %v2726_v20, %v3960_v53 }
 0xc98   : > { %v3963_v5 = vpop.permute.xlu1 %3962  ;;  %v2710_v7 = vsel %vm737_vm0, %v6032_v29, %v3915_v42 }
 0xc99   : > { %v3965_v52 = vunpack.i.h.bf16 %v3963_v5  ;;  %v3964_v16 = vunpack.i.l.bf16 %v3963_v5  ;;  %v2732_v55 = vsel %vm2731_vm2, %v2715_v34, %v3949_v31  ;;  %v2740_v2 = vsel %vm2731_vm2, %v2723_v15, %v3950_v35 }
 0xc9a   : > { %3678 = vmatprep.mubr.f32.mxu0 %v2732_v55  ;;  %3690 = vmatprep.mubr.f32.mxu1 %v2740_v2  ;;  %v3953_v23 = vpop.permute.xlu0 %3952  ;;  %v2727_v15 = vsel %vm2714_vm1, %v2710_v7, %v3925_v1 }
 0xc9b   : > { %v2733_v30 = vsel %vm2731_vm2, %v2716_v33, %v3964_v16  ;;  %v2741_v10 = vsel %vm2731_vm2, %v2724_v12, %v3965_v52  ;;  %v6030_v33 = vld [vmem:[#allocation21_spill] sm:$0xff]  ;;  %v3955_v34 = vunpack.i.h.bf16 %v3953_v23  ;;  %v3954_v35 = vunpack.i.l.bf16 %v3953_v23  ;;  %v6034_v16 = vld [vmem:[#allocation27_spill] sm:$0xff] }
 0xc9c   : > { %3679 = vmatmul.mubr.f32.vlgmr.msra.gmra.mrb[96].mxu0 %v2733_v30  ;;  %3691 = vmatmul.mubr.f32.vlgmr.msra.gmra.mrb[80].mxu1 %v2741_v10  ;;  %v3968_v0 = vpop.permute.xlu1 %3967  ;;  %v2705_v63 = vsel %vm737_vm0, %v6030_v33, %v3939_v17  ;;  %v2704_v52 = vsel %vm737_vm0, %v6033_v14, %v3934_v62  ;;  %v2712_v55 = vsel %vm737_vm0, %v6034_v16, %v3935_v4  ;;  %v6035_v30 = vld [vmem:[#allocation29_spill] sm:$0xff] }
 0xc9d   : > { %3681 = vmatprep.mubr.f32.mxu0 %v2734_v50  ;;  %3693 = vmatprep.mubr.f32.mxu1 %v2742_v40  ;;  %v3970_v49 = vunpack.i.h.bf16 %v3968_v0  ;;  %v3969_v5 = vunpack.i.l.bf16 %v3968_v0  ;;  %v2721_v53 = vsel %vm2714_vm1, %v2704_v52, %v3954_v35  ;;  %v2729_v21 = vsel %vm2714_vm1, %v2712_v55, %v3955_v34 }
 0xc9e   : > { %v2713_v10 = vsel %vm737_vm0, %v6035_v30, %v3940_v11 }
 0xc9f   : > { %v2722_v54 = vsel %vm2714_vm1, %v2705_v63, %v3969_v5  ;;  %v2730_v25 = vsel %vm2714_vm1, %v2713_v10, %v3970_v49 }
 0xca0   : > { %3682 = vmatmul.mubr.f32.gmra.mrb[98].mxu0 %v2735_v8  ;;  %3694 = vmatmul.mubr.f32.gmra.mrb[82].mxu1 %v2743_v51  ;;  %v3135_v8 = vld [vmem:[#allocation8] ss:$0 sm:$0xff] }
 0xcbf   : > { %v3973_v59 = vpop.permute.xlu0 %3972 }
 0xcc0   : > { %v3975_v12 = vunpack.i.h.bf16 %v3973_v59  ;;  %v3974_v41 = vunpack.i.l.bf16 %v3973_v59 }
 0xcc1   : > { %v3978_v31 = vpop.permute.xlu1 %3977 }
 0xcc2   : > { %v3980_v18 = vunpack.i.h.bf16 %v3978_v31  ;;  %v3979_v36 = vunpack.i.l.bf16 %v3978_v31  ;;  %v2736_v61 = vsel %vm2731_vm2, %v2719_v13, %v3974_v41  ;;  %v2744_v28 = vsel %vm2731_vm2, %v2727_v15, %v3975_v12 }
 0xcc3   : > { %v3983_v39 = vpop.permute.xlu0 %3982  ;;  %3684 = vmatprep.mubr.f32.mxu0 %v2736_v61  ;;  %3696 = vmatprep.mubr.f32.mxu1 %v2744_v28 }
 0xcc4   : > { %v3985_v2 = vunpack.i.h.bf16 %v3983_v39  ;;  %v3984_v60 = vunpack.i.l.bf16 %v3983_v39  ;;  %v2737_v6 = vsel %vm2731_vm2, %v2720_v27, %v3979_v36  ;;  %v2745_v22 = vsel %vm2731_vm2, %v2728_v24, %v3980_v18 }
 0xcc5   : > { %v3988_v58 = vpop.permute.xlu1 %3987  ;;  %3685 = vmatmul.mubr.f32.gmra.mrb[100].mxu0 %v2737_v6  ;;  %3697 = vmatmul.mubr.f32.gmra.mrb[84].mxu1 %v2745_v22 }
 0xcc6   : > { %v3990_v50 = vunpack.i.h.bf16 %v3988_v58  ;;  %v3989_v40 = vunpack.i.l.bf16 %v3988_v58  ;;  %v2738_v3 = vsel %vm2731_vm2, %v2721_v53, %v3984_v60  ;;  %v2746_v38 = vsel %vm2731_vm2, %v2729_v21, %v3985_v2 }
 0xcc7   : > { %3687 = vmatprep.mubr.f32.mxu0 %v2738_v3  ;;  %3699 = vmatprep.mubr.f32.mxu1 %v2746_v38 }
 0xcc8   : > { %v2739_v19 = vsel %vm2731_vm2, %v2722_v54, %v3989_v40  ;;  %v2747_v20 = vsel %vm2731_vm2, %v2730_v25, %v3990_v50 }
 0xcc9   : > { %3688 = vmatmul.mubr.f32.gmra.mrb[102].mxu0 %v2739_v19  ;;  %3700 = vmatmul.mubr.f32.gmra.mrb[86].mxu1 %v2747_v20 }
 0xd6f   : > { %v3680_v51 = vpop.f32.mrb[96].mxu0  ;;  %v3692_v37 = vpop.f32.mrb[80].mxu1 }
 0xd70   : > { %v2859_v46 = vadd.f32 %v3680_v51, %v3135_v8  ;;  %v2899_v48 = vadd.f32 %v3692_v37, %v3135_v8  ;;  %v2853_v32 = vpop.f32.mrb[97].mxu0  ;;  %v2893_v17 = vpop.f32.mrb[81].mxu1 }
 0xd71   : > { %v2854_v23 = vadd.f32 %v3135_v8, %v2853_v32  ;;  %v2894_v42 = vadd.f32 %v3135_v8, %v2893_v17 }
 0xd72   : > { %2933 = vst [vmem:[%s5881_s14 + $0x8] sm:$0xff] %v2859_v46  ;;  %2941 = vst [vmem:[%s5881_s14 + $0x48] sm:$0xff] %v2899_v48 }
 0xd73   : > { %2932 = vst [vmem:[%s5881_s14] sm:$0xff] %v2854_v23  ;;  %2940 = vst [vmem:[%s5881_s14 + $0x40] sm:$0xff] %v2894_v42  ;;  %v3683_v44 = vpop.f32.mrb[98].mxu0  ;;  %v3695_v1 = vpop.f32.mrb[82].mxu1 }
 0xd74   : > { %v2869_v47 = vadd.f32 %v3683_v44, %v3135_v8  ;;  %v2909_v0 = vadd.f32 %v3695_v1, %v3135_v8  ;;  %v2863_v26 = vpop.f32.mrb[99].mxu0  ;;  %v2903_v9 = vpop.f32.mrb[83].mxu1 }
 0xd75   : > { %v2864_v45 = vadd.f32 %v3135_v8, %v2863_v26  ;;  %v2904_v56 = vadd.f32 %v3135_v8, %v2903_v9 }
 0xd76   : > { %2935 = vst [vmem:[%s5881_s14 + $0x18] sm:$0xff] %v2869_v47  ;;  %2943 = vst [vmem:[%s5881_s14 + $0x58] sm:$0xff] %v2909_v0 }
 0xd77   : > { %2934 = vst [vmem:[%s5881_s14 + $0x10] sm:$0xff] %v2864_v45  ;;  %2942 = vst [vmem:[%s5881_s14 + $0x50] sm:$0xff] %v2904_v56 }
 0xd98   : > { %v3686_v27 = vpop.f32.mrb[100].mxu0  ;;  %v3698_v24 = vpop.f32.mrb[84].mxu1 }
 0xd99   : > { %v2879_v11 = vadd.f32 %v3686_v27, %v3135_v8  ;;  %v2919_v4 = vadd.f32 %v3698_v24, %v3135_v8  ;;  %v2873_v62 = vpop.f32.mrb[101].mxu0  ;;  %v2913_v59 = vpop.f32.mrb[85].mxu1 }
 0xd9a   : > { %v2874_v33 = vadd.f32 %v3135_v8, %v2873_v62  ;;  %v2914_v63 = vadd.f32 %v3135_v8, %v2913_v59 }
 0xd9b   : > { %2937 = vst [vmem:[%s5881_s14 + $0x28] sm:$0xff] %v2879_v11  ;;  %2945 = vst [vmem:[%s5881_s14 + $0x68] sm:$0xff] %v2919_v4 }
 0xd9c   : > { %2936 = vst [vmem:[%s5881_s14 + $0x20] sm:$0xff] %v2874_v33  ;;  %2944 = vst [vmem:[%s5881_s14 + $0x60] sm:$0xff] %v2914_v63  ;;  %v3689_v12 = vpop.f32.mrb[102].mxu0  ;;  %v3701_v41 = vpop.f32.mrb[86].mxu1 }
 0xd9d   : > { %v2889_v43 = vadd.f32 %v3689_v12, %v3135_v8  ;;  %v2929_v57 = vadd.f32 %v3701_v41, %v3135_v8  ;;  %v2883_v29 = vpop.f32.mrb[103].mxu0  ;;  %v2923_v7 = vpop.f32.mrb[87].mxu1 }
 0xd9e   : > { %v2884_v34 = vadd.f32 %v3135_v8, %v2883_v29  ;;  %v2924_v35 = vadd.f32 %v3135_v8, %v2923_v7 }
 0xd9f   : > { %2939 = vst [vmem:[%s5881_s14 + $0x38] sm:$0xff] %v2889_v43  ;;  %2947 = vst [vmem:[%s5881_s14 + $0x78] sm:$0xff] %v2929_v57 }
 0xda0   : > { %2938 = vst [vmem:[%s5881_s14 + $0x30] sm:$0xff] %v2884_v34  ;;  %2946 = vst [vmem:[%s5881_s14 + $0x70] sm:$0xff] %v2924_v35 }
 0xda1   : > { %4406 = shalt.err (!%p4403_p4)
}
 0xda2   : > { %s4407_s24 = scalar_lea.hbm %s5900_s22, 2048  ;;  %s4411_s28 = scalar_lea.hbm %s5955_s5, 4096 }
 0xda3   : > { %p4408_p9 = scmp.ne.s32.totalorder %s5900_s22, %s4407_s24  ;;  %p4412_p8 = scmp.lt.u32.totalorder %s5900_s22, %s5955_s5 }
 0xda4   : > { %p4413_p13 = scmp.lt.u32.totalorder %s4411_s28, %s4407_s24  ;;  %p4415_p10 = scmp.lt.u32.totalorder %s4407_s24, %s5900_s22 }
 0xda5   : > { %p4409_p0 = pnand %p4408_p9, %p4658_p5 }
 0xda6   : > { %p4414_p6 = por %p4413_p13, %p4412_p8 }
 0xda7   : > { %p4410_p11 = pneg %p4409_p0 }
 0xda8   : > { %p4416_p3 = por %p4415_p10, %p4414_p6 }
 0xdaa   : > { %p4417_p7 = pnand %p4416_p3, %p4410_p11 }
 0xdac   : > { %4420 = shalt.err (!%p4417_p7)
}
 0xdad   : > { %s4484_s7 = smov 128   ;;  %s4485_s11 = smov 8  }
 0xdae   : > { %3796 = dma.vmem_to_hbm [thread:$0]  (%p4658_p5), %s5902_s10, 2048, %s5900_s22, %s2949_s15, %s4484_s7, %s4484_s7, %s4485_s11  }
 0xdaf PF: > { %s2977_s13 = sand.u32 1, %s4455_s18   ;;  %p6036_p12 = scmp.ne.s32.totalorder %s5966_s25, 0 }
 0xdb0   : > { %p6037_p2 = scmp.ge.s32.totalorder %s4467_s21, 2  ;;  %s2978_s16 = scalar_lea.sflag [#allocation4], %s2977_s13 }
 0xdb2   : > { %p3813_p1 = pnand %p6037_p2, %p6036_p12 }
 0xdb4   : > { %4450 = dma.done.wait (!%p3813_p1), %s2978_s16, 2048  }
 0xdb5   : > { %4452 = vsyncadd (!%p3813_p1), %s2978_s16, 4294965248  ;;  %p20_p4 = scmp.ge.s32.totalorder %s4626_s30, 4   ;;  %s6038_s18 = smov %s4459_s19 }
 0xdb6   : > { %s6039_s19 = smov %s4463_s20  ;;  %s6040_s20 = smov %s4654_s29 }
 0xdb7   : > { %s6041_s21 = smov %s4626_s30  ;;  %22 = sbr.rel (!%p20_p4) target bundleno = 7 (0x7), region = 97 }
 0xdbe   :  { %2983 = vsyncpa [#allocation3], 1 }
 0xdbf   :  { %2985 = vsyncpa [#allocation3 + $0x1], 1 }
 0xdc0   :  { %2986 = vsyncpa [#allocation6], 1 }
 0xdc1   :  { %2987 = vsyncpa [#allocation9], 1 }
 0xdc2   :  { %2988 = vsyncpa [#allocation4], 1 }
 0xdc3   :  { %2990 = vsyncpa [#allocation4 + $0x1], 1 }

</bundles_post_ra>
